<compile_context>
chip_gen: v5e
topology: v5e:2x2
jax: 0.10.0
libtpu: 0.0.40
codegen_flags: <defaults>
</compile_context>

<pallas_src>
import functools

import jax
import jax.numpy as jnp
from jax.experimental import pallas as pl
from jax.experimental.pallas import tpu as pltpu

MAT_DIFF_LOSS_SCALE = 0.001


def _pointnet_loss_kernel(logits_ref, target_ref, trans_ref, out_ref, *,
                          total_b, tile_b):
    # Native-dtype tiles; only the small logits tensor is upcast for exp/log.
    logits = logits_ref[...].astype(jnp.float32)          # (TB, C) f32
    target = target_ref[...]                               # (TB, 1) int32
    trans = trans_ref[...]                                  # (TB, d, d) native dtype

    TB, C = logits.shape
    d = trans.shape[1]

    # ---- validity mask for the (possibly partial) tail tile ----
    row_ids = (pl.program_id(0) * tile_b
               + jax.lax.broadcasted_iota(jnp.int32, (TB, 1), 0))        # (TB, 1)
    valid = row_ids < total_b                                            # (TB, 1) bool

    # ---- cross entropy per row: logsumexp(logits) - logits[target] ----
    row_max = jnp.max(logits, axis=-1, keepdims=True)                    # (TB, 1)
    lse = row_max + jnp.log(jnp.sum(jnp.exp(logits - row_max),
                                    axis=-1, keepdims=True))             # (TB, 1)
    cls_iota = jax.lax.broadcasted_iota(jnp.int32, (TB, C), 1)           # (TB, C)
    onehot = (cls_iota == target).astype(jnp.float32)                    # (TB, C)
    tgt_logit = jnp.sum(logits * onehot, axis=-1, keepdims=True)         # (TB, 1)
    ce_rows = lse - tgt_logit                                            # (TB, 1)
    ce_sum = jnp.sum(jnp.where(valid, ce_rows, 0.0))

    # ---- feature transform regularizer: ||T T^T - I||_F per row ----
    # Native (bf16) operands go straight to the MXU; accumulation is f32.
    gram = jnp.einsum("bij,bkj->bik", trans, trans,
                      preferred_element_type=jnp.float32)                # (TB, d, d)
    eye = (jax.lax.broadcasted_iota(jnp.int32, (d, d), 0)
           == jax.lax.broadcasted_iota(jnp.int32, (d, d), 1)).astype(jnp.float32)
    diff = gram - eye[None, :, :]
    sq = jnp.sum(diff * diff, axis=2)                                    # (TB, d)
    fro_rows = jnp.sqrt(jnp.sum(sq, axis=1, keepdims=True))              # (TB, 1)
    fro_sum = jnp.sum(jnp.where(valid, fro_rows, 0.0))

    # ---- emit per-tile partial sums into a lane-dense (8, 128) tile ----
    lane = jax.lax.broadcasted_iota(jnp.int32, (8, 128), 1)
    sub = jax.lax.broadcasted_iota(jnp.int32, (8, 128), 0)
    tile = jnp.where((sub == 0) & (lane == 0), ce_sum,
                     jnp.where((sub == 0) & (lane == 1), fro_sum, 0.0))
    out_ref[...] = tile.reshape(1, 8, 128)


def _choose_tile_b(B, C, d, trans_itemsize, logits_itemsize,
                   budget_bytes=12 << 20):
    """Largest batch tile whose double-buffered footprint fits the VMEM budget."""
    per_row = 2 * (d * d * trans_itemsize + C * logits_itemsize + 4)
    tb = max(1, budget_bytes // per_row)
    if tb >= B:
        return B
    return max(8, (tb // 8) * 8)


def pointnet_debut_loss(logits, target, trans_feat,
                        mat_diff_loss_scale=MAT_DIFF_LOSS_SCALE,
                        feature_transform=True, tile_b=None):
    B, C = logits.shape
    d = trans_feat.shape[1]
    target2d = target.reshape(B, 1).astype(jnp.int32)

    if tile_b is None:
        tile_b = _choose_tile_b(B, C, d,
                                jnp.dtype(trans_feat.dtype).itemsize,
                                jnp.dtype(logits.dtype).itemsize)
    tile_b = min(tile_b, B)
    num_tiles = pl.cdiv(B, tile_b)

    kernel = functools.partial(_pointnet_loss_kernel, total_b=B, tile_b=tile_b)

    partials = pl.pallas_call(
        kernel,
        out_shape=jax.ShapeDtypeStruct((num_tiles, 8, 128), jnp.float32),
        grid=(num_tiles,),
        in_specs=[
            pl.BlockSpec((tile_b, C), lambda i: (i, 0)),
            pl.BlockSpec((tile_b, 1), lambda i: (i, 0)),
            pl.BlockSpec((tile_b, d, d), lambda i: (i, 0, 0)),
        ],
        out_specs=pl.BlockSpec((1, 8, 128), lambda i: (i, 0, 0)),
        compiler_params=pltpu.CompilerParams(
            dimension_semantics=("parallel",),
            vmem_limit_bytes=32 * 1024 * 1024,
        ),
    )(logits, target2d, trans_feat)

    # Tiny final reduction in the wrapper (divide by the TRUE B; tail already masked).
    ce_loss = jnp.sum(partials[:, 0, 0]) / B
    if not feature_transform:
        return ce_loss
    mat_diff_loss = jnp.sum(partials[:, 0, 1]) / B
    return ce_loss + mat_diff_loss * mat_diff_loss_scale


def _reference(logits, target, trans_feat, scale=MAT_DIFF_LOSS_SCALE):
    logits = logits.astype(jnp.float32)
    trans = trans_feat.astype(jnp.float32)
    lse = jax.scipy.special.logsumexp(logits, axis=-1)
    tgt = jnp.take_along_axis(logits, target.reshape(-1, 1).astype(jnp.int32),
                              axis=-1)[:, 0]
    ce = jnp.mean(lse - tgt)
    d = trans.shape[1]
    gram = jnp.einsum("bij,bkj->bik", trans, trans)
    diff = gram - jnp.eye(d, dtype=jnp.float32)[None]
    fro = jnp.sqrt(jnp.sum(diff * diff, axis=(1, 2)))
    return ce + jnp.mean(fro) * scale


if __name__ == "__main__":
    key = jax.random.PRNGKey(0)
    k1, k2, k3 = jax.random.split(key, 3)

    # Small shapes: batch=20 (deliberately not a multiple of 8), 16 classes, 64x64 transform.
    B, C, d = 20, 16, 64
    logits = jax.random.normal(k1, (B, C), dtype=jnp.float32)
    target = jax.random.randint(k2, (B,), 0, C, dtype=jnp.int32)
    trans_feat = jnp.eye(d, dtype=jnp.float32)[None] + \
        0.1 * jax.random.normal(k3, (B, d, d), dtype=jnp.float32)

    ref = _reference(logits, target, trans_feat)

    # (1) default tiling (single tile: TB == B)
    out = jax.block_until_ready(pointnet_debut_loss(logits, target, trans_feat))
    assert jnp.allclose(out, ref, rtol=1e-4, atol=1e-4), (out, ref)

    # (2) forced multi-tile path with a masked tail (grid=3, tile_b=8)
    out_tiled = jax.block_until_ready(
        pointnet_debut_loss(logits, target, trans_feat, tile_b=8))
    assert jnp.allclose(out_tiled, ref, rtol=1e-4, atol=1e-4), (out_tiled, ref)

    # (3) native-bf16 path: no wrapper-side upcast, MXU accumulates in f32
    out_bf16 = jax.block_until_ready(
        pointnet_debut_loss(logits.astype(jnp.bfloat16), target,
                            trans_feat.astype(jnp.bfloat16), tile_b=8))
    ref_bf16 = _reference(logits.astype(jnp.bfloat16), target,
                          trans_feat.astype(jnp.bfloat16))
    assert jnp.allclose(out_bf16, ref_bf16, rtol=5e-2, atol=5e-2), (out_bf16, ref_bf16)

    # (4) cross_entropy-only path (feature_transform=False)
    out_ce = jax.block_until_ready(
        pointnet_debut_loss(logits, target, trans_feat, feature_transform=False))
    lse = jax.scipy.special.logsumexp(logits, axis=-1)
    tgt = jnp.take_along_axis(logits, target.reshape(-1, 1), axis=-1)[:, 0]
    assert jnp.allclose(out_ce, jnp.mean(lse - tgt), rtol=1e-4, atol=1e-4)

    print("KERNEL_OK")
</pallas_src>

<mosaic_0001>
module attributes {stable_mosaic.version = 11 : i64} {
  func.func @_pointnet_loss_kernel(%arg0: i32, %arg1: memref<20x16xf32, #tpu.memory_space<vmem>>, %arg2: memref<20x1xi32, #tpu.memory_space<vmem>>, %arg3: memref<20x64x64xf32, #tpu.memory_space<vmem>>, %arg4: memref<1x8x128xf32, #tpu.memory_space<vmem>>) attributes {dimension_semantics = [#tpu.dimension_semantics<parallel>], iteration_bounds = array<i64: 1>, scalar_prefetch = 0 : i64, scratch_operands = 0 : i64, tpu.core_type = #tpu.core_type<tc>, window_params = [{transform_indices = @transform_0, window_bounds = array<i64: 20, 16>}, {transform_indices = @transform_1, window_bounds = array<i64: 20, 1>}, {transform_indices = @transform_2, window_bounds = array<i64: 20, 64, 64>}, {transform_indices = @transform_3, window_bounds = array<i64: 1, 8, 128>}]} {
    %c0 = arith.constant 0 : index
    %c0_0 = arith.constant 0 : index
    %0 = vector.load %arg1[%c0, %c0_0] : memref<20x16xf32, #tpu.memory_space<vmem>>, vector<20x16xf32>
    %c0_1 = arith.constant 0 : index
    %c0_2 = arith.constant 0 : index
    %1 = vector.load %arg2[%c0_1, %c0_2] : memref<20x1xi32, #tpu.memory_space<vmem>>, vector<20x1xi32>
    %c0_3 = arith.constant 0 : index
    %c0_4 = arith.constant 0 : index
    %c0_5 = arith.constant 0 : index
    %2 = vector.load %arg3[%c0_3, %c0_4, %c0_5] : memref<20x64x64xf32, #tpu.memory_space<vmem>>, vector<20x64x64xf32>
    %c20_i32 = arith.constant 20 : i32
    %3 = arith.muli %arg0, %c20_i32 : i32
    %4 = tpu.iota {dimensions = array<i32: 0>} : vector<20x1xi32>
    %5 = vector.broadcast %3 : i32 to vector<20x1xi32>
    %6 = arith.addi %5, %4 : vector<20x1xi32>
    %c20_i32_6 = arith.constant 20 : i32
    %7 = vector.broadcast %c20_i32_6 : i32 to vector<20x1xi32>
    %8 = arith.cmpi slt, %6, %7 : vector<20x1xi32>
    %cst = arith.constant dense<0xFF800000> : vector<20xf32>
    %9 = vector.multi_reduction <maximumf>, %0, %cst [1] : vector<20x16xf32> to vector<20xf32>
    %10 = vector.shape_cast %9 : vector<20xf32> to vector<20x1xf32>
    %11 = vector.broadcast %10 : vector<20x1xf32> to vector<20x16xf32>
    %12 = arith.subf %0, %11 : vector<20x16xf32>
    %13 = math.exp %12 : vector<20x16xf32>
    %cst_7 = arith.constant dense<0.000000e+00> : vector<20xf32>
    %14 = vector.multi_reduction <add>, %13, %cst_7 [1] : vector<20x16xf32> to vector<20xf32>
    %15 = vector.shape_cast %14 : vector<20xf32> to vector<20x1xf32>
    %16 = math.log %15 : vector<20x1xf32>
    %17 = arith.addf %10, %16 : vector<20x1xf32>
    %18 = tpu.iota {dimensions = array<i32: 1>} : vector<20x16xi32>
    %19 = vector.broadcast %1 : vector<20x1xi32> to vector<20x16xi32>
    %20 = arith.cmpi eq, %18, %19 : vector<20x16xi32>
    %21 = arith.extui %20 : vector<20x16xi1> to vector<20x16xi32>
    %22 = arith.sitofp %21 : vector<20x16xi32> to vector<20x16xf32>
    %23 = arith.mulf %0, %22 : vector<20x16xf32>
    %cst_8 = arith.constant dense<0.000000e+00> : vector<20xf32>
    %24 = vector.multi_reduction <add>, %23, %cst_8 [1] : vector<20x16xf32> to vector<20xf32>
    %25 = vector.shape_cast %24 : vector<20xf32> to vector<20x1xf32>
    %26 = arith.subf %17, %25 : vector<20x1xf32>
    %cst_9 = arith.constant 0.000000e+00 : f32
    %27 = vector.broadcast %cst_9 : f32 to vector<20x1xf32>
    %28 = arith.select %8, %26, %27 : vector<20x1xi1>, vector<20x1xf32>
    %29 = vector.shape_cast %28 : vector<20x1xf32> to vector<1x20x1xf32>
    %cst_10 = arith.constant dense<0.000000e+00> : vector<1xf32>
    %30 = vector.multi_reduction <add>, %29, %cst_10 [1, 2] : vector<1x20x1xf32> to vector<1xf32>
    %31 = vector.shape_cast %30 : vector<1xf32> to vector<1x1x1xf32>
    %32 = vector.extract %31[0, 0, 0] : f32 from vector<1x1x1xf32>
    "tpu.trace_start"() <{level = 10 : i32, message = "bij,bkj->bik"}> : () -> ()
    %cst_11 = arith.constant dense<0.000000e+00> : vector<20x64x64xf32>
    %33 = tpu.matmul %2, %2, %cst_11 {dimension_numbers = #tpu.dot_dimension_numbers<[2], [2], [1], [1], [0, 0, 0, 1, 1, 1], [0], [0]>} : vector<20x64x64xf32>, vector<20x64x64xf32>, vector<20x64x64xf32> -> vector<20x64x64xf32>
    "tpu.trace_stop"() : () -> ()
    %34 = tpu.iota {dimensions = array<i32: 0>} : vector<64x64xi32>
    %35 = tpu.iota {dimensions = array<i32: 1>} : vector<64x64xi32>
    %36 = arith.cmpi eq, %34, %35 : vector<64x64xi32>
    %37 = arith.extui %36 : vector<64x64xi1> to vector<64x64xi32>
    %38 = arith.sitofp %37 : vector<64x64xi32> to vector<64x64xf32>
    %39 = vector.shape_cast %38 : vector<64x64xf32> to vector<1x64x64xf32>
    %40 = vector.broadcast %39 : vector<1x64x64xf32> to vector<20x64x64xf32>
    %41 = arith.subf %33, %40 : vector<20x64x64xf32>
    %42 = arith.mulf %41, %41 : vector<20x64x64xf32>
    %cst_12 = arith.constant dense<0.000000e+00> : vector<20x64xf32>
    %43 = vector.multi_reduction <add>, %42, %cst_12 [2] : vector<20x64x64xf32> to vector<20x64xf32>
    %cst_13 = arith.constant dense<0.000000e+00> : vector<20xf32>
    %44 = vector.multi_reduction <add>, %43, %cst_13 [1] : vector<20x64xf32> to vector<20xf32>
    %45 = vector.shape_cast %44 : vector<20xf32> to vector<20x1xf32>
    %46 = math.sqrt %45 : vector<20x1xf32>
    %cst_14 = arith.constant 0.000000e+00 : f32
    %47 = vector.broadcast %cst_14 : f32 to vector<20x1xf32>
    %48 = arith.select %8, %46, %47 : vector<20x1xi1>, vector<20x1xf32>
    %49 = vector.shape_cast %48 : vector<20x1xf32> to vector<1x20x1xf32>
    %cst_15 = arith.constant dense<0.000000e+00> : vector<1xf32>
    %50 = vector.multi_reduction <add>, %49, %cst_15 [1, 2] : vector<1x20x1xf32> to vector<1xf32>
    %51 = vector.shape_cast %50 : vector<1xf32> to vector<1x1x1xf32>
    %52 = vector.extract %51[0, 0, 0] : f32 from vector<1x1x1xf32>
    %53 = tpu.iota {dimensions = array<i32: 1>} : vector<8x128xi32>
    %54 = tpu.iota {dimensions = array<i32: 0>} : vector<8x128xi32>
    %c0_i32 = arith.constant 0 : i32
    %55 = vector.broadcast %c0_i32 : i32 to vector<8x128xi32>
    %56 = arith.cmpi eq, %54, %55 : vector<8x128xi32>
    %c0_i32_16 = arith.constant 0 : i32
    %57 = vector.broadcast %c0_i32_16 : i32 to vector<8x128xi32>
    %58 = arith.cmpi eq, %53, %57 : vector<8x128xi32>
    %59 = arith.andi %56, %58 : vector<8x128xi1>
    %c0_i32_17 = arith.constant 0 : i32
    %60 = vector.broadcast %c0_i32_17 : i32 to vector<8x128xi32>
    %61 = arith.cmpi eq, %54, %60 : vector<8x128xi32>
    %c1_i32 = arith.constant 1 : i32
    %62 = vector.broadcast %c1_i32 : i32 to vector<8x128xi32>
    %63 = arith.cmpi eq, %53, %62 : vector<8x128xi32>
    %64 = arith.andi %61, %63 : vector<8x128xi1>
    %cst_18 = arith.constant 0.000000e+00 : f32
    %65 = vector.broadcast %52 : f32 to vector<8x128xf32>
    %66 = vector.broadcast %cst_18 : f32 to vector<8x128xf32>
    %67 = arith.select %64, %65, %66 : vector<8x128xi1>, vector<8x128xf32>
    %68 = vector.broadcast %32 : f32 to vector<8x128xf32>
    %69 = arith.select %59, %68, %67 : vector<8x128xi1>, vector<8x128xf32>
    %70 = vector.shape_cast %69 : vector<8x128xf32> to vector<1x8x128xf32>
    %c0_19 = arith.constant 0 : index
    %c0_20 = arith.constant 0 : index
    %c0_21 = arith.constant 0 : index
    %71 = vector.load %arg4[%c0_19, %c0_20, %c0_21] : memref<1x8x128xf32, #tpu.memory_space<vmem>>, vector<1x8x128xf32>
    tpu.vector_store %arg4[%c0_19, %c0_20, %c0_21], %70 {strides = array<i32>} : memref<1x8x128xf32, #tpu.memory_space<vmem>>, vector<1x8x128xf32>,
    return
  }
  func.func @transform_0(%arg0: i32) -> (i32, i32) {
    %c0_i32 = arith.constant 0 : i32
    %c0_i32_0 = arith.constant 0 : i32
    return %arg0, %c0_i32 : i32, i32
  }
  func.func @transform_1(%arg0: i32) -> (i32, i32) {
    %c0_i32 = arith.constant 0 : i32
    %c0_i32_0 = arith.constant 0 : i32
    return %arg0, %c0_i32 : i32, i32
  }
  func.func @transform_2(%arg0: i32) -> (i32, i32, i32) {
    %c0_i32 = arith.constant 0 : i32
    %c0_i32_0 = arith.constant 0 : i32
    %c0_i32_1 = arith.constant 0 : i32
    return %arg0, %c0_i32, %c0_i32_0 : i32, i32, i32
  }
  func.func @transform_3(%arg0: i32) -> (i32, i32, i32) {
    %c0_i32 = arith.constant 0 : i32
    %c0_i32_0 = arith.constant 0 : i32
    %c0_i32_1 = arith.constant 0 : i32
    return %arg0, %c0_i32, %c0_i32_0 : i32, i32, i32
  }
}

</mosaic_0001>

<bundles_post_ra>
// kernel: tpu_custom_call.1
= control target key start
LH: loop header
LB: loop body
LE: loop exit
PB: predicated region body
PF: predicated region fallthrough
CT: control target
= control target key end

     0   :  { %8 = vsyncpa [#allocation3], 0  ;;  %s5422_s0 = inlined_call_operand.vmem [shape: f32[20,16], index: 0, kind: input, shape index: {}]   ;;  %s5423_s1 = inlined_call_operand.vmem [shape: s32[20,1], index: 1, kind: input, shape index: {}]   ;;  %s5424_s2 = inlined_call_operand.hbm [shape: f32[20,64,64], index: 2, kind: input, shape index: {}]   ;;  %s5425_s3 = inlined_call_operand.hbm [shape: f32[1,8,128], index: 3, kind: output, shape index: {}]  }
   0x1   :  { %9 = vsyncpa [#allocation4], 0  ;;  %s18_s14 = sshll.u32 %s5424_s2, 4  ;;  %s3436_s15 = smov [#allocation2]   ;;  %s19_s14 = int_to_ptr.hbm [resolvable:$true] %s18_s14 }
   0x2   :  { %s20_s16 = sshll.u32 %s3436_s15, 4  ;;  %s3437_s17 = smov 128   ;;  %s21_s16 = int_to_ptr.vmem [resolvable:$true] %s20_s16 }
   0x3   :  { %s3438_s18 = smov 8  }
   0x4   :  { %26 = dma.hbm_to_vmem [thread:$0]  %s19_s14, 20480, %s21_s16, [#allocation3], %s3437_s17, %s3437_s17, %s3438_s18  }
   0x5   :  { %3432 = dma.done.wait [#allocation3], 20480  }
   0x6   :  { %3433 = vsyncadd [#allocation3], 4294946816  ;;  %v3439_v0 = vmov 0   ;;  %vm301_vm0 = vcmask 523264   ;;  %vm216_vm1 = vcmask 125952   ;;  %vm209_vm2 = vcmask 130048  }
   0x7   :  { %3364 = vset.pattern.permute.xlu1 %v3439_v0  ;;  %3363 = vset.pattern.permute.xlu0 %v3439_v0  ;;  %v3465_v1 = vld [vmem:[#allocation2 + $0x38] sm:$0xff]  ;;  %v3478_v4 = vld [vmem:[%s5422_s0 + $0x10] sm:$0xf]  ;;  %v3483_v5 = vld [vmem:[%s5422_s0] sm:$0xff]  ;;  %vm285_vm15 = vcmask 7168   ;;  %s3441_s29 = smov [#allocation5]  }
   0x8   :  { %3365 = vset.pattern.permute.xlu2 %v3439_v0  ;;  %v3467_v2 = vld [vmem:[#allocation2 + $0xb8] sm:$0xff]  ;;  %3025 = vmatpush.xpose.msk.msra.mxu0 %vm301_vm0, %v3465_v1  ;;  %v217_v6 = vsel %vm216_vm1, %v3478_v4, -inf  ;;  %v210_v7 = vsel %vm209_vm2, %v3483_v5, -inf  ;;  %v3491_v8 = vld [vmem:[#allocation2 + $0x30] sm:$0xff]  ;;  %v3508_v12 = vld [vmem:[%s5422_s0 + $0x8] sm:$0xff]  ;;  %s3010_s30 = sshll.u32 %s3441_s29, 4  ;;  %s3011_s30 = int_to_ptr.vmem [resolvable:$true] %s3010_s30 }
   0x9   :  { %v3469_v3 = vld [vmem:[#allocation2 + $0xf8] sm:$0xff]  ;;  %3057 = vmatpush.xpose.msk.msra.mxu2 %vm301_vm0, %v3467_v2  ;;  %v3493_v9 = vld [vmem:[#allocation2 + $0xb0] sm:$0xff]  ;;  %218 = vmax.xlane.f32.xlu1 %v217_v6  ;;  %v3514_v14 = vld [vmem:[#allocation2 + $0x28] sm:$0xff]  ;;  %v213_v17 = vsel %vm209_vm2, %v3508_v12, -inf  ;;  %s3012_s6 = sshll.u32 %s5425_s3, 4  ;;  %s3013_s6 = int_to_ptr.hbm [resolvable:$true] %s3012_s6 }
   0xa   :  { %3073 = vmatpush.xpose.msk.msra.mxu3 %vm301_vm0, %v3469_v3  ;;  %v3495_v10 = vld [vmem:[#allocation2 + $0x78] sm:$0xff]  ;;  %211 = vmax.xlane.f32.xlu0 %v210_v7  ;;  %v3497_v11 = vld [vmem:[#allocation2 + $0xf0] sm:$0xff]  ;;  %v3516_v15 = vld [vmem:[#allocation2 + $0xa8] sm:$0xff] }
   0xb   :  { %3041 = vmatpush.xpose.msk.msra.mxu1 %vm301_vm0, %v3495_v10  ;;  %v3510_v13 = vld [vmem:[#allocation2 + $0x70] sm:$0xff]  ;;  %v3518_v16 = vld [vmem:[#allocation2 + $0xe8] sm:$0xff]  ;;  %v3532_v19 = vld [vmem:[#allocation2 + $0x20] sm:$0xff] }
   0xc   :  { %3026 = vmatpush.xpose.msk.msra.mxu0 %vm301_vm0, %v3491_v8  ;;  %v3528_v18 = vld [vmem:[#allocation2 + $0x68] sm:$0xff]  ;;  %v3534_v20 = vld [vmem:[#allocation2 + $0xa0] sm:$0xff]  ;;  %v3548_v23 = vld [vmem:[#allocation2 + $0x18] sm:$0xff] }
   0xd   :  { %3058 = vmatpush.xpose.msk.msra.mxu2 %vm301_vm0, %v3493_v9  ;;  %v3536_v21 = vld [vmem:[#allocation2 + $0xe0] sm:$0xff]  ;;  %v3550_v24 = vld [vmem:[#allocation2 + $0x98] sm:$0xff]  ;;  %v3564_v27 = vld [vmem:[#allocation2 + $0x10] sm:$0xff] }
   0xe   :  { %3074 = vmatpush.xpose.msk.msra.mxu3 %vm301_vm0, %v3497_v11  ;;  %v3544_v22 = vld [vmem:[#allocation2 + $0x60] sm:$0xff]  ;;  %v3552_v25 = vld [vmem:[#allocation2 + $0xd8] sm:$0xff]  ;;  %v55_v28 = vld [vmem:[#allocation2 + $0x90] sm:$0xff] }
   0xf   :  { %3042 = vmatpush.xpose.msk.msra.mxu1 %vm301_vm0, %v3510_v13  ;;  %v3560_v26 = vld [vmem:[#allocation2 + $0x58] sm:$0xff]  ;;  %v3566_v29 = vld [vmem:[#allocation2 + $0xd0] sm:$0xff]  ;;  %v38_v31 = vld [vmem:[#allocation2 + $0x8] sm:$0xff] }
  0x10   :  { %3027 = vmatpush.xpose.msk.msra.mxu0 %vm301_vm0, %v3514_v14  ;;  %v3573_v30 = vld [vmem:[#allocation2 + $0x50] sm:$0xff]  ;;  %v54_v32 = vld [vmem:[#allocation2 + $0x88] sm:$0xff]  ;;  %v37_v37 = vld [vmem:[#allocation2] sm:$0xff] }
  0x11   :  { %3059 = vmatpush.xpose.msk.msra.mxu2 %vm301_vm0, %v3516_v15  ;;  %v62_v33 = vld [vmem:[#allocation2 + $0xc8] sm:$0xff]  ;;  %v36_v36 = vld [vmem:[%s5423_s1 + $0x10] sm:$0xf]  ;;  %v53_v38 = vld [vmem:[#allocation2 + $0x80] sm:$0xff] }
  0x12   :  { %3075 = vmatpush.xpose.msk.msra.mxu3 %vm301_vm0, %v3518_v16  ;;  %214 = vmax.xlane.f32.xlu0 %v213_v17  ;;  %v35_v34 = vld [vmem:[%s5423_s1 + $0x8] sm:$0xff]  ;;  %v61_v39 = vld [vmem:[#allocation2 + $0xc0] sm:$0xff]  ;;  %v3588_v40 = vld [vmem:[#allocation2 + $0x1b8] sm:$0xff] }
  0x13   :  { %3043 = vmatpush.xpose.msk.msra.mxu1 %vm301_vm0, %v3528_v18  ;;  %v46_v35 = vld [vmem:[#allocation2 + $0x48] sm:$0xff]  ;;  %256 = vperm.xlu2 %3365, %v36_v36   ;;  %v34_v41 = vld [vmem:[%s5423_s1] sm:$0xff]  ;;  %v3594_v42 = vld [vmem:[#allocation2 + $0x138] sm:$0xff] }
  0x14   :  { %3028 = vmatpush.xpose.msk.msra.mxu0 %vm301_vm0, %v3532_v19  ;;  %v45_v43 = vld [vmem:[#allocation2 + $0x40] sm:$0xff]  ;;  %v3603_v44 = vld [vmem:[#allocation2 + $0x1b0] sm:$0xff]  ;;  %v3605_v45 = vld [vmem:[#allocation2 + $0x1f8] sm:$0xff] }
  0x15   :  { %3060 = vmatpush.xpose.msk.msra.mxu2 %vm301_vm0, %v3534_v20  ;;  %v3611_v46 = vld [vmem:[#allocation2 + $0x130] sm:$0xff]  ;;  %v3613_v47 = vld [vmem:[#allocation2 + $0x178] sm:$0xff]  ;;  %v3623_v48 = vld [vmem:[#allocation2 + $0x1a8] sm:$0xff] }
  0x16   :  { %3076 = vmatpush.xpose.msk.msra.mxu3 %vm301_vm0, %v3536_v21  ;;  %v3625_v49 = vld [vmem:[#allocation2 + $0x1f0] sm:$0xff]  ;;  %v3634_v50 = vld [vmem:[#allocation2 + $0x128] sm:$0xff]  ;;  %v3638_v52 = vld [vmem:[#allocation2 + $0x1a0] sm:$0xff] }
  0x17   :  { %3044 = vmatpush.xpose.msk.msra.mxu1 %vm301_vm0, %v3544_v22  ;;  %v3636_v51 = vld [vmem:[#allocation2 + $0x170] sm:$0xff]  ;;  %v3643_v53 = vld [vmem:[#allocation2 + $0x1e8] sm:$0xff]  ;;  %v3655_v54 = vld [vmem:[#allocation2 + $0x120] sm:$0xff] }
  0x18   :  { %3029 = vmatpush.xpose.msk.msra.mxu0 %vm301_vm0, %v3548_v23  ;;  %v3657_v55 = vld [vmem:[#allocation2 + $0x168] sm:$0xff]  ;;  %v3659_v56 = vld [vmem:[#allocation2 + $0x198] sm:$0xff]  ;;  %v3665_v57 = vld [vmem:[#allocation2 + $0x1e0] sm:$0xff] }
  0x19   :  { %3061 = vmatpush.xpose.msk.msra.mxu2 %vm301_vm0, %v3550_v24  ;;  %v3671_v58 = vld [vmem:[#allocation2 + $0x118] sm:$0xff]  ;;  %v3675_v59 = vld [vmem:[#allocation2 + $0x160] sm:$0xff]  ;;  %v87_v60 = vld [vmem:[#allocation2 + $0x190] sm:$0xff] }
  0x1a   :  { %3077 = vmatpush.xpose.msk.msra.mxu3 %vm301_vm0, %v3552_v25  ;;  %v3679_v61 = vld [vmem:[#allocation2 + $0x1d8] sm:$0xff]  ;;  %v86_v63 = vld [vmem:[#allocation2 + $0x188] sm:$0xff]  ;;  %v71_v0 = vld [vmem:[#allocation2 + $0x110] sm:$0xff] }
  0x1b   :  { %3045 = vmatpush.xpose.msk.msra.mxu1 %vm301_vm0, %v3560_v26  ;;  %v80_v62 = vld [vmem:[#allocation2 + $0x158] sm:$0xff]  ;;  %v95_v6 = vld [vmem:[#allocation2 + $0x1d0] sm:$0xff]  ;;  %v85_v17 = vld [vmem:[#allocation2 + $0x180] sm:$0xff] }
  0x1c   :  { %3030 = vmatpush.xpose.msk.msra.mxu0 %vm301_vm0, %v3564_v27  ;;  %v79_v7 = vld [vmem:[#allocation2 + $0x150] sm:$0xff]  ;;  %v3825_v36 = vld [vmem:[#allocation2 + $0x228] sm:$0xff] }
  0x1d   :  { %3062 = vmatpush.xpose.msk.msra.mxu2 %vm301_vm0, %v55_v28 }
  0x1e   :  { %3078 = vmatpush.xpose.msk.msra.mxu3 %vm301_vm0, %v3566_v29 }
  0x1f   :  { %3046 = vmatpush.xpose.msk.msra.mxu1 %vm301_vm0, %v3573_v30 }
  0x20   :  { %3031 = vmatpush.xpose.msk.msra.mxu0 %vm301_vm0, %v38_v31 }
  0x21   :  { %3063 = vmatpush.xpose.msk.msra.mxu2 %vm301_vm0, %v54_v32 }
  0x22   :  { %3079 = vmatpush.xpose.msk.msra.mxu3 %vm301_vm0, %v62_v33  ;;  %253 = vperm.xlu1 %3364, %v35_v34   ;;  %v3821_v34 = vld [vmem:[#allocation2 + $0x270] sm:$0xff] }
  0x23   :  { %3047 = vmatpush.xpose.msk.msra.mxu1 %vm301_vm0, %v46_v35 }
  0x24   :  { %3032 = vmatpush.xpose.msk.msra.mxu0 %vm301_vm0, %v37_v37 }
  0x25   :  { %3064 = vmatpush.xpose.msk.msra.mxu2 %vm301_vm0, %v53_v38 }
  0x26   :  { %3080 = vmatpush.xpose.msk.msra.mxu3 %vm301_vm0, %v61_v39  ;;  %250 = vperm.xlu0 %3363, %v34_v41  }
  0x27   :  { %3033 = vmatmul.msk.f32.vlgmr.msra.gmra.mxu0 %vm301_vm0, %v37_v37  ;;  %3048 = vmatpush.xpose.msk.msra.mxu1 %vm301_vm0, %v45_v43 }
  0x28   :  { %3089 = vmatpush.xpose.msk.msrb.mxu0 %vm301_vm0, %v3594_v42  ;;  %3065 = vmatmul.msk.f32.vlgmr.msra.gmra.mxu2 %vm301_vm0, %v53_v38  ;;  %v3832_v38 = vld [vmem:[#allocation2 + $0x2e8] sm:$0xff] }
  0x29   :  { %3121 = vmatpush.xpose.msk.msrb.mxu2 %vm301_vm0, %v3588_v40  ;;  %3081 = vmatmul.msk.f32.vlgmr.msra.gmra.mxu3 %vm301_vm0, %v61_v39 }
  0x2a   :  { %3137 = vmatpush.xpose.msk.msrb.mxu3 %vm301_vm0, %v3605_v45  ;;  %3049 = vmatmul.msk.f32.vlgmr.msra.gmra.mxu1 %vm301_vm0, %v45_v43 }
  0x2b   :  { %3105 = vmatpush.xpose.msk.msrb.mxu1 %vm301_vm0, %v3613_v47 }
  0x2c   :  { %3090 = vmatpush.xpose.msk.msrb.mxu0 %vm301_vm0, %v3611_v46 }
  0x2d   :  { %3122 = vmatpush.xpose.msk.msrb.mxu2 %vm301_vm0, %v3603_v44 }
  0x2e   :  { %3138 = vmatpush.xpose.msk.msrb.mxu3 %vm301_vm0, %v3625_v49 }
  0x2f   :  { %3034 = vmatmul.msk.f32.gmra.mxu0 %vm301_vm0, %v38_v31  ;;  %3106 = vmatpush.xpose.msk.msrb.mxu1 %vm301_vm0, %v3636_v51  ;;  %v3816_v31 = vld [vmem:[#allocation2 + $0x2f0] sm:$0xff] }
  0x30   :  { %3066 = vmatmul.msk.f32.gmra.mxu2 %vm301_vm0, %v54_v32  ;;  %3091 = vmatpush.xpose.msk.msrb.mxu0 %vm301_vm0, %v3634_v50 }
  0x31   :  { %3123 = vmatpush.xpose.msk.msrb.mxu2 %vm301_vm0, %v3623_v48  ;;  %3082 = vmatmul.msk.f32.gmra.mxu3 %vm301_vm0, %v62_v33 }
  0x32   :  { %3139 = vmatpush.xpose.msk.msrb.mxu3 %vm301_vm0, %v3643_v53  ;;  %3050 = vmatmul.msk.f32.gmra.mxu1 %vm301_vm0, %v46_v35  ;;  %v3823_v35 = vld [vmem:[#allocation2 + $0x2a8] sm:$0xff] }
  0x33   :  { %3107 = vmatpush.xpose.msk.msrb.mxu1 %vm301_vm0, %v3657_v55 }
  0x34   :  { %3092 = vmatpush.xpose.msk.msrb.mxu0 %vm301_vm0, %v3655_v54 }
  0x35   :  { %3124 = vmatpush.xpose.msk.msrb.mxu2 %vm301_vm0, %v3638_v52 }
  0x36   :  { %3140 = vmatpush.xpose.msk.msrb.mxu3 %vm301_vm0, %v3665_v57 }
  0x37   :  { %3035 = vmatmul.msk.f32.gmra.mxu0 %vm301_vm0, %v3564_v27  ;;  %3108 = vmatpush.xpose.msk.msrb.mxu1 %vm301_vm0, %v3675_v59  ;;  %v69_v27 = vld [vmem:[#allocation2 + $0x100] sm:$0xff] }
  0x38   :  { %3067 = vmatmul.msk.f32.gmra.mxu2 %vm301_vm0, %v55_v28  ;;  %3093 = vmatpush.xpose.msk.msrb.mxu0 %vm301_vm0, %v3671_v58  ;;  %v93_v28 = vld [vmem:[#allocation2 + $0x1c0] sm:$0xff] }
  0x39   :  { %3083 = vmatmul.msk.f32.gmra.mxu3 %vm301_vm0, %v3566_v29  ;;  %3125 = vmatpush.xpose.msk.msrb.mxu2 %vm301_vm0, %v3659_v56 }
  0x3a   :  { %3051 = vmatmul.msk.f32.gmra.mxu1 %vm301_vm0, %v3573_v30  ;;  %3141 = vmatpush.xpose.msk.msrb.mxu3 %vm301_vm0, %v3679_v61 }
  0x3b   :  { %3109 = vmatpush.xpose.msk.msrb.mxu1 %vm301_vm0, %v80_v62 }
  0x3c   :  { %3094 = vmatpush.xpose.msk.msrb.mxu0 %vm301_vm0, %v71_v0 }
  0x3d   :  { %3126 = vmatpush.xpose.msk.msrb.mxu2 %vm301_vm0, %v87_v60 }
  0x3e   :  { %3142 = vmatpush.xpose.msk.msrb.mxu3 %vm301_vm0, %v95_v6 }
  0x3f   :  { %3036 = vmatmul.msk.f32.gmra.mxu0 %vm301_vm0, %v3548_v23  ;;  %v70_v23 = vld [vmem:[#allocation2 + $0x108] sm:$0xff]  ;;  %3110 = vmatpush.xpose.msk.msrb.mxu1 %vm301_vm0, %v79_v7 }
  0x40   :  { %3068 = vmatmul.msk.f32.gmra.mxu2 %vm301_vm0, %v3550_v24  ;;  %3095 = vmatpush.xpose.msk.msrb.mxu0 %vm301_vm0, %v70_v23  ;;  %v78_v24 = vld [vmem:[#allocation2 + $0x148] sm:$0xff] }
  0x41   :  { %3084 = vmatmul.msk.f32.gmra.mxu3 %vm301_vm0, %v3552_v25  ;;  %3127 = vmatpush.xpose.msk.msrb.mxu2 %vm301_vm0, %v86_v63  ;;  %v94_v25 = vld [vmem:[#allocation2 + $0x1c8] sm:$0xff] }
  0x42   :  { %3052 = vmatmul.msk.f32.gmra.mxu1 %vm301_vm0, %v3560_v26  ;;  %3143 = vmatpush.xpose.msk.msrb.mxu3 %vm301_vm0, %v94_v25  ;;  %v77_v26 = vld [vmem:[#allocation2 + $0x140] sm:$0xff] }
  0x43   :  { %3111 = vmatpush.xpose.msk.msrb.mxu1 %vm301_vm0, %v78_v24 }
  0x44   :  { %3096 = vmatpush.xpose.msk.msrb.mxu0 %vm301_vm0, %v69_v27 }
  0x45   :  { %3128 = vmatpush.xpose.msk.msrb.mxu2 %vm301_vm0, %v85_v17 }
  0x46   :  { %3144 = vmatpush.xpose.msk.msrb.mxu3 %vm301_vm0, %v93_v28 }
  0x47   :  { %3037 = vmatmul.msk.f32.gmra.mxu0 %vm301_vm0, %v3532_v19  ;;  %3112 = vmatpush.xpose.msk.msrb.mxu1 %vm301_vm0, %v77_v26  ;;  %v3788_v19 = vld [vmem:[#allocation2 + $0x2b0] sm:$0xff] }
  0x48   :  { %3069 = vmatmul.msk.f32.gmra.mxu2 %vm301_vm0, %v3534_v20  ;;  %v3790_v20 = vld [vmem:[#allocation2 + $0x2f8] sm:$0xff] }
  0x49   :  { %3085 = vmatmul.msk.f32.gmra.mxu3 %vm301_vm0, %v3536_v21 }
  0x4a   :  { %3053 = vmatmul.msk.f32.gmra.mxu1 %vm301_vm0, %v3544_v22  ;;  %3201 = vmatpush.xpose.msk.msra.mxu3 %vm301_vm0, %v3790_v20  ;;  %v3802_v22 = vld [vmem:[#allocation2 + $0x230] sm:$0xff] }
  0x4e   :  { %3202 = vmatpush.xpose.msk.msra.mxu3 %vm301_vm0, %v3816_v31 }
  0x4f   :  { %3038 = vmatmul.msk.f32.gmra.mxu0 %vm301_vm0, %v3514_v14  ;;  %v3775_v14 = vld [vmem:[#allocation2 + $0x238] sm:$0xff] }
  0x50   :  { %3070 = vmatmul.msk.f32.gmra.mxu2 %vm301_vm0, %v3516_v15  ;;  %3153 = vmatpush.xpose.msk.msra.mxu0 %vm301_vm0, %v3775_v14 }
  0x51   :  { %3086 = vmatmul.msk.f32.gmra.mxu3 %vm301_vm0, %v3518_v16 }
  0x52   :  { %3054 = vmatmul.msk.f32.gmra.mxu1 %vm301_vm0, %v3528_v18  ;;  %v3786_v18 = vld [vmem:[#allocation2 + $0x278] sm:$0xff]  ;;  %3203 = vmatpush.xpose.msk.msra.mxu3 %vm301_vm0, %v3832_v38 }
  0x53   :  { %3169 = vmatpush.xpose.msk.msra.mxu1 %vm301_vm0, %v3786_v18 }
  0x54   :  { %3154 = vmatpush.xpose.msk.msra.mxu0 %vm301_vm0, %v3802_v22 }
  0x57   :  { %3039 = vmatmul.msk.f32.gmra.mxu0 %vm301_vm0, %v3491_v8  ;;  %v3440_v8 = vmov 0.0   ;;  %3170 = vmatpush.xpose.msk.msra.mxu1 %vm301_vm0, %v3821_v34 }
  0x58   :  { %3071 = vmatmul.msk.f32.gmra.mxu2 %vm301_vm0, %v3493_v9  ;;  %3155 = vmatpush.xpose.msk.msra.mxu0 %vm301_vm0, %v3825_v36 }
  0x59   :  { %3087 = vmatmul.msk.f32.gmra.mxu3 %vm301_vm0, %v3497_v11 }
  0x5a   :  { %3055 = vmatmul.msk.f32.gmra.mxu1 %vm301_vm0, %v3510_v13 }
  0x5f   :  { %3040 = vmatmul.msk.f32.gmra.mxu0 %vm301_vm0, %v3465_v1  ;;  %v198_v1 = vlaneseq }
  0x60   :  { %3072 = vmatmul.msk.f32.gmra.mxu2 %vm301_vm0, %v3467_v2 }
  0x61   :  { %3088 = vmatmul.msk.f32.gmra.mxu3 %vm301_vm0, %v3469_v3  ;;  %v3753_v2 = vand.u32 127, %v198_v1 }
  0x62   :  { %3056 = vmatmul.msk.f32.gmra.mxu1 %vm301_vm0, %v3495_v10  ;;  %v3764_v10 = vld [vmem:[#allocation2 + $0x2b8] sm:$0xff] }
  0x63   :  { %3185 = vmatpush.xpose.msk.msra.mxu2 %vm301_vm0, %v3764_v10 }
  0x67   :  { %3097 = vmatmul.msk.f32.vlgmr.msrb.gmra.mxu0 %vm301_vm0, %v69_v27  ;;  %3186 = vmatpush.xpose.msk.msra.mxu2 %vm301_vm0, %v3788_v19 }
  0x68   :  { %3129 = vmatmul.msk.f32.vlgmr.msrb.gmra.mxu2 %vm301_vm0, %v85_v17  ;;  %v3917_v17 = vld [vmem:[#allocation2 + $0x258] sm:$0xff] }
  0x69   :  { %3145 = vmatmul.msk.f32.vlgmr.msrb.gmra.mxu3 %vm301_vm0, %v93_v28  ;;  %v3927_v28 = vld [vmem:[#allocation2 + $0x250] sm:$0xff] }
  0x6a   :  { %3113 = vmatmul.msk.f32.vlgmr.msrb.gmra.mxu1 %vm301_vm0, %v77_v26  ;;  %v101_v26 = vld [vmem:[#allocation2 + $0x200] sm:$0xff] }
  0x6b   :  { %3187 = vmatpush.xpose.msk.msra.mxu2 %vm301_vm0, %v3823_v35 }
  0x6d   :  { %v257_v3 = vpop.permute.xlu2 %256 }
  0x6e   :  { %vm260_vm3 = vcmp.eq.s32.totalorder %v3753_v2, %v257_v3 }
  0x6f   :  { %3098 = vmatmul.msk.f32.gmra.mxu0 %vm301_vm0, %v70_v23  ;;  %v3024_v9 = vsel %vm260_vm3, 1.0, %v3440_v8  ;;  %vm2598_vm3 = vcmask 195712  }
  0x70   :  { %3130 = vmatmul.msk.f32.gmra.mxu2 %vm301_vm0, %v86_v63  ;;  %v269_v13 = vmul.f32 %v3024_v9, %v3478_v4  ;;  %v3903_v63 = vld [vmem:[#allocation2 + $0x290] sm:$0xff] }
  0x71   :  { %3146 = vmatmul.msk.f32.gmra.mxu3 %vm301_vm0, %v94_v25 }
  0x72   :  { %3114 = vmatmul.msk.f32.gmra.mxu1 %vm301_vm0, %v78_v24  ;;  %v276_v15 = vsel %vm216_vm1, %v269_v13, 0.0  ;;  %v126_v24 = vld [vmem:[#allocation2 + $0x2c8] sm:$0xff] }
  0x73   :  { %277 = vadd.xlane.f32.xlu0 %v276_v15 }
  0x77   :  { %3099 = vmatmul.msk.f32.gmra.mxu0 %vm301_vm0, %v71_v0  ;;  %v3905_v0 = vld [vmem:[#allocation2 + $0x2d0] sm:$0xff] }
  0x78   :  { %3131 = vmatmul.msk.f32.gmra.mxu2 %vm301_vm0, %v87_v60 }
  0x79   :  { %3147 = vmatmul.msk.f32.gmra.mxu3 %vm301_vm0, %v95_v6 }
  0x7a   :  { %3115 = vmatmul.msk.f32.gmra.mxu1 %vm301_vm0, %v79_v7  ;;  %v102_v7 = vld [vmem:[#allocation2 + $0x208] sm:$0xff] }
  0x7c   :  { %v3782_v16 = vpop.xlane.xlu1 %218 }
  0x7d   :  { %v3768_v11 = vpop.xlane.xlu0 %211 }
  0x7e   :  { %v220_v29 = vsub.f32 %v3483_v5, %v3768_v11 }
  0x7f   :  { %3100 = vmatmul.msk.f32.gmra.mxu0 %vm301_vm0, %v3671_v58 }
  0x80   :  { %3132 = vmatmul.msk.f32.gmra.mxu2 %vm301_vm0, %v3659_v56  ;;  %v223_v32 = vmul.f32 1.442695, %v220_v29  ;;  %v3879_v56 = vld [vmem:[#allocation2 + $0x298] sm:$0xff]  ;;  %v117_v29 = vld [vmem:[#allocation2 + $0x280] sm:$0xff] }
  0x81   :  { %3148 = vmatmul.msk.f32.gmra.mxu3 %vm301_vm0, %v3679_v61  ;;  %v3893_v61 = vld [vmem:[#allocation2 + $0x210] sm:$0xff] }
  0x82   :  { %3116 = vmatmul.msk.f32.gmra.mxu1 %vm301_vm0, %v80_v62  ;;  %3366 = vpow2.f32 %v223_v32  ;;  %v3895_v62 = vld [vmem:[#allocation2 + $0x260] sm:$0xff] }
  0x85   :  { %v3796_v21 = vpop.xlane.xlu0 %214 }
  0x86   :  { %v221_v30 = vsub.f32 %v3508_v12, %v3796_v21 }
  0x87   :  { %3101 = vmatmul.msk.f32.gmra.mxu0 %vm301_vm0, %v3655_v54  ;;  %v3862_v54 = vld [vmem:[#allocation2 + $0x2e0] sm:$0xff] }
  0x88   :  { %3133 = vmatmul.msk.f32.gmra.mxu2 %vm301_vm0, %v3638_v52  ;;  %v225_v39 = vmul.f32 1.442695, %v221_v30  ;;  %v3844_v52 = vld [vmem:[#allocation2 + $0x220] sm:$0xff]  ;;  %3204 = vmatpush.xpose.msk.msra.mxu3 %vm301_vm0, %v3862_v54 }
  0x89   :  { %3149 = vmatmul.msk.f32.gmra.mxu3 %vm301_vm0, %v3665_v57  ;;  %3156 = vmatpush.xpose.msk.msra.mxu0 %vm301_vm0, %v3844_v52  ;;  %v125_v30 = vld [vmem:[#allocation2 + $0x2c0] sm:$0xff] }
  0x8a   :  { %3117 = vmatmul.msk.f32.gmra.mxu1 %vm301_vm0, %v3675_v59  ;;  %3368 = vpow2.f32 %v225_v39 }
  0x8f   :  { %3102 = vmatmul.msk.f32.gmra.mxu0 %vm301_vm0, %v3634_v50 }
  0x90   :  { %3134 = vmatmul.msk.f32.gmra.mxu2 %vm301_vm0, %v3623_v48 }
  0x91   :  { %3150 = vmatmul.msk.f32.gmra.mxu3 %vm301_vm0, %v3643_v53  ;;  %v222_v53 = vsub.f32 %v3478_v4, %v3782_v16  ;;  %v3873_v4 = vld [vmem:[#allocation2 + $0x218] sm:$0xff] }
  0x92   :  { %3118 = vmatmul.msk.f32.gmra.mxu1 %vm301_vm0, %v3657_v55  ;;  %v3865_v55 = vld [vmem:[#allocation2 + $0x268] sm:$0xff]  ;;  %3157 = vmatpush.xpose.msk.msra.mxu0 %vm301_vm0, %v3873_v4 }
  0x93   :  { %3171 = vmatpush.xpose.msk.msra.mxu1 %vm301_vm0, %v3865_v55  ;;  %v227_v57 = vmul.f32 1.442695, %v222_v53 }
  0x94   :  { %v254_v33 = vpop.permute.xlu1 %253 }
  0x95   :  { %vm259_vm4 = vcmp.eq.s32.totalorder %v3753_v2, %v254_v33  ;;  %3370 = vpow2.f32 %v227_v57  ;;  %v109_v57 = vld [vmem:[#allocation2 + $0x240] sm:$0xff] }
  0x96   :  { %v3023_v37 = vsel %vm259_vm4, 1.0, %v3440_v8  ;;  %3158 = vmatpush.xpose.msk.msra.mxu0 %vm301_vm0, %v3893_v61  ;;  %vm2602_vm4 = vcmask 261312  }
  0x97   :  { %v268_v43 = vmul.f32 %v3023_v37, %v3508_v12  ;;  %3103 = vmatmul.msk.f32.gmra.mxu0 %vm301_vm0, %v3611_v46  ;;  %v3851_v12 = vshrl.u32 %v198_v1, 7  ;;  %v3860_v46 = vld [vmem:[#allocation2 + $0x2a0] sm:$0xff]  ;;  %3172 = vmatpush.xpose.msk.msra.mxu1 %vm301_vm0, %v3895_v62 }
  0x98   :  { %v251_v41 = vpop.permute.xlu0 %250  ;;  %3135 = vmatmul.msk.f32.gmra.mxu2 %vm301_vm0, %v3603_v44 }
  0x99   :  { %vm258_vm5 = vcmp.eq.s32.totalorder %v3753_v2, %v251_v41  ;;  %v273_v50 = vsel %vm209_vm2, %v268_v43, 0.0  ;;  %3151 = vmatmul.msk.f32.gmra.mxu3 %vm301_vm0, %v3625_v49  ;;  %5445 = vst [vmem:[#allocation8_spill] sm:$0xff] %v3851_v12  ;;  %3188 = vmatpush.xpose.msk.msra.mxu2 %vm301_vm0, %v3860_v46  ;;  %vm1607_vm6 = vcmp.eq.s32.totalorder %v3851_v12, %v3753_v2  ;;  %v200_v3 = vadd.s32 8, %v3851_v12  ;;  %v110_v43 = vld [vmem:[#allocation2 + $0x248] sm:$0xff] }
  0x9a   :  { %v3022_v48 = vsel %vm258_vm5, 1.0, %v3440_v8  ;;  %274 = vadd.xlane.f32.xlu1 %v273_v50  ;;  %3119 = vmatmul.msk.f32.gmra.mxu1 %vm301_vm0, %v3636_v51  ;;  %v3367_v51 = vpop.eup %3366  ;;  %v3888_v59 = vsel %vm1607_vm6, 1.0, %v3440_v8  ;;  %vm2606_vm5 = vcmask 326912   ;;  %vm2610_vm6 = vcmask 392512  }
  0x9b   :  { %v267_v44 = vmul.f32 %v3022_v48, %v3483_v5  ;;  %v3875_v5 = vld [vmem:[#allocation2 + $0x2d8] sm:$0xff]  ;;  %v3369_v58 = vpop.eup %3368  ;;  %v229_v60 = vsel %vm209_vm2, %v3367_v51, 0.0  ;;  %3173 = vmatpush.xpose.msk.msra.mxu1 %vm301_vm0, %v3917_v17  ;;  %3159 = vmatpush.xpose.msk.msra.mxu0 %vm301_vm0, %v102_v7  ;;  %vm1608_vm7 = vcmp.eq.s32.totalorder %v200_v3, %v3753_v2  ;;  %v3942_v48 = vadd.s32 16, %v3851_v12 }
  0x9c   :  { %3205 = vmatpush.xpose.msk.msra.mxu3 %vm301_vm0, %v3875_v5  ;;  %v3371_v1 = vpop.eup %3370  ;;  %v3950_v51 = vsel %vm1608_vm7, 1.0, %v3440_v8  ;;  %vm2614_vm7 = vcmask 458112  }
  0x9d   :  { %v270_v49 = vsel %vm209_vm2, %v267_v44, 0.0  ;;  %3189 = vmatpush.xpose.msk.msra.mxu2 %vm301_vm0, %v3879_v56  ;;  %v235_v41 = vsel %vm216_vm1, %v3371_v1, 0.0  ;;  %5446 = vst [vmem:[#allocation9_spill] sm:$0xff] %v3942_v48  ;;  %vm1609_vm8 = vcmp.eq.s32.totalorder %v3942_v48, %v3753_v2  ;;  %vm5444_vm14 = vcmp.lt.s32.totalorder %v3942_v48, 20 }
  0x9e   :  { %271 = vadd.xlane.f32.xlu2 %v270_v49  ;;  %vm5443_vm1 = vcmask 3072  }
  0x9f   :  { %3104 = vmatmul.msk.f32.gmra.mxu0 %vm301_vm0, %v3594_v42  ;;  %v232_v42 = vsel %vm209_vm2, %v3369_v58, 0.0  ;;  %3174 = vmatpush.xpose.msk.msra.mxu1 %vm301_vm0, %v3927_v28  ;;  %vm2594_vm2 = vcmask 130112  }
  0xa0   :  { %3136 = vmatmul.msk.f32.gmra.mxu2 %vm301_vm0, %v3588_v40  ;;  %3206 = vmatpush.xpose.msk.msra.mxu3 %vm301_vm0, %v3905_v0 }
  0xa1   :  { %3152 = vmatmul.msk.f32.gmra.mxu3 %vm301_vm0, %v3605_v45  ;;  %3190 = vmatpush.xpose.msk.msra.mxu2 %vm301_vm0, %v3903_v63  ;;  %v3921_v45 = vld [vmem:[#allocation2 + $0x288] sm:$0xff] }
  0xa2   :  { %230 = vadd.xlane.f32.xlu1 %v229_v60  ;;  %3120 = vmatmul.msk.f32.gmra.mxu1 %vm301_vm0, %v3613_v47 }
  0xa3   :  { %3160 = vmatpush.xpose.msk.msra.mxu0 %vm301_vm0, %v101_v26  ;;  %3175 = vmatpush.xpose.msk.msra.mxu1 %vm301_vm0, %v110_v43 }
  0xa4   :  { %v343_v40 = vpop.f32.mrf.mxu0  ;;  %3207 = vmatpush.xpose.msk.msra.mxu3 %vm301_vm0, %v126_v24 }
  0xa5   :  { %v1631_v6 = vsub.f32 %v343_v40, %v3888_v59  ;;  %3191 = vmatpush.xpose.msk.msra.mxu2 %vm301_vm0, %v3921_v45 }
  0xa6   :  { %233 = vadd.xlane.f32.xlu2 %v232_v42 }
  0xa7   :  { %v1791_v23 = vmul.f32 %v1631_v6, %v1631_v6  ;;  %v408_v25 = vpop.f32.mrf.mxu1  ;;  %3161 = vmatmul.msk.f32.vlgmr.msra.gmra.mxu0 %vm301_vm0, %v101_v26  ;;  %3176 = vmatpush.xpose.msk.msra.mxu1 %vm301_vm0, %v109_v57 }
  0xa8   :  { %v1639_v27 = vsub.f32 %v408_v25, %v3888_v59  ;;  %3208 = vmatpush.xpose.msk.msra.mxu3 %vm301_vm0, %v125_v30 }
  0xa9   :  { %v1951_v47 = vsel %vm301_vm0, %v1791_v23, 0.0  ;;  %3192 = vmatpush.xpose.msk.msra.mxu2 %vm301_vm0, %v117_v29 }
  0xaa   :  { %1952 = vadd.xlane.f32.xlu1 %v1951_v47  ;;  %v1799_v32 = vmul.f32 %v1639_v27, %v1639_v27  ;;  %v3961_v47 = vsel %vm1609_vm8, 1.0, %v3440_v8  ;;  %3177 = vmatmul.msk.f32.vlgmr.msra.gmra.mxu1 %vm301_vm0, %v109_v57  ;;  %vm2618_vm8 = vcmask 523712  }
  0xab   :  { %v473_v9 = vpop.f32.mrf.mxu2  ;;  %3209 = vmatmul.msk.f32.vlgmr.msra.gmra.mxu3 %vm301_vm0, %v125_v30 }
  0xac   :  { %v1647_v13 = vsub.f32 %v473_v9, %v3888_v59  ;;  %v538_v15 = vpop.f32.mrf.mxu3  ;;  %v346_v37 = vpop.f32.mrf.mxu0  ;;  %v1975_v49 = vsel %vm301_vm0, %v1799_v32, 0.0  ;;  %3193 = vmatmul.msk.f32.vlgmr.msra.gmra.mxu2 %vm301_vm0, %v117_v29  ;;  %v1602_v29 = vadd.s32 24, %v3851_v12 }
  0xad   :  { %v1655_v33 = vsub.f32 %v538_v15, %v3888_v59  ;;  %v1632_v60 = vsub.f32 %v346_v37, %v3950_v51 }
  0xae   :  { %v1807_v39 = vmul.f32 %v1647_v13, %v1647_v13  ;;  %236 = vadd.xlane.f32.xlu2 %v235_v41  ;;  %v1603_v41 = vadd.s32 32, %v3851_v12  ;;  %vm1610_vm9 = vcmp.eq.s32.totalorder %v1602_v29, %v3753_v2 }
  0xaf   :  { %v1815_v50 = vmul.f32 %v1655_v33, %v1655_v33  ;;  %v411_v53 = vpop.f32.mrf.mxu1  ;;  %v1792_v1 = vmul.f32 %v1632_v60, %v1632_v60  ;;  %3162 = vmatmul.msk.f32.gmra.mxu0 %vm301_vm0, %v102_v7 }
  0xb0   :  { %v1999_v44 = vsel %vm301_vm0, %v1807_v39, 0.0  ;;  %v1640_v7 = vsub.f32 %v411_v53, %v3950_v51  ;;  %vm1611_vm10 = vcmp.eq.s32.totalorder %v1603_v41, %v3753_v2  ;;  %v3983_v53 = vsel %vm1610_vm9, 1.0, %v3440_v8 }
  0xb1   :  { %2000 = vadd.xlane.f32.xlu0 %v1999_v44  ;;  %v2023_v42 = vsel %vm301_vm0, %v1815_v50, 0.0  ;;  %v1954_v37 = vsel %vm301_vm0, %v1792_v1, 0.0  ;;  %vm2905_vm9 = vcmask 1041409  }
  0xb2   :  { %1976 = vadd.xlane.f32.xlu1 %v1975_v49  ;;  %3178 = vmatmul.msk.f32.gmra.mxu1 %vm301_vm0, %v110_v43 }
  0xb3   :  { %v476_v58 = vpop.f32.mrf.mxu2  ;;  %3210 = vmatmul.msk.f32.gmra.mxu3 %vm301_vm0, %v126_v24 }
  0xb4   :  { %v1648_v40 = vsub.f32 %v476_v58, %v3950_v51  ;;  %v541_v6 = vpop.f32.mrf.mxu3  ;;  %v349_v25 = vpop.f32.mrf.mxu0  ;;  %3194 = vmatmul.msk.f32.gmra.mxu2 %vm301_vm0, %v3921_v45  ;;  %v1800_v45 = vmul.f32 %v1640_v7, %v1640_v7 }
  0xb5   :  { %v1656_v23 = vsub.f32 %v541_v6, %v3950_v51  ;;  %v1633_v9 = vsub.f32 %v349_v25, %v3961_v47 }
  0xb6   :  { %v1808_v27 = vmul.f32 %v1648_v40, %v1648_v40  ;;  %2024 = vadd.xlane.f32.xlu2 %v2023_v42  ;;  %v1978_v6 = vsel %vm301_vm0, %v1800_v45, 0.0  ;;  %v1605_v45 = vadd.s32 48, %v3851_v12 }
  0xb7   :  { %v1816_v26 = vmul.f32 %v1656_v23, %v1656_v23  ;;  %v414_v13 = vpop.f32.mrf.mxu1  ;;  %v1793_v50 = vmul.f32 %v1633_v9, %v1633_v9  ;;  %3163 = vmatmul.msk.f32.gmra.mxu0 %vm301_vm0, %v3893_v61  ;;  %v3992_v61 = vsel %vm1611_vm10, 1.0, %v3440_v8  ;;  %vm2907_vm10 = vcmask 1042434  }
  0xb8   :  { %v2002_v15 = vsel %vm301_vm0, %v1808_v27, 0.0  ;;  %v1641_v30 = vsub.f32 %v414_v13, %v3961_v47  ;;  %vm1613_vm12 = vcmp.eq.s32.totalorder %v1605_v45, %v3753_v2  ;;  %v4120_v45 = vld [vmem:[#allocation2 + $0x3b0] sm:$0xff] }
  0xb9   :  { %v2026_v3 = vsel %vm301_vm0, %v1816_v26, 0.0  ;;  %v1957_v57 = vsel %vm301_vm0, %v1793_v50, 0.0 }
  0xba   :  { %2027 = vadd.xlane.f32.xlu0 %v2026_v3  ;;  %v1801_v33 = vmul.f32 %v1641_v30, %v1641_v30  ;;  %2003 = vadd.xlane.f32.xlu1 %v2002_v15  ;;  %v1604_v30 = vadd.s32 40, %v3851_v12 }
  0xbb   :  { %v479_v32 = vpop.f32.mrf.mxu2  ;;  %3211 = vmatmul.msk.f32.gmra.mxu3 %vm301_vm0, %v3905_v0  ;;  %3179 = vmatmul.msk.f32.gmra.mxu1 %vm301_vm0, %v3927_v28 }
  0xbc   :  { %v544_v39 = vpop.f32.mrf.mxu3  ;;  %v352_v24 = vpop.f32.mrf.mxu0  ;;  %v1981_v44 = vsel %vm301_vm0, %v1801_v33, 0.0  ;;  %3195 = vmatmul.msk.f32.gmra.mxu2 %vm301_vm0, %v3903_v63  ;;  %v1649_v60 = vsub.f32 %v479_v32, %v3961_v47  ;;  %vm1612_vm11 = vcmp.eq.s32.totalorder %v1604_v30, %v3753_v2  ;;  %v4086_v30 = vld [vmem:[#allocation2 + $0x3b8] sm:$0xff] }
  0xbd   :  { %v1657_v49 = vsub.f32 %v544_v39, %v3961_v47  ;;  %v1634_v15 = vsub.f32 %v352_v24, %v3983_v53  ;;  %v4026_v50 = vsel %vm1612_vm11, 1.0, %v3440_v8  ;;  %3249 = vmatpush.xpose.msk.msrb.mxu2 %vm301_vm0, %v4086_v30  ;;  %vm2909_vm11 = vcmask 1043459  }
  0xbe   :  { %1955 = vadd.xlane.f32.xlu2 %v1954_v37  ;;  %v1809_v63 = vmul.f32 %v1649_v60, %v1649_v60  ;;  %5447 = vst [vmem:[#allocation10_spill] sm:$0xff] %v4026_v50 }
  0xbf   :  { %v417_v58 = vpop.f32.mrf.mxu1  ;;  %v1817_v23 = vmul.f32 %v1657_v49, %v1657_v49  ;;  %3164 = vmatmul.msk.f32.gmra.mxu0 %vm301_vm0, %v3873_v4 }
  0xc0   :  { %v1642_v1 = vsub.f32 %v417_v58, %v3983_v53  ;;  %v2005_v29 = vsel %vm301_vm0, %v1809_v63, 0.0 }
  0xc1   :  { %v2029_v3 = vsel %vm301_vm0, %v1817_v23, 0.0  ;;  %3250 = vmatpush.xpose.msk.msrb.mxu2 %vm301_vm0, %v4120_v45 }
  0xc2   :  { %1982 = vadd.xlane.f32.xlu0 %v1981_v44  ;;  %1958 = vadd.xlane.f32.xlu1 %v1957_v57  ;;  %v1802_v32 = vmul.f32 %v1642_v1, %v1642_v1 }
  0xc3   :  { %v482_v43 = vpop.f32.mrf.mxu2  ;;  %3212 = vmatmul.msk.f32.gmra.mxu3 %vm301_vm0, %v3875_v5  ;;  %3180 = vmatmul.msk.f32.gmra.mxu1 %vm301_vm0, %v3917_v17 }
  0xc4   :  { %v1650_v40 = vsub.f32 %v482_v43, %v3983_v53  ;;  %v547_v42 = vpop.f32.mrf.mxu3  ;;  %v355_v25 = vpop.f32.mrf.mxu0  ;;  %3196 = vmatmul.msk.f32.gmra.mxu2 %vm301_vm0, %v3879_v56  ;;  %v1794_v56 = vmul.f32 %v1634_v15, %v1634_v15  ;;  %v1984_v39 = vsel %vm301_vm0, %v1802_v32, 0.0  ;;  %v4088_v32 = vld [vmem:[#allocation2 + $0x3f0] sm:$0xff] }
  0xc5   :  { %v1635_v0 = vsub.f32 %v355_v25, %v3992_v61  ;;  %v4053_v25 = vld [vmem:[#allocation2 + $0x3f8] sm:$0xff] }
  0xc6   :  { %v1810_v27 = vmul.f32 %v1650_v40, %v1650_v40  ;;  %1979 = vadd.xlane.f32.xlu2 %v1978_v6  ;;  %v1960_v24 = vsel %vm301_vm0, %v1794_v56, 0.0  ;;  %v4042_v6 = vld [vmem:[#allocation2 + $0x378] sm:$0xff]  ;;  %3265 = vmatpush.xpose.msk.msrb.mxu3 %vm301_vm0, %v4053_v25 }
  0xc7   :  { %v420_v9 = vpop.f32.mrf.mxu1  ;;  %v1795_v13 = vmul.f32 %v1635_v0, %v1635_v0  ;;  %3165 = vmatmul.msk.f32.gmra.mxu0 %vm301_vm0, %v3844_v52  ;;  %v1658_v52 = vsub.f32 %v547_v42, %v3983_v53  ;;  %3233 = vmatpush.xpose.msk.msrb.mxu1 %vm301_vm0, %v4042_v6 }
  0xc8   :  { %v2008_v26 = vsel %vm301_vm0, %v1810_v27, 0.0  ;;  %v1643_v42 = vsub.f32 %v420_v9, %v3992_v61  ;;  %v1606_v27 = vadd.s32 56, %v3851_v12 }
  0xc9   :  { %v1963_v7 = vsel %vm301_vm0, %v1795_v13, 0.0 }
  0xca   :  { %2009 = vadd.xlane.f32.xlu0 %v2008_v26  ;;  %2030 = vadd.xlane.f32.xlu1 %v2029_v3  ;;  %v1803_v26 = vmul.f32 %v1643_v42, %v1643_v42  ;;  %vm1614_vm13 = vcmp.eq.s32.totalorder %v1606_v27, %v3753_v2 }
  0xcb   :  { %v485_v28 = vpop.f32.mrf.mxu2  ;;  %3213 = vmatmul.msk.f32.gmra.mxu3 %vm301_vm0, %v3862_v54  ;;  %3181 = vmatmul.msk.f32.gmra.mxu1 %vm301_vm0, %v3895_v62  ;;  %v4082_v15 = vsel %vm1614_vm13, 1.0, %v3440_v8  ;;  %vm2913_vm13 = vcmask 1045509  }
  0xcc   :  { %v550_v4 = vpop.f32.mrf.mxu3  ;;  %v358_v33 = vpop.f32.mrf.mxu0  ;;  %v1651_v37 = vsub.f32 %v485_v28, %v3992_v61  ;;  %3197 = vmatmul.msk.f32.gmra.mxu2 %vm301_vm0, %v3860_v46  ;;  %v1818_v46 = vmul.f32 %v1658_v52, %v1658_v52  ;;  %v4071_v28 = vld [vmem:[#allocation2 + $0x338] sm:$0xff]  ;;  %5449 = vst [vmem:[#allocation12_spill] sm:$0xff] %v4082_v15  ;;  %3266 = vmatpush.xpose.msk.msrb.mxu3 %vm301_vm0, %v4088_v32  ;;  %v4110_v52 = vld [vmem:[#allocation2 + $0x368] sm:$0xff] }
  0xcd   :  { %v1659_v5 = vsub.f32 %v550_v4, %v3992_v61  ;;  %v1636_v43 = vsub.f32 %v358_v33, %v4026_v50  ;;  %3217 = vmatpush.xpose.msk.msrb.mxu0 %vm301_vm0, %v4071_v28 }
  0xce   :  { %2006 = vadd.xlane.f32.xlu2 %v2005_v29  ;;  %v1811_v49 = vmul.f32 %v1651_v37, %v1651_v37  ;;  %v2032_v23 = vsel %vm301_vm0, %v1818_v46, 0.0  ;;  %v1987_v29 = vsel %vm301_vm0, %v1803_v26, 0.0  ;;  %v4132_v46 = vld [vmem:[#allocation2 + $0x328] sm:$0xff]  ;;  %v4161_v26 = vld [vmem:[#allocation2 + $0x3a0] sm:$0xff] }
  0xcf   :  { %v1819_v41 = vmul.f32 %v1659_v5, %v1659_v5  ;;  %v423_v44 = vpop.f32.mrf.mxu1  ;;  %3166 = vmatmul.msk.f32.gmra.mxu0 %vm301_vm0, %v3825_v36  ;;  %v4049_v36 = vsel %vm1613_vm12, 1.0, %v3440_v8  ;;  %v1796_v0 = vmul.f32 %v1636_v43, %v1636_v43  ;;  %v4096_v5 = vld [vmem:[#allocation2 + $0x3e8] sm:$0xff]  ;;  %v4136_v43 = vld [vmem:[#allocation2 + $0x3d8] sm:$0xff]  ;;  %vm2911_vm12 = vcmask 1044484  }
  0xd0   :  { %v1644_v57 = vsub.f32 %v423_v44, %v4026_v50  ;;  %v2011_v60 = vsel %vm301_vm0, %v1811_v49, 0.0  ;;  %5448 = vst [vmem:[#allocation11_spill] sm:$0xff] %v4049_v36  ;;  %3267 = vmatpush.xpose.msk.msrb.mxu3 %vm301_vm0, %v4096_v5  ;;  %v4122_v49 = vld [vmem:[#allocation2 + $0x3e0] sm:$0xff] }
  0xd1   :  { %v2035_v54 = vsel %vm301_vm0, %v1819_v41, 0.0  ;;  %v1966_v9 = vsel %vm301_vm0, %v1796_v0, 0.0 }
  0xd2   :  { %1964 = vadd.xlane.f32.xlu0 %v1963_v7  ;;  %1985 = vadd.xlane.f32.xlu1 %v1984_v39  ;;  %v1804_v62 = vmul.f32 %v1644_v57, %v1644_v57 }
  0xd3   :  { %v488_v17 = vpop.f32.mrf.mxu2  ;;  %3214 = vmatmul.msk.f32.gmra.mxu3 %vm301_vm0, %v3832_v38  ;;  %3182 = vmatmul.msk.f32.gmra.mxu1 %vm301_vm0, %v3865_v55  ;;  %v4073_v55 = vld [vmem:[#allocation2 + $0x370] sm:$0xff] }
  0xd4   :  { %v553_v58 = vpop.f32.mrf.mxu3  ;;  %v361_v40 = vpop.f32.mrf.mxu0  ;;  %3198 = vmatmul.msk.f32.gmra.mxu2 %vm301_vm0, %v3823_v35  ;;  %v1990_v35 = vsel %vm301_vm0, %v1804_v62, 0.0  ;;  %3234 = vmatpush.xpose.msk.msrb.mxu1 %vm301_vm0, %v4073_v55 }
  0xd5   :  { %v1660_v3 = vsub.f32 %v553_v58, %v4026_v50  ;;  %3268 = vmatpush.xpose.msk.msrb.mxu3 %vm301_vm0, %v4122_v49  ;;  %v4134_v58 = vld [vmem:[#allocation2 + $0x3a8] sm:$0xff] }
  0xd6   :  { %1961 = vadd.xlane.f32.xlu2 %v1960_v24  ;;  %3251 = vmatpush.xpose.msk.msrb.mxu2 %vm301_vm0, %v4134_v58 }
  0xd7   :  { %v426_v1 = vpop.f32.mrf.mxu1  ;;  %3167 = vmatmul.msk.f32.gmra.mxu0 %vm301_vm0, %v3802_v22 }
  0xd8   :  { %v1645_v37 = vsub.f32 %v426_v1, %v4049_v36  ;;  %3235 = vmatpush.xpose.msk.msrb.mxu1 %vm301_vm0, %v4110_v52  ;;  %v4163_v1 = vld [vmem:[#allocation2 + $0x3d0] sm:$0xff] }
  0xd9   :  { %3269 = vmatpush.xpose.msk.msrb.mxu3 %vm301_vm0, %v4136_v43 }
  0xda   :  { %2036 = vadd.xlane.f32.xlu0 %v2035_v54  ;;  %2012 = vadd.xlane.f32.xlu1 %v2011_v60 }
  0xdb   :  { %v491_v38 = vpop.f32.mrf.mxu2  ;;  %3215 = vmatmul.msk.f32.gmra.mxu3 %vm301_vm0, %v3816_v31  ;;  %v1652_v31 = vsub.f32 %v488_v17, %v4026_v50  ;;  %3183 = vmatmul.msk.f32.gmra.mxu1 %vm301_vm0, %v3821_v34  ;;  %v4108_v17 = vld [vmem:[#allocation2 + $0x330] sm:$0xff] }
  0xdc   :  { %v1653_v63 = vsub.f32 %v491_v38, %v4049_v36  ;;  %v4069_v13 = vpop.f32.mrf.mxu3  ;;  %3199 = vmatmul.msk.f32.gmra.mxu2 %vm301_vm0, %v3788_v19  ;;  %v364_v4 = vpop.f32.mrf.mxu0  ;;  %v1820_v19 = vmul.f32 %v1660_v3, %v1660_v3  ;;  %3218 = vmatpush.xpose.msk.msrb.mxu0 %vm301_vm0, %v4108_v17 }
  0xdd   :  { %v1638_v7 = vsub.f32 %v364_v4, %v4082_v15  ;;  %v1812_v56 = vmul.f32 %v1652_v31, %v1652_v31  ;;  %v1661_v27 = vsub.f32 %v4069_v13, %v4049_v36  ;;  %3252 = vmatpush.xpose.msk.msrb.mxu2 %vm301_vm0, %v4161_v26  ;;  %3270 = vmatpush.xpose.msk.msrb.mxu3 %vm301_vm0, %v4163_v1 }
  0xde   :  { %2033 = vadd.xlane.f32.xlu2 %v2032_v23  ;;  %v1813_v22 = vmul.f32 %v1653_v63, %v1653_v63  ;;  %v2038_v39 = vsel %vm301_vm0, %v1820_v19, 0.0  ;;  %v4150_v23 = vld [vmem:[#allocation2 + $0x360] sm:$0xff]  ;;  %v4177_v19 = vld [vmem:[#allocation2 + $0x358] sm:$0xff] }
  0xdf   :  { %3168 = vmatmul.msk.f32.gmra.mxu0 %vm301_vm0, %v3775_v14  ;;  %v4106_v41 = vpop.f32.mrf.mxu1  ;;  %v1798_v34 = vmul.f32 %v1638_v7, %v1638_v7  ;;  %v1637_v14 = vsub.f32 %v361_v40, %v4049_v36  ;;  %v2014_v24 = vsel %vm301_vm0, %v1812_v56, 0.0  ;;  %3236 = vmatpush.xpose.msk.msrb.mxu1 %vm301_vm0, %v4150_v23  ;;  %v1821_v31 = vmul.f32 %v1661_v27, %v1661_v27  ;;  %v158_v7 = vld [vmem:[#allocation2 + $0x3c8] sm:$0xff] }
  0xe0   :  { %v2017_v8 = vsel %vm301_vm0, %v1813_v22, 0.0  ;;  %3219 = vmatpush.xpose.msk.msrb.mxu0 %vm301_vm0, %v4132_v46  ;;  %v4171_v22 = vld [vmem:[#allocation2 + $0x318] sm:$0xff] }
  0xe1   :  { %v1972_v54 = vsel %vm301_vm0, %v1798_v34, 0.0  ;;  %3271 = vmatpush.xpose.msk.msrb.mxu3 %vm301_vm0, %v158_v7  ;;  %v2041_v34 = vsel %vm301_vm0, %v1821_v31, 0.0 }
  0xe2   :  { %1991 = vadd.xlane.f32.xlu0 %v1990_v35  ;;  %1967 = vadd.xlane.f32.xlu1 %v1966_v9 }
  0xe3   :  { %v494_v33 = vpop.f32.mrf.mxu2  ;;  %3216 = vmatmul.msk.f32.gmra.mxu3 %vm301_vm0, %v3790_v20  ;;  %v1805_v20 = vmul.f32 %v1645_v37, %v1645_v37  ;;  %3184 = vmatmul.msk.f32.gmra.mxu1 %vm301_vm0, %v3786_v18  ;;  %v4152_v18 = vld [vmem:[#allocation2 + $0x320] sm:$0xff]  ;;  %v4186_v37 = vld [vmem:[#allocation2 + $0x310] sm:$0xff] }
  0xe4   :  { %v559_v44 = vpop.f32.mrf.mxu3  ;;  %3200 = vmatmul.msk.f32.gmra.mxu2 %vm301_vm0, %v3764_v10  ;;  %v1797_v10 = vmul.f32 %v1637_v14, %v1637_v14  ;;  %v603_v60 = vpop.f32.mrf.mxu0  ;;  %v1654_v40 = vsub.f32 %v494_v33, %v4082_v15  ;;  %3220 = vmatpush.xpose.msk.msrb.mxu0 %vm301_vm0, %v4152_v18 }
  0xe5   :  { %v1662_v57 = vsub.f32 %v559_v44, %v4082_v15  ;;  %v1993_v62 = vsel %vm301_vm0, %v1805_v20, 0.0  ;;  %3237 = vmatpush.xpose.msk.msrb.mxu1 %vm301_vm0, %v4177_v19  ;;  %v4193_v44 = vld [vmem:[#allocation2 + $0x350] sm:$0xff] }
  0xe6   :  { %1988 = vadd.xlane.f32.xlu2 %v1987_v29  ;;  %v1969_v0 = vsel %vm301_vm0, %v1797_v10, 0.0  ;;  %v1814_v3 = vmul.f32 %v1654_v40, %v1654_v40  ;;  %v1663_v29 = vsub.f32 %v603_v60, %v3888_v59  ;;  %v4195_v20 = vld [vmem:[#allocation2 + $0x390] sm:$0xff]  ;;  %v134_v60 = vld [vmem:[#allocation2 + $0x308] sm:$0xff] }
  0xe7   :  { %v1822_v38 = vmul.f32 %v1662_v57, %v1662_v57  ;;  %v668_v35 = vpop.f32.mrf.mxu1 }
  0xe8   :  { %v1671_v13 = vsub.f32 %v668_v35, %v3888_v59  ;;  %3221 = vmatpush.xpose.msk.msrb.mxu0 %vm301_vm0, %v4171_v22  ;;  %v2020_v4 = vsel %vm301_vm0, %v1814_v3, 0.0  ;;  %v150_v35 = vld [vmem:[#allocation2 + $0x388] sm:$0xff] }
  0xe9   :  { %v2044_v9 = vsel %vm301_vm0, %v1822_v38, 0.0  ;;  %3238 = vmatpush.xpose.msk.msrb.mxu1 %vm301_vm0, %v4193_v44 }
  0xea   :  { %2018 = vadd.xlane.f32.xlu0 %v2017_v8  ;;  %2039 = vadd.xlane.f32.xlu1 %v2038_v39  ;;  %v4179_v8 = vld [vmem:[#allocation2 + $0x398] sm:$0xff]  ;;  %v1831_v33 = vmul.f32 %v1671_v13, %v1671_v13  ;;  %v1646_v39 = vsub.f32 %v4106_v41, %v4082_v15 }
  0xeb   :  { %v4148_v42 = vpop.f32.mrf.mxu2  ;;  %3253 = vmatpush.xpose.msk.msrb.mxu2 %vm301_vm0, %v4179_v8 }
  0xec   :  { %v798_v63 = vpop.f32.mrf.mxu3  ;;  %v606_v56 = vpop.f32.mrf.mxu0  ;;  %3222 = vmatpush.xpose.msk.msrb.mxu0 %vm301_vm0, %v4186_v37  ;;  %v2071_v41 = vsel %vm301_vm0, %v1831_v33, 0.0  ;;  %v1806_v40 = vmul.f32 %v1646_v39, %v1646_v39  ;;  %v1679_v13 = vsub.f32 %v4148_v42, %v3888_v59  ;;  %v149_v33 = vld [vmem:[#allocation2 + $0x380] sm:$0xff] }
  0xed   :  { %v1687_v38 = vsub.f32 %v798_v63, %v3888_v59 }
  0xee   :  { %2015 = vadd.xlane.f32.xlu2 %v2014_v24  ;;  %v1823_v24 = vmul.f32 %v1663_v29, %v1663_v29  ;;  %v1996_v31 = vsel %vm301_vm0, %v1806_v40, 0.0 }
  0xef   :  { %3254 = vmatpush.xpose.msk.msrb.mxu2 %vm301_vm0, %v4195_v20  ;;  %v1847_v29 = vmul.f32 %v1687_v38, %v1687_v38  ;;  %v1664_v38 = vsub.f32 %v606_v56, %v3950_v51 }
  0xf0   :  { %3223 = vmatpush.xpose.msk.msrb.mxu0 %vm301_vm0, %v134_v60  ;;  %v2047_v27 = vsel %vm301_vm0, %v1823_v24, 0.0 }
  0xf2   :  { %1973 = vadd.xlane.f32.xlu0 %v1972_v54  ;;  %1994 = vadd.xlane.f32.xlu1 %v1993_v62  ;;  %v157_v54 = vld [vmem:[#allocation2 + $0x3c0] sm:$0xff]  ;;  %v671_v62 = vpop.f32.mrf.mxu1 }
  0xf3   :  { %v736_v14 = vpop.f32.mrf.mxu2  ;;  %3272 = vmatpush.xpose.msk.msrb.mxu3 %vm301_vm0, %v157_v54  ;;  %3255 = vmatpush.xpose.msk.msrb.mxu2 %vm301_vm0, %v150_v35 }
  0xf4   :  { %v4197_v57 = vpop.f32.mrf.mxu3  ;;  %v1680_v10 = vsub.f32 %v736_v14, %v3950_v51  ;;  %v609_v63 = vpop.f32.mrf.mxu0  ;;  %v1839_v14 = vmul.f32 %v1679_v13, %v1679_v13 }
  0xf6   :  { %1970 = vadd.xlane.f32.xlu2 %v1969_v0  ;;  %v142_v0 = vld [vmem:[#allocation2 + $0x348] sm:$0xff]  ;;  %v1840_v3 = vmul.f32 %v1680_v10, %v1680_v10  ;;  %3273 = vmatmul.msk.f32.vlgmr.msrb.gmra.mxu3 %vm301_vm0, %v157_v54  ;;  %v1672_v54 = vsub.f32 %v671_v62, %v3950_v51 }
  0xf7   :  { %3239 = vmatpush.xpose.msk.msrb.mxu1 %vm301_vm0, %v142_v0  ;;  %3256 = vmatpush.xpose.msk.msrb.mxu2 %vm301_vm0, %v149_v33 }
  0xf8   :  { %v2098_v39 = vsel %vm301_vm0, %v1840_v3, 0.0  ;;  %v1832_v3 = vmul.f32 %v1672_v54, %v1672_v54 }
  0xfa   :  { %2045 = vadd.xlane.f32.xlu0 %v2044_v9  ;;  %2021 = vadd.xlane.f32.xlu1 %v2020_v4  ;;  %v133_v9 = vld [vmem:[#allocation2 + $0x300] sm:$0xff]  ;;  %v674_v10 = vpop.f32.mrf.mxu1  ;;  %v2074_v56 = vsel %vm301_vm0, %v1832_v3, 0.0 }
  0xfb   :  { %3224 = vmatpush.xpose.msk.msrb.mxu0 %vm301_vm0, %v133_v9  ;;  %v141_v4 = vld [vmem:[#allocation2 + $0x340] sm:$0xff]  ;;  %v739_v42 = vpop.f32.mrf.mxu2  ;;  %3257 = vmatmul.msk.f32.vlgmr.msrb.gmra.mxu2 %vm301_vm0, %v149_v33 }
  0xfc   :  { %3240 = vmatpush.xpose.msk.msrb.mxu1 %vm301_vm0, %v141_v4  ;;  %v804_v24 = vpop.f32.mrf.mxu3 }
  0xfd   :  { %v1689_v13 = vsub.f32 %v804_v24, %v3961_v47 }
  0xfe   :  { %2042 = vadd.xlane.f32.xlu2 %v2041_v34  ;;  %v1665_v34 = vsub.f32 %v609_v63, %v3961_v47  ;;  %3225 = vmatmul.msk.f32.vlgmr.msrb.gmra.mxu0 %vm301_vm0, %v133_v9  ;;  %v1824_v63 = vmul.f32 %v1664_v38, %v1664_v38 }
  0xff   :  { %3241 = vmatmul.msk.f32.vlgmr.msrb.gmra.mxu1 %vm301_vm0, %v141_v4  ;;  %3274 = vmatmul.msk.f32.gmra.mxu3 %vm301_vm0, %v158_v7  ;;  %v1681_v7 = vsub.f32 %v739_v42, %v3961_v47 }
 0x100   :  { %v1825_v40 = vmul.f32 %v1665_v34, %v1665_v34  ;;  %v1688_v34 = vsub.f32 %v4197_v57, %v3950_v51  ;;  %v4250_v57 = vpop.xlane.xlu0 %277 }
 0x101   :  { %v1841_v42 = vmul.f32 %v1681_v7, %v1681_v7 }
 0x102   :  { %2072 = vadd.xlane.f32.xlu0 %v2071_v41  ;;  %2048 = vadd.xlane.f32.xlu1 %v2047_v27  ;;  %v2119_v41 = vsel %vm301_vm0, %v1847_v29, 0.0  ;;  %v2095_v27 = vsel %vm301_vm0, %v1839_v14, 0.0  ;;  %v2053_v62 = vsel %vm301_vm0, %v1825_v40, 0.0  ;;  %v677_v14 = vpop.f32.mrf.mxu1 }
 0x103   :  { %v742_v33 = vpop.f32.mrf.mxu2  ;;  %3258 = vmatmul.msk.f32.gmra.mxu2 %vm301_vm0, %v150_v35  ;;  %v1674_v54 = vsub.f32 %v677_v14, %v3983_v53  ;;  %v2101_v35 = vsel %vm301_vm0, %v1841_v42, 0.0 }
 0x104   :  { %v807_v29 = vpop.f32.mrf.mxu3 }
 0x105   :  { %v1834_v3 = vmul.f32 %v1674_v54, %v1674_v54  ;;  %v4286_v54 = vld [vmem:[#allocation2 + $0x438] sm:$0xff] }
 0x106   :  { %1997 = vadd.xlane.f32.xlu2 %v1996_v31  ;;  %v612_v31 = vpop.f32.mrf.mxu0  ;;  %3226 = vmatmul.msk.f32.gmra.mxu0 %vm301_vm0, %v134_v60  ;;  %v2050_v60 = vsel %vm301_vm0, %v1824_v63, 0.0  ;;  %5451 = vst [vmem:[#allocation14_spill] sm:$0xff] %v4286_v54 }
 0x107   :  { %3242 = vmatmul.msk.f32.gmra.mxu1 %vm301_vm0, %v142_v0  ;;  %3275 = vmatmul.msk.f32.gmra.mxu3 %vm301_vm0, %v4163_v1  ;;  %v1666_v1 = vsub.f32 %v612_v31, %v3983_v53 }
 0x108   :  { %3281 = vmatpush.xpose.msk.msra.mxu0 %vm301_vm0, %v4286_v54 }
 0x109   :  { %v1826_v31 = vmul.f32 %v1666_v1, %v1666_v1 }
 0x10a   :  { %2099 = vadd.xlane.f32.xlu0 %v2098_v39  ;;  %2120 = vadd.xlane.f32.xlu1 %v2119_v41  ;;  %v1849_v39 = vmul.f32 %v1689_v13, %v1689_v13  ;;  %v1848_v41 = vmul.f32 %v1688_v34, %v1688_v34  ;;  %v680_v63 = vpop.f32.mrf.mxu1 }
 0x10b   :  { %3259 = vmatmul.msk.f32.gmra.mxu2 %vm301_vm0, %v4195_v20  ;;  %v745_v13 = vpop.f32.mrf.mxu2  ;;  %v2080_v20 = vsel %vm301_vm0, %v1834_v3, 0.0 }
 0x10c   :  { %v2125_v0 = vsel %vm301_vm0, %v1849_v39, 0.0  ;;  %v2056_v39 = vsel %vm301_vm0, %v1826_v31, 0.0 }
 0x10d   :  { %v4228_v9 = vpop.xlane.xlu1 %274 }
 0x10e   :  { %2096 = vadd.xlane.f32.xlu2 %v2095_v27  ;;  %3227 = vmatmul.msk.f32.gmra.mxu0 %vm301_vm0, %v4186_v37  ;;  %v4252_v40 = vpop.f32.mrf.mxu0  ;;  %v4256_v27 = vpop.f32.mrf.mxu3  ;;  %v1673_v37 = vsub.f32 %v674_v10, %v3961_v47  ;;  %v1690_v10 = vsub.f32 %v807_v29, %v3983_v53 }
 0x10f   :  { %3243 = vmatmul.msk.f32.gmra.mxu1 %vm301_vm0, %v4193_v44  ;;  %3276 = vmatmul.msk.f32.gmra.mxu3 %vm301_vm0, %v4136_v43  ;;  %v4264_v44 = vld [vmem:[#allocation2 + $0x4f8] sm:$0xff]  ;;  %v1683_v43 = vsub.f32 %v745_v13, %v3992_v61  ;;  %v1675_v13 = vsub.f32 %v680_v63, %v3992_v61  ;;  %v4324_v63 = vld [vmem:[#allocation2 + $0x430] sm:$0xff] }
 0x110   :  { %5450 = vst [vmem:[#allocation13_spill] sm:$0xff] %v4264_v44  ;;  %3329 = vmatpush.xpose.msk.msra.mxu3 %vm301_vm0, %v4264_v44  ;;  %3282 = vmatpush.xpose.msk.msra.mxu0 %vm301_vm0, %v4324_v63 }
 0x111   :  { %v4236_v4 = vpop.xlane.xlu2 %271  ;;  %5455 = vst [vmem:[#allocation18_spill] sm:$0xff] %v4324_v63 }
 0x112   :  { %2054 = vadd.xlane.f32.xlu0 %v2053_v62  ;;  %2075 = vadd.xlane.f32.xlu1 %v2074_v56  ;;  %v2122_v62 = vsel %vm301_vm0, %v1848_v41, 0.0  ;;  %v1833_v56 = vmul.f32 %v1673_v37, %v1673_v37  ;;  %v4288_v41 = vld [vmem:[#allocation2 + $0x478] sm:$0xff] }
 0x113   :  { %3260 = vmatmul.msk.f32.gmra.mxu2 %vm301_vm0, %v4179_v8  ;;  %5452 = vst [vmem:[#allocation15_spill] sm:$0xff] %v4288_v41  ;;  %v4290_v8 = vld [vmem:[#allocation2 + $0x4b8] sm:$0xff]  ;;  %3297 = vmatpush.xpose.msk.msra.mxu1 %vm301_vm0, %v4288_v41  ;;  %v748_v37 = vpop.f32.mrf.mxu2 }
 0x114   :  { %v2077_v42 = vsel %vm301_vm0, %v1833_v56, 0.0  ;;  %5453 = vst [vmem:[#allocation16_spill] sm:$0xff] %v4290_v8  ;;  %3313 = vmatpush.xpose.msk.msra.mxu2 %vm301_vm0, %v4290_v8 }
 0x115   :  { %v231_v24 = vpop.xlane.xlu1 %230 }
 0x116   :  { %2051 = vadd.xlane.f32.xlu2 %v2050_v60  ;;  %3228 = vmatmul.msk.f32.gmra.mxu0 %vm301_vm0, %v4171_v22  ;;  %v1843_v60 = vmul.f32 %v1683_v43, %v1683_v43  ;;  %v618_v14 = vpop.f32.mrf.mxu0  ;;  %v1682_v22 = vsub.f32 %v742_v33, %v3983_v53 }
 0x117   :  { %3244 = vmatmul.msk.f32.gmra.mxu1 %vm301_vm0, %v4177_v19  ;;  %3277 = vmatmul.msk.f32.gmra.mxu3 %vm301_vm0, %v4122_v49  ;;  %v813_v19 = vpop.f32.mrf.mxu3  ;;  %v4296_v49 = vld [vmem:[#allocation2 + $0x4f0] sm:$0xff]  ;;  %v1668_v1 = vsub.f32 %v618_v14, %v4026_v50 }
 0x118   :  { %5454 = vst [vmem:[#allocation17_spill] sm:$0xff] %v4296_v49  ;;  %v1842_v3 = vmul.f32 %v1682_v22, %v1682_v22  ;;  %3330 = vmatpush.xpose.msk.msra.mxu3 %vm301_vm0, %v4296_v49 }
 0x119   :  { %v234_v38 = vpop.xlane.xlu2 %233 }
 0x11a   :  { %2126 = vadd.xlane.f32.xlu0 %v2125_v0  ;;  %2102 = vadd.xlane.f32.xlu1 %v2101_v35  ;;  %3372 = vlog2.f32 %v234_v38  ;;  %v1850_v0 = vmul.f32 %v1690_v10, %v1690_v10  ;;  %v4302_v35 = vpop.f32.mrf.mxu1 }
 0x11b   :  { %3261 = vmatmul.msk.f32.gmra.mxu2 %vm301_vm0, %v4161_v26  ;;  %v1835_v26 = vmul.f32 %v1675_v13, %v1675_v13 }
 0x11c   :  { %v2128_v31 = vsel %vm301_vm0, %v1850_v0, 0.0  ;;  %v4341_v0 = vld [vmem:[#allocation2 + $0x4e0] sm:$0xff] }
 0x11d   :  { %v4268_v7 = vpop.xlane.xlu1 %1952 }
 0x11e   :  { %2123 = vadd.xlane.f32.xlu2 %v2122_v62  ;;  %3229 = vmatmul.msk.f32.gmra.mxu0 %vm301_vm0, %v4152_v18  ;;  %v4320_v18 = vpop.f32.mrf.mxu0 }
 0x11f   :  { %3245 = vmatmul.msk.f32.gmra.mxu1 %vm301_vm0, %v4150_v23  ;;  %3278 = vmatmul.msk.f32.gmra.mxu3 %vm301_vm0, %v4096_v5  ;;  %v1667_v23 = vsub.f32 %v4252_v40, %v3992_v61  ;;  %v4329_v14 = vpop.f32.mrf.mxu3  ;;  %v4337_v5 = vld [vmem:[#allocation2 + $0x470] sm:$0xff] }
 0x120   :  { %v3373_v38 = vpop.eup %3372  ;;  %5456 = vst [vmem:[#allocation19_spill] sm:$0xff] %v4337_v5  ;;  %3298 = vmatpush.xpose.msk.msra.mxu1 %vm301_vm0, %v4337_v5  ;;  %v1693_v8 = vsub.f32 %v4329_v14, %v4049_v36  ;;  %v165_v14 = vld [vmem:[#allocation2 + $0x400] sm:$0xff] }
 0x121   :  { %v237_v34 = vpop.xlane.xlu2 %236 }
 0x122   :  { %2081 = vadd.xlane.f32.xlu0 %v2080_v20  ;;  %3374 = vlog2.f32 %v237_v34  ;;  %2057 = vadd.xlane.f32.xlu1 %v2056_v39  ;;  %v4312_v20 = vld [vmem:[#allocation2 + $0x4e8] sm:$0xff]  ;;  %v1828_v39 = vmul.f32 %v1668_v1, %v1668_v1  ;;  %v241_v34 = vmul.f32 0.6931472, %v3373_v38 }
 0x123   :  { %3376 = vlog2.f32 %v231_v24  ;;  %v2107_v24 = vsel %vm301_vm0, %v1843_v60, 0.0  ;;  %v2104_v60 = vsel %vm301_vm0, %v1842_v3, 0.0  ;;  %3331 = vmatpush.xpose.msk.msra.mxu3 %vm301_vm0, %v4312_v20  ;;  %v1692_v3 = vsub.f32 %v813_v19, %v4026_v50  ;;  %v4363_v19 = vld [vmem:[#allocation2 + $0x4a8] sm:$0xff]  ;;  %3262 = vmatmul.msk.f32.gmra.mxu2 %vm301_vm0, %v4134_v58 }
 0x124   :  { %v4283_v29 = vpop.xlane.xlu0 %2000  ;;  %v2062_v38 = vsel %vm301_vm0, %v1828_v39, 0.0  ;;  %v245_v13 = vadd.f32 %v241_v34, %v3796_v21  ;;  %v4365_v39 = vld [vmem:[#allocation2 + $0x4d8] sm:$0xff] }
 0x125   :  { %v4298_v33 = vpop.xlane.xlu1 %1976 }
 0x126   :  { %2078 = vadd.xlane.f32.xlu2 %v2077_v42  ;;  %v4339_v42 = vld [vmem:[#allocation2 + $0x4b0] sm:$0xff]  ;;  %3230 = vmatmul.msk.f32.gmra.mxu0 %vm301_vm0, %v4132_v46  ;;  %v4372_v46 = vpop.f32.mrf.mxu2 }
 0x127   :  { %5457 = vst [vmem:[#allocation20_spill] sm:$0xff] %v4339_v42  ;;  %3314 = vmatpush.xpose.msk.msra.mxu2 %vm301_vm0, %v4339_v42  ;;  %3332 = vmatpush.xpose.msk.msra.mxu3 %vm301_vm0, %v4341_v0 }
 0x128   :  { %v3375_v62 = vpop.eup %3374  ;;  %3246 = vmatmul.msk.f32.gmra.mxu1 %vm301_vm0, %v4110_v52  ;;  %3279 = vmatmul.msk.f32.gmra.mxu3 %vm301_vm0, %v4088_v32  ;;  %v4381_v52 = vld [vmem:[#allocation2 + $0x420] sm:$0xff]  ;;  %v4392_v32 = vld [vmem:[#allocation2 + $0x468] sm:$0xff] }
 0x129   :  { %v4316_v43 = vpop.xlane.xlu2 %2024  ;;  %v3377_v56 = vpop.eup %3376  ;;  %v243_v10 = vmul.f32 0.6931472, %v3375_v62  ;;  %v4352_v62 = vld [vmem:[#allocation2 + $0x428] sm:$0xff]  ;;  %5458 = vst [vmem:[#allocation21_spill] sm:$0xff] %v4392_v32  ;;  %3299 = vmatpush.xpose.msk.msra.mxu1 %vm301_vm0, %v4392_v32 }
 0x12a   :  { %2108 = vadd.xlane.f32.xlu0 %v2107_v24  ;;  %2129 = vadd.xlane.f32.xlu1 %v2128_v31  ;;  %v239_v40 = vmul.f32 0.6931472, %v3377_v56  ;;  %v1827_v31 = vmul.f32 %v1667_v23, %v1667_v23  ;;  %v2083_v56 = vsel %vm301_vm0, %v1835_v26, 0.0  ;;  %v4390_v26 = vpop.f32.mrf.mxu0 }
 0x12b   :  { %v246_v24 = vadd.f32 %v243_v10, %v3782_v16  ;;  %v1684_v16 = vsub.f32 %v748_v37, %v4026_v50  ;;  %v686_v10 = vpop.f32.mrf.mxu1  ;;  %3283 = vmatpush.xpose.msk.msra.mxu0 %vm301_vm0, %v4352_v62  ;;  %v1852_v37 = vmul.f32 %v1692_v3, %v1692_v3  ;;  %3315 = vmatpush.xpose.msk.msra.mxu2 %vm301_vm0, %v4363_v19 }
 0x12c   :  { %v244_v21 = vadd.f32 %v239_v40, %v3768_v11  ;;  %v2059_v11 = vsel %vm301_vm0, %v1827_v31, 0.0  ;;  %3333 = vmatpush.xpose.msk.msra.mxu3 %vm301_vm0, %v4365_v39  ;;  %v4396_v40 = vld [vmem:[#allocation2 + $0x4a0] sm:$0xff]  ;;  %v1677_v31 = vsub.f32 %v686_v10, %v4049_v36  ;;  %v1669_v10 = vsub.f32 %v4320_v18, %v4049_v36  ;;  %3263 = vmatmul.msk.f32.gmra.mxu2 %vm301_vm0, %v4120_v45 }
 0x12d   :  { %v4333_v22 = vpop.xlane.xlu0 %2027  ;;  %v4348_v1 = vpop.xlane.xlu1 %2003  ;;  %v281_v23 = vsub.f32 %v246_v24, %v4250_v57  ;;  %v1844_v58 = vmul.f32 %v1684_v16, %v1684_v16  ;;  %v4398_v24 = vld [vmem:[#allocation2 + $0x4d0] sm:$0xff] }
 0x12e   :  { %2105 = vadd.xlane.f32.xlu2 %v2104_v60  ;;  %v280_v60 = vsub.f32 %v245_v13, %v4228_v9  ;;  %v4401_v9 = vpop.f32.mrf.mxu3  ;;  %v2134_v13 = vsel %vm301_vm0, %v1852_v37, 0.0  ;;  %3231 = vmatmul.msk.f32.gmra.mxu0 %vm301_vm0, %v4108_v17  ;;  %v4425_v37 = vld [vmem:[#allocation2 + $0x498] sm:$0xff] }
 0x12f   :  { %3284 = vmatpush.xpose.msk.msra.mxu0 %vm301_vm0, %v4381_v52  ;;  %v284_v16 = vsel %vm5444_vm14, %v281_v23, 0.0  ;;  %3316 = vmatpush.xpose.msk.msra.mxu2 %vm301_vm0, %v4396_v40  ;;  %v4427_v23 = vld [vmem:[#allocation2 + $0x4c8] sm:$0xff]  ;;  %vm2917_vm14 = vcmask 1047559  }
 0x130   :  { %3334 = vmatpush.xpose.msk.msra.mxu3 %vm301_vm0, %v4398_v24  ;;  %3247 = vmatmul.msk.f32.gmra.mxu1 %vm301_vm0, %v4073_v55  ;;  %v4443_v55 = vld [vmem:[#allocation2 + $0x410] sm:$0xff] }
 0x131   :  { %v4370_v34 = vpop.xlane.xlu2 %1955  ;;  %3280 = vmatmul.msk.f32.gmra.mxu3 %vm301_vm0, %v4053_v25  ;;  %v4455_v25 = vld [vmem:[#allocation2 + $0x490] sm:$0xff] }
 0x132   :  { %2063 = vadd.xlane.f32.xlu0 %v2062_v38  ;;  %2084 = vadd.xlane.f32.xlu1 %v2083_v56  ;;  %v279_v38 = vsub.f32 %v244_v21, %v4236_v4  ;;  %v4413_v4 = vld [vmem:[#allocation2 + $0x418] sm:$0xff]  ;;  %v287_v56 = vsel %vm285_vm15, %v280_v60, 0.0  ;;  %v2110_v21 = vsel %vm301_vm0, %v1844_v58, 0.0  ;;  %v290_v60 = vsel %vm5443_vm1, %v284_v16, 0.0  ;;  %v863_v48 = vpop.f32.mrf.mxu0 }
 0x133   :  { %3285 = vmatpush.xpose.msk.msra.mxu0 %vm301_vm0, %v4413_v4  ;;  %v4435_v18 = vpop.f32.mrf.mxu1  ;;  %v1837_v58 = vmul.f32 %v1677_v31, %v1677_v31  ;;  %3317 = vmatpush.xpose.msk.msra.mxu2 %vm301_vm0, %v4425_v37  ;;  %v1829_v16 = vmul.f32 %v1669_v10, %v1669_v10  ;;  %vm2915_vm1 = vcmask 1046534  }
 0x134   :  { %v286_v17 = vsel %vm285_vm15, %v279_v38, 0.0  ;;  %v1691_v38 = vsub.f32 %v4256_v27, %v3992_v61  ;;  %3335 = vmatpush.xpose.msk.msra.mxu3 %vm301_vm0, %v4427_v23  ;;  %3264 = vmatmul.msk.f32.gmra.mxu2 %vm301_vm0, %v4086_v30  ;;  %v1678_v42 = vsub.f32 %v4435_v18, %v4082_v15 }
 0x135   :  { %v4388_v57 = vpop.xlane.xlu0 %1982  ;;  %v4405_v3 = vpop.xlane.xlu1 %1958  ;;  %v288_v12 = vadd.f32 %v287_v56, %v286_v17  ;;  %v4451_v56 = vld [vmem:[#allocation2 + $0x460] sm:$0xff] }
 0x136   :  { %2060 = vadd.xlane.f32.xlu2 %v2059_v11  ;;  %v189_v17 = vld [vmem:[#allocation2 + $0x4c0] sm:$0xff]  ;;  %3300 = vmatpush.xpose.msk.msra.mxu1 %vm301_vm0, %v4451_v56  ;;  %v1058_v41 = vpop.f32.mrf.mxu3  ;;  %v1838_v18 = vmul.f32 %v1678_v42, %v1678_v42 }
 0x137   :  { %v291_v31 = vadd.f32 %v290_v60, %v288_v12  ;;  %3286 = vmatpush.xpose.msk.msra.mxu0 %vm301_vm0, %v4443_v55  ;;  %3318 = vmatpush.xpose.msk.msra.mxu2 %vm301_vm0, %v4455_v25  ;;  %v166_v12 = vld [vmem:[#allocation2 + $0x408] sm:$0xff]  ;;  %v1851_v60 = vmul.f32 %v1691_v38, %v1691_v38  ;;  %v1719_v49 = vsub.f32 %v1058_v41, %v3888_v59 }
 0x138   :  { %3336 = vmatpush.xpose.msk.msra.mxu3 %vm301_vm0, %v189_v17  ;;  %3232 = vmatmul.msk.f32.gmra.mxu0 %vm301_vm0, %v4071_v28  ;;  %v2092_v42 = vsel %vm301_vm0, %v1838_v18, 0.0 }
 0x139   :  { %v4431_v11 = vpop.xlane.xlu2 %1979  ;;  %3248 = vmatmul.msk.f32.gmra.mxu1 %vm301_vm0, %v4042_v6  ;;  %v2131_v5 = vsel %vm301_vm0, %v1851_v60, 0.0  ;;  %v1695_v60 = vsub.f32 %v863_v48, %v3888_v59  ;;  %v1879_v41 = vmul.f32 %v1719_v49, %v1719_v49  ;;  %v2635_v49 = vperm.slane %v4283_v29, %v3753_v2 }
 0x13a   :  { %2135 = vadd.xlane.f32.xlu0 %v2134_v13  ;;  %2111 = vadd.xlane.f32.xlu1 %v2110_v21  ;;  %v754_v13 = vpop.f32.mrf.mxu2  ;;  %v2089_v21 = vsel %vm301_vm0, %v1837_v58, 0.0  ;;  %v4472_v58 = vld [vmem:[#allocation2 + $0x458] sm:$0xff] }
 0x13b   :  { %v1686_v10 = vsub.f32 %v754_v13, %v4082_v15  ;;  %3287 = vmatpush.xpose.msk.msra.mxu0 %vm301_vm0, %v166_v12  ;;  %v4474_v13 = vld [vmem:[#allocation2 + $0x488] sm:$0xff]  ;;  %3337 = vmatmul.msk.f32.vlgmr.msra.gmra.mxu3 %vm301_vm0, %v189_v17  ;;  %v4488_v6 = vpop.f32.mrf.mxu1  ;;  %v4495_v17 = vld [vmem:[#allocation2 + $0x450] sm:$0xff]  ;;  %v1855_v32 = vmul.f32 %v1695_v60, %v1695_v60 }
 0x13c   :  { %3301 = vmatpush.xpose.msk.msra.mxu1 %vm301_vm0, %v4472_v58  ;;  %3319 = vmatpush.xpose.msk.msra.mxu2 %vm301_vm0, %v4474_v13 }
 0x13d   :  { %v4449_v45 = vpop.xlane.xlu0 %2009  ;;  %v4459_v27 = vpop.xlane.xlu1 %2030  ;;  %v1846_v28 = vmul.f32 %v1686_v10, %v1686_v10  ;;  %v181_v10 = vld [vmem:[#allocation2 + $0x480] sm:$0xff] }
 0x13e   :  { %292 = vadd.xlane.f32.xlu2 %v291_v31  ;;  %v2065_v31 = vsel %vm301_vm0, %v1829_v16, 0.0  ;;  %v1676_v16 = vsub.f32 %v4302_v35, %v4026_v50  ;;  %v4505_v50 = vpop.f32.mrf.mxu3 }
 0x13f   :  { %3288 = vmatpush.xpose.msk.msra.mxu0 %vm301_vm0, %v165_v14  ;;  %v2116_v35 = vsel %vm301_vm0, %v1846_v28, 0.0  ;;  %v4512_v28 = vld [vmem:[#allocation2 + $0x448] sm:$0xff] }
 0x140   :  { %3302 = vmatpush.xpose.msk.msra.mxu1 %vm301_vm0, %v4495_v17  ;;  %3320 = vmatpush.xpose.msk.msra.mxu2 %vm301_vm0, %v181_v10 }
 0x141   :  { %v4478_v38 = vpop.xlane.xlu2 %2006 }
 0x142   :  { %2090 = vadd.xlane.f32.xlu0 %v2089_v21  ;;  %2066 = vadd.xlane.f32.xlu1 %v2065_v31  ;;  %v1853_v21 = vmul.f32 %v1693_v8, %v1693_v8  ;;  %v993_v54 = vpop.f32.mrf.mxu2  ;;  %v4501_v31 = vpop.f32.mrf.mxu0  ;;  %v1836_v8 = vmul.f32 %v1676_v16, %v1676_v16  ;;  %v1685_v16 = vsub.f32 %v4372_v46, %v4049_v36  ;;  %v4539_v36 = vadd.s32 4294967288, %v3753_v2 }
 0x143   :  { %3289 = vmatmul.msk.f32.vlgmr.msra.gmra.mxu0 %vm301_vm0, %v165_v14  ;;  %3321 = vmatmul.msk.f32.vlgmr.msra.gmra.mxu2 %vm301_vm0, %v181_v10  ;;  %v931_v63 = vpop.f32.mrf.mxu1  ;;  %v2143_v10 = vsel %vm301_vm0, %v1855_v32, 0.0 }
 0x144   :  { %3303 = vmatpush.xpose.msk.msra.mxu1 %vm301_vm0, %v4512_v28  ;;  %v2086_v14 = vsel %vm301_vm0, %v1836_v8, 0.0  ;;  %3338 = vmatmul.msk.f32.gmra.mxu3 %vm301_vm0, %v4427_v23  ;;  %v1845_v46 = vmul.f32 %v1685_v16, %v1685_v16  ;;  %v1711_v8 = vsub.f32 %v993_v54, %v3888_v59  ;;  %v1670_v54 = vsub.f32 %v4390_v26, %v4082_v15 }
 0x145   :  { %v4492_v30 = vpop.xlane.xlu0 %1964  ;;  %v4497_v44 = vpop.xlane.xlu1 %1985  ;;  %v4552_v16 = vadd.s32 4294967280, %v3753_v2  ;;  %v4561_v26 = vadd.s32 4294967272, %v3753_v2  ;;  %v1704_v29 = vsub.f32 %v931_v63, %v3950_v51  ;;  %v1696_v63 = vsub.f32 %v4501_v31, %v3950_v51 }
 0x146   :  { %2132 = vadd.xlane.f32.xlu2 %v2131_v5  ;;  %v2137_v5 = vsel %vm301_vm0, %v1853_v21, 0.0  ;;  %v1871_v18 = vmul.f32 %v1711_v8, %v1711_v8  ;;  %v2215_v8 = vsel %vm301_vm0, %v1879_v41, 0.0 }
 0x148   :  { %v2191_v41 = vsel %vm301_vm0, %v1871_v18, 0.0  ;;  %v1864_v18 = vmul.f32 %v1704_v29, %v1704_v29  ;;  %v4623_v29 = vadd.s32 4294967248, %v3753_v2 }
 0x149   :  { %v4514_v48 = vpop.xlane.xlu2 %1961 }
 0x14a   :  { %2117 = vadd.xlane.f32.xlu0 %v2116_v35  ;;  %2138 = vadd.xlane.f32.xlu1 %v2137_v5  ;;  %v173_v35 = vld [vmem:[#allocation2 + $0x440] sm:$0xff]  ;;  %v4534_v23 = vpop.f32.mrf.mxu2  ;;  %v4536_v5 = vpop.f32.mrf.mxu0 }
 0x14b   :  { %3304 = vmatpush.xpose.msk.msra.mxu1 %vm301_vm0, %v173_v35  ;;  %3290 = vmatmul.msk.f32.gmra.mxu0 %vm301_vm0, %v166_v12  ;;  %5459 = vst [vmem:[#allocation22_spill] sm:$0xff] %v4536_v5  ;;  %v2113_v12 = vsel %vm301_vm0, %v1845_v46, 0.0  ;;  %v4576_v5 = vadd.s32 4294967264, %v3753_v2 }
 0x14c   :  { %3322 = vmatmul.msk.f32.gmra.mxu2 %vm301_vm0, %v4474_v13  ;;  %3339 = vmatmul.msk.f32.gmra.mxu3 %vm301_vm0, %v4398_v24  ;;  %v2651_v13 = vperm.slane %v4333_v22, %v4539_v36  ;;  %v2636_v24 = vperm.slane %v4348_v1, %v4539_v36  ;;  %v4578_v1 = vpop.f32.mrf.mxu1 }
 0x14d   :  { %v4524_v21 = vpop.xlane.xlu0 %2036  ;;  %v4526_v60 = vpop.xlane.xlu1 %2012 }
 0x14e   :  { %2087 = vadd.xlane.f32.xlu2 %v2086_v14  ;;  %v4541_v14 = vpop.f32.mrf.mxu3  ;;  %3305 = vmatmul.msk.f32.vlgmr.msra.gmra.mxu1 %vm301_vm0, %v173_v35  ;;  %v1694_v35 = vsub.f32 %v4401_v9, %v4082_v15  ;;  %v2653_v9 = vperm.slane %v4459_v27, %v4552_v16  ;;  %v2593_v27 = vperm.slane %v4370_v34, %v4539_v36 }
 0x14f   :  { %5460 = vst [vmem:[#allocation23_spill] sm:$0xff] %v4541_v14  ;;  %v1830_v14 = vmul.f32 %v1670_v54, %v1670_v54 }
 0x150   :  { %v1854_v31 = vmul.f32 %v1694_v35, %v1694_v35  ;;  %v1856_v35 = vmul.f32 %v1696_v63, %v1696_v63 }
 0x151   :  { %v2034_v32 = vpop.xlane.xlu2 %2033 }
 0x152   :  { %2144 = vadd.xlane.f32.xlu0 %v2143_v10  ;;  %2093 = vadd.xlane.f32.xlu1 %v2092_v42  ;;  %v2650_v42 = vperm.slane %v4316_v43, %v3753_v2  ;;  %v2620_v43 = vperm.slane %v4298_v33, %v3753_v2  ;;  %v999_v15 = vpop.f32.mrf.mxu2  ;;  %v2621_v33 = vperm.slane %v4431_v11, %v4539_v36 }
 0x153   :  { %3291 = vmatmul.msk.f32.gmra.mxu0 %vm301_vm0, %v4443_v55  ;;  %v2637_v55 = vsel %vm2594_vm2, %v2636_v24, %v2635_v49  ;;  %v2068_v49 = vsel %vm301_vm0, %v1830_v14, 0.0  ;;  %v2657_v11 = vperm.slane %v4524_v21, %v4576_v5  ;;  %v2640_v21 = vperm.slane %v4449_v45, %v4561_v26 }
 0x154   :  { %v2652_v54 = vsel %vm2594_vm2, %v2651_v13, %v2650_v42  ;;  %3323 = vmatmul.msk.f32.gmra.mxu2 %vm301_vm0, %v4455_v25  ;;  %v872_v13 = vpop.f32.mrf.mxu0  ;;  %3340 = vmatmul.msk.f32.gmra.mxu3 %vm301_vm0, %v4365_v39  ;;  %v2597_v39 = vperm.slane %v4405_v3, %v4552_v16  ;;  %v1713_v63 = vsub.f32 %v999_v15, %v3961_v47 }
 0x155   :  { %v4554_v10 = vpop.xlane.xlu0 %1991  ;;  %v4567_v46 = vpop.xlane.xlu1 %1967  ;;  %v2654_v25 = vsel %vm2598_vm3, %v2653_v9, %v2652_v54  ;;  %v2170_v9 = vsel %vm301_vm0, %v1864_v18, 0.0  ;;  %v2642_v54 = vperm.slane %v4526_v60, %v4576_v5  ;;  %v2625_v3 = vperm.slane %v4497_v44, %v4561_v26 }
 0x156   :  { %2114 = vadd.xlane.f32.xlu2 %v2113_v12  ;;  %v2655_v12 = vperm.slane %v2034_v32, %v4561_v26  ;;  %3306 = vmatmul.msk.f32.gmra.mxu1 %vm301_vm0, %v4512_v28  ;;  %v2638_v32 = vperm.slane %v4478_v38, %v4552_v16  ;;  %v4606_v28 = vsub.f32 %v4488_v6, %v3888_v59  ;;  %v4609_v24 = vpop.f32.mrf.mxu3  ;;  %v4617_v38 = vadd.s32 4294967256, %v3753_v2 }
 0x157   :  { %v1720_v15 = vsub.f32 %v4505_v50, %v3950_v51 }
 0x158   :  { %v2656_v14 = vsel %vm2602_vm4, %v2655_v12, %v2654_v25  ;;  %v2601_v25 = vperm.slane %v4514_v48, %v4561_v26  ;;  %v5461_v48 = vperm.slane %v4268_v7, %v3753_v2 }
 0x159   :  { %v4591_v22 = vpop.xlane.xlu2 %1988  ;;  %v2658_v45 = vsel %vm2606_vm5, %v2657_v11, %v2656_v14  ;;  %v1880_v14 = vmul.f32 %v1720_v15, %v1720_v15 }
 0x15a   :  { %2216 = vadd.xlane.f32.xlu0 %v2215_v8  ;;  %2192 = vadd.xlane.f32.xlu1 %v2191_v41  ;;  %v2623_v8 = vperm.slane %v4388_v57, %v4552_v16  ;;  %v2622_v57 = vsel %vm2594_vm2, %v2621_v33, %v2620_v43  ;;  %v2639_v41 = vsel %vm2598_vm3, %v2638_v32, %v2637_v55  ;;  %v2146_v43 = vsel %vm301_vm0, %v1856_v35, 0.0  ;;  %v4650_v33 = vpop.f32.mrf.mxu1 }
 0x15b   :  { %3292 = vmatmul.msk.f32.gmra.mxu0 %vm301_vm0, %v4413_v4  ;;  %v2627_v55 = vperm.slane %v4591_v22, %v4576_v5  ;;  %v2641_v44 = vsel %vm2602_vm4, %v2640_v21, %v2639_v41  ;;  %v1873_v32 = vmul.f32 %v1713_v63, %v1713_v63 }
 0x15c   :  { %3324 = vmatmul.msk.f32.gmra.mxu2 %vm301_vm0, %v4425_v37  ;;  %v2624_v22 = vsel %vm2598_vm3, %v2623_v8, %v2622_v57  ;;  %v2643_v11 = vsel %vm2606_vm5, %v2642_v54, %v2641_v44  ;;  %v4665_v35 = vpop.f32.mrf.mxu0  ;;  %3341 = vmatmul.msk.f32.gmra.mxu3 %vm301_vm0, %v4341_v0  ;;  %v2629_v37 = vperm.slane %v4554_v10, %v4617_v38  ;;  %v4682_v0 = vadd.s32 4294967240, %v3753_v2 }
 0x15d   :  { %v2019_v6 = vpop.xlane.xlu0 %2018  ;;  %v2040_v42 = vpop.xlane.xlu1 %2039  ;;  %v2605_v57 = vperm.slane %v4492_v30, %v4576_v5  ;;  %v2197_v34 = vsel %vm301_vm0, %v1873_v32, 0.0  ;;  %v1863_v54 = vmul.f32 %v4606_v28, %v4606_v28  ;;  %v1705_v30 = vsub.f32 %v4578_v1, %v3961_v47 }
 0x15e   :  { %2069 = vadd.xlane.f32.xlu2 %v2068_v49  ;;  %v2659_v12 = vperm.slane %v2040_v42, %v4617_v38  ;;  %v2646_v60 = vperm.slane %v2019_v6, %v4623_v29  ;;  %3307 = vmatmul.msk.f32.gmra.mxu1 %vm301_vm0, %v4495_v17  ;;  %v4656_v49 = vpop.f32.mrf.mxu2  ;;  %v2140_v17 = vsel %vm301_vm0, %v1854_v31, 0.0  ;;  %v2626_v6 = vsel %vm2602_vm4, %v2625_v3, %v2624_v22  ;;  %v4685_v10 = vpop.f32.mrf.mxu3 }
 0x15f   :  { %v2595_v31 = vsel %vm2594_vm2, %v2593_v27, %v5461_v48  ;;  %v2628_v42 = vsel %vm2606_vm5, %v2627_v55, %v2626_v6  ;;  %v1698_v27 = vsub.f32 %v872_v13, %v3983_v53  ;;  %v2218_v13 = vsel %vm301_vm0, %v1880_v14, 0.0 }
 0x160   :  { %v4648_v18 = vsel %vm2610_vm6, %v2659_v12, %v2658_v45  ;;  %v2599_v63 = vsel %vm2598_vm3, %v2597_v39, %v2595_v31  ;;  %v2609_v12 = vperm.slane %v4567_v46, %v4617_v38  ;;  %v2630_v39 = vsel %vm2610_vm6, %v2629_v37, %v2628_v42 }
 0x161   :  { %v2016_v4 = vpop.xlane.xlu2 %2015  ;;  %v2603_v41 = vsel %vm2602_vm4, %v2601_v25, %v2599_v63  ;;  %v1858_v1 = vmul.f32 %v1698_v27, %v1698_v27  ;;  %v1712_v55 = vsub.f32 %v4534_v23, %v3950_v51 }
 0x162   :  { %2171 = vadd.xlane.f32.xlu0 %v2170_v9  ;;  %v2644_v50 = vperm.slane %v2016_v4, %v4617_v38  ;;  %2147 = vadd.xlane.f32.xlu1 %v2146_v43  ;;  %v2607_v46 = vsel %vm2606_vm5, %v2605_v57, %v2603_v41  ;;  %v940_v4 = vpop.f32.mrf.mxu1  ;;  %v5463_v57 = vld [vmem:[#allocation17_spill] sm:$0xff] }
 0x163   :  { %3293 = vmatmul.msk.f32.gmra.mxu0 %vm301_vm0, %v4381_v52  ;;  %v2611_v43 = vsel %vm2610_vm6, %v2609_v12, %v2607_v46  ;;  %v1872_v6 = vmul.f32 %v1712_v55, %v1712_v55 }
 0x164   :  { %v2645_v8 = vsel %vm2610_vm6, %v2644_v50, %v2643_v11  ;;  %3325 = vmatmul.msk.f32.gmra.mxu2 %vm301_vm0, %v4396_v40  ;;  %v4718_v44 = vpop.f32.mrf.mxu0  ;;  %3342 = vmatmul.msk.f32.gmra.mxu3 %vm301_vm0, %v4312_v20  ;;  %v2152_v11 = vsel %vm301_vm0, %v1858_v1, 0.0  ;;  %v1714_v20 = vsub.f32 %v4656_v49, %v3983_v53  ;;  %v5466_v1 = vld [vmem:[#allocation20_spill] sm:$0xff] }
 0x165   :  { %v1974_v21 = vpop.xlane.xlu0 %1973  ;;  %v2647_v9 = vsel %vm2614_vm7, %v2646_v60, %v2645_v8  ;;  %v1995_v7 = vpop.xlane.xlu1 %1994  ;;  %v2167_v60 = vsel %vm301_vm0, %v1863_v54, 0.0  ;;  %v2194_v63 = vsel %vm301_vm0, %v1872_v6, 0.0  ;;  %v1723_v54 = vsub.f32 %v4685_v10, %v3992_v61  ;;  %v5469_v6 = vld [vmem:[#allocation10_spill] sm:$0xff] }
 0x166   :  { %2141 = vadd.xlane.f32.xlu2 %v2140_v17  ;;  %v2631_v3 = vperm.slane %v1995_v7, %v4623_v29  ;;  %v2617_v45 = vperm.slane %v1974_v21, %v4682_v0  ;;  %3308 = vmatmul.msk.f32.gmra.mxu1 %vm301_vm0, %v4472_v58  ;;  %v1865_v58 = vmul.f32 %v1705_v30, %v1705_v30  ;;  %v4723_v22 = vpop.f32.mrf.mxu2  ;;  %v4726_v25 = vpop.f32.mrf.mxu3 }
 0x167   :  { %v1707_v17 = vsub.f32 %v940_v4, %v3992_v61  ;;  %v1874_v7 = vmul.f32 %v1714_v20, %v1714_v20  ;;  %v1883_v46 = vmul.f32 %v1723_v54, %v1723_v54 }
 0x168   :  { %v4706_v15 = vsel %vm2614_vm7, %v2631_v3, %v2630_v39  ;;  %v2173_v8 = vsel %vm301_vm0, %v1865_v58, 0.0 }
 0x169   :  { %v1971_v28 = vpop.xlane.xlu2 %1970  ;;  %v1867_v42 = vmul.f32 %v1707_v17, %v1707_v17  ;;  %v2200_v39 = vsel %vm301_vm0, %v1874_v7, 0.0  ;;  %v2227_v17 = vsel %vm301_vm0, %v1883_v46, 0.0  ;;  %v5472_v7 = vld [vmem:[#allocation16_spill] sm:$0xff] }
 0x16a   :  { %2198 = vadd.xlane.f32.xlu0 %v2197_v34  ;;  %v2613_v52 = vperm.slane %v1971_v28, %v4623_v29  ;;  %2219 = vadd.xlane.f32.xlu1 %v2218_v13  ;;  %v1699_v13 = vsub.f32 %v4665_v35, %v3992_v61  ;;  %v5465_v28 = vld [vmem:[#allocation21_spill] sm:$0xff] }
 0x16b   :  { %3294 = vmatmul.msk.f32.gmra.mxu0 %vm301_vm0, %v4352_v62  ;;  %v5462_v62 = vld [vmem:[#allocation22_spill] sm:$0xff]  ;;  %v2179_v41 = vsel %vm301_vm0, %v1867_v42, 0.0 }
 0x16c   :  { %v2615_v50 = vsel %vm2614_vm7, %v2613_v52, %v2611_v43  ;;  %3326 = vmatmul.msk.f32.gmra.mxu2 %vm301_vm0, %v4363_v19  ;;  %v1697_v49 = vsub.f32 %v5462_v62, %v3961_v47  ;;  %3343 = vmatmul.msk.f32.gmra.mxu3 %vm301_vm0, %v5463_v57  ;;  %v4753_v27 = vpop.f32.mrf.mxu0  ;;  %v943_v52 = vpop.f32.mrf.mxu1  ;;  %v5467_v43 = vld [vmem:[#allocation23_spill] sm:$0xff] }
 0x16d   :  { %v2046_v32 = vpop.xlane.xlu0 %2045  ;;  %v2619_v40 = vsel %vm2618_vm8, %v2617_v45, %v2615_v50  ;;  %v2022_v23 = vpop.xlane.xlu1 %2021  ;;  %v1721_v55 = vsub.f32 %v5467_v43, %v3961_v47  ;;  %v1859_v50 = vmul.f32 %v1699_v13, %v1699_v13 }
 0x16e   :  { %2168 = vadd.xlane.f32.xlu2 %v2167_v60  ;;  %v2648_v37 = vperm.slane %v2022_v23, %v4682_v0  ;;  %v2663_v14 = vperm.slane %v2046_v32, %v4682_v0  ;;  %3309 = vmatmul.msk.f32.gmra.mxu1 %vm301_vm0, %v4451_v56  ;;  %v1008_v12 = vpop.f32.mrf.mxu2  ;;  %v1857_v3 = vmul.f32 %v1697_v49, %v1697_v49  ;;  %v4760_v30 = vpop.f32.mrf.mxu3  ;;  %v5468_v60 = vld [vmem:[#allocation13_spill] sm:$0xff]  ;;  %v5471_v49 = vld [vmem:[#allocation19_spill] sm:$0xff] }
 0x170   :  { %v2649_v21 = vsel %vm2618_vm8, %v2648_v37, %v2647_v9  ;;  %v2149_v35 = vsel %vm301_vm0, %v1857_v3, 0.0  ;;  %v1716_v37 = vsub.f32 %v1008_v12, %v5469_v6 }
 0x171   :  { %v2043_v48 = vpop.xlane.xlu2 %2042 }
 0x172   :  { %2153 = vadd.xlane.f32.xlu0 %v2152_v11  ;;  %v2661_v31 = vperm.slane %v2043_v48, %v4623_v29  ;;  %2174 = vadd.xlane.f32.xlu1 %v2173_v8  ;;  %v1881_v8 = vmul.f32 %v1721_v55, %v1721_v55  ;;  %v5470_v48 = vld [vmem:[#allocation14_spill] sm:$0xff]  ;;  %v1876_v57 = vmul.f32 %v1716_v37, %v1716_v37 }
 0x174   :  { %v2662_v9 = vsel %vm2614_vm7, %v2661_v31, %v4648_v18  ;;  %v5464_v18 = vld [vmem:[#allocation18_spill] sm:$0xff]  ;;  %3327 = vmatmul.msk.f32.gmra.mxu2 %vm301_vm0, %v5466_v1  ;;  %3344 = vmatmul.msk.f32.gmra.mxu3 %vm301_vm0, %v5468_v60  ;;  %v1708_v31 = vsub.f32 %v943_v52, %v5469_v6  ;;  %v2206_v13 = vsel %vm301_vm0, %v1876_v57, 0.0  ;;  %v5473_v52 = vld [vmem:[#allocation11_spill] sm:$0xff] }
 0x175   :  { %v4750_v56 = vpop.xlane.xlu0 %2072  ;;  %v2664_v34 = vsel %vm2618_vm8, %v2663_v14, %v2662_v9  ;;  %v4755_v19 = vpop.xlane.xlu1 %2048  ;;  %3295 = vmatmul.msk.f32.gmra.mxu0 %vm301_vm0, %v5464_v18  ;;  %v5474_v60 = vld [vmem:[#allocation15_spill] sm:$0xff] }
 0x176   :  { %2195 = vadd.xlane.f32.xlu2 %v2194_v63  ;;  %3310 = vmatmul.msk.f32.gmra.mxu1 %vm301_vm0, %v5465_v28  ;;  %v1011_v20 = vpop.f32.mrf.mxu2  ;;  %v4785_v14 = vpop.f32.mrf.mxu0  ;;  %v1868_v3 = vmul.f32 %v1708_v31, %v1708_v31  ;;  %v2680_v18 = vperm.slane %v4750_v56, %v3753_v2 }
 0x177   :  { %v4795_v62 = vpop.f32.mrf.mxu3  ;;  %v4800_v9 = vpop.f32.mrf.mxu1  ;;  %v1717_v1 = vsub.f32 %v1011_v20, %v5473_v52 }
 0x178   :  { %v2182_v46 = vsel %vm301_vm0, %v1868_v3, 0.0 }
 0x179   :  { %v1998_v45 = vpop.xlane.xlu2 %1997  ;;  %v1877_v20 = vmul.f32 %v1717_v1, %v1717_v1  ;;  %v5475_v1 = vld [vmem:[#allocation12_spill] sm:$0xff] }
 0x17a   :  { %2180 = vadd.xlane.f32.xlu0 %v2179_v41  ;;  %v2633_v10 = vperm.slane %v1998_v45, %v4682_v0  ;;  %2201 = vadd.xlane.f32.xlu1 %v2200_v39  ;;  %v2221_v41 = vsel %vm301_vm0, %v1881_v8, 0.0  ;;  %v1724_v45 = vsub.f32 %v4726_v25, %v5469_v6  ;;  %v2665_v25 = vperm.slane %v4755_v19, %v3753_v2 }
 0x17c   :  { %v2634_v4 = vsel %vm2618_vm8, %v2633_v10, %v4706_v15  ;;  %3328 = vmatmul.msk.f32.gmra.mxu2 %vm301_vm0, %v5472_v7 }
 0x17d   :  { %v2100_v58 = vpop.xlane.xlu0 %2099  ;;  %v2906_v32 = vsel %vm2905_vm9, %v2634_v4, %v2619_v40  ;;  %v4781_v11 = vpop.xlane.xlu1 %2120  ;;  %3296 = vmatmul.msk.f32.gmra.mxu0 %vm301_vm0, %v5470_v48 }
 0x17e   :  { %v2908_v23 = vsel %vm2907_vm10, %v2649_v21, %v2906_v32  ;;  %2150 = vadd.xlane.f32.xlu2 %v2149_v35  ;;  %v2696_v40 = vperm.slane %v2100_v58, %v4539_v36  ;;  %v2155_v21 = vsel %vm301_vm0, %v1859_v50, 0.0  ;;  %3311 = vmatmul.msk.f32.gmra.mxu1 %vm301_vm0, %v5471_v49  ;;  %v4813_v28 = vpop.f32.mrf.mxu2  ;;  %v4820_v35 = vpop.f32.mrf.mxu0  ;;  %v1884_v58 = vmul.f32 %v1724_v45, %v1724_v45 }
 0x17f   :  { %v4790_v15 = vsel %vm2909_vm11, %v2664_v34, %v2908_v23  ;;  %v1706_v34 = vsub.f32 %v4650_v33, %v3983_v53  ;;  %v1722_v50 = vsub.f32 %v4609_v24, %v3983_v53  ;;  %v4830_v23 = vpop.f32.mrf.mxu3  ;;  %v949_v8 = vpop.f32.mrf.mxu1  ;;  %v2209_v49 = vsel %vm301_vm0, %v1877_v20, 0.0 }
 0x180   :  { %v2230_v19 = vsel %vm301_vm0, %v1884_v58, 0.0  ;;  %v1700_v20 = vsub.f32 %v4718_v44, %v5469_v6 }
 0x181   :  { %v2097_v42 = vpop.xlane.xlu2 %2096  ;;  %v1866_v33 = vmul.f32 %v1706_v34, %v1706_v34  ;;  %v1882_v24 = vmul.f32 %v1722_v50, %v1722_v50 }
 0x182   :  { %2228 = vadd.xlane.f32.xlu0 %v2227_v17  ;;  %v2695_v63 = vperm.slane %v2097_v42, %v3753_v2  ;;  %2156 = vadd.xlane.f32.xlu1 %v2155_v21  ;;  %v1701_v21 = vsub.f32 %v4753_v27, %v5473_v52  ;;  %v1725_v42 = vsub.f32 %v4760_v30, %v5473_v52 }
 0x183   :  { %v2176_v32 = vsel %vm301_vm0, %v1866_v33, 0.0  ;;  %v2224_v3 = vsel %vm301_vm0, %v1882_v24, 0.0  ;;  %v1860_v44 = vmul.f32 %v1700_v20, %v1700_v20 }
 0x184   :  { %v2697_v54 = vsel %vm2594_vm2, %v2696_v40, %v2695_v63 }
 0x185   :  { %v2055_v12 = vpop.xlane.xlu0 %2054  ;;  %v2076_v39 = vpop.xlane.xlu1 %2075 }
 0x186   :  { %2222 = vadd.xlane.f32.xlu2 %v2221_v41  ;;  %v2681_v10 = vperm.slane %v2076_v39, %v4539_v36  ;;  %v2668_v43 = vperm.slane %v2055_v12, %v4552_v16  ;;  %3312 = vmatmul.msk.f32.gmra.mxu1 %vm301_vm0, %v5474_v60  ;;  %v4841_v63 = vpop.f32.mrf.mxu2  ;;  %v2710_v41 = vperm.slane %v4781_v11, %v3753_v2  ;;  %v4849_v30 = vpop.f32.mrf.mxu0 }
 0x187   :  { %v1861_v12 = vmul.f32 %v1701_v21, %v1701_v21  ;;  %v1885_v39 = vmul.f32 %v1725_v42, %v1725_v42  ;;  %v1188_v45 = vpop.f32.mrf.mxu1  ;;  %v1702_v60 = vsub.f32 %v4785_v14, %v5475_v1 }
 0x188   :  { %v2682_v56 = vsel %vm2594_vm2, %v2681_v10, %v2680_v18  ;;  %v4855_v10 = vpop.f32.mrf.mxu3 }
 0x189   :  { %v2052_v55 = vpop.xlane.xlu2 %2051 }
 0x18a   :  { %2207 = vadd.xlane.f32.xlu0 %v2206_v13  ;;  %v2666_v4 = vperm.slane %v2052_v55, %v4539_v36  ;;  %2183 = vadd.xlane.f32.xlu1 %v2182_v46  ;;  %v2161_v46 = vsel %vm301_vm0, %v1861_v12, 0.0 }
 0x18c   :  { %v2667_v17 = vsel %vm2594_vm2, %v2666_v4, %v2665_v25  ;;  %v2233_v25 = vsel %vm301_vm0, %v1885_v39, 0.0 }
 0x18d   :  { %v2127_v37 = vpop.xlane.xlu0 %2126  ;;  %v2669_v48 = vsel %vm2598_vm3, %v2668_v43, %v2667_v17  ;;  %v2103_v40 = vpop.xlane.xlu1 %2102  ;;  %v1710_v43 = vsub.f32 %v949_v8, %v5475_v1  ;;  %v1862_v8 = vmul.f32 %v1702_v60, %v1702_v60  ;;  %v1743_v60 = vsub.f32 %v4841_v63, %v3888_v59 }
 0x18e   :  { %2177 = vadd.xlane.f32.xlu2 %v2176_v32  ;;  %v2698_v31 = vperm.slane %v2103_v40, %v4552_v16  ;;  %v2713_v57 = vperm.slane %v2127_v37, %v4552_v16  ;;  %v4866_v37 = vpop.f32.mrf.mxu2  ;;  %v1129_v24 = vpop.f32.mrf.mxu0 }
 0x18f   :  { %v1870_v17 = vmul.f32 %v1710_v43, %v1710_v43 }
 0x190   :  { %v2699_v7 = vsel %vm2598_vm3, %v2698_v31, %v2697_v54  ;;  %v1715_v54 = vsub.f32 %v4723_v22, %v3992_v61 }
 0x191   :  { %v2124_v34 = vpop.xlane.xlu2 %2123  ;;  %v2188_v42 = vsel %vm301_vm0, %v1870_v17, 0.0 }
 0x192   :  { %2231 = vadd.xlane.f32.xlu0 %v2230_v19  ;;  %v2711_v27 = vperm.slane %v2124_v34, %v4539_v36  ;;  %2210 = vadd.xlane.f32.xlu1 %v2209_v49  ;;  %v1875_v4 = vmul.f32 %v1715_v54, %v1715_v54  ;;  %v4871_v19 = vpop.f32.mrf.mxu1  ;;  %v1727_v49 = vsub.f32 %v4820_v35, %v3888_v59  ;;  %v2164_v34 = vsel %vm301_vm0, %v1862_v8, 0.0 }
 0x193   :  { %v1709_v35 = vsub.f32 %v4800_v9, %v5473_v52  ;;  %v1903_v8 = vmul.f32 %v1743_v60, %v1743_v60 }
 0x194   :  { %v2712_v18 = vsel %vm2594_vm2, %v2711_v27, %v2710_v41  ;;  %v2203_v21 = vsel %vm301_vm0, %v1875_v4, 0.0  ;;  %v1735_v41 = vsub.f32 %v1188_v45, %v3888_v59  ;;  %v1887_v39 = vmul.f32 %v1727_v49, %v1727_v49 }
 0x195   :  { %v2082_v13 = vpop.xlane.xlu0 %2081  ;;  %v2714_v33 = vsel %vm2598_vm3, %v2713_v57, %v2712_v18  ;;  %v2058_v11 = vpop.xlane.xlu1 %2057  ;;  %v1869_v9 = vmul.f32 %v1709_v35, %v1709_v35 }
 0x196   :  { %2225 = vadd.xlane.f32.xlu2 %v2224_v3  ;;  %v2670_v55 = vperm.slane %v2058_v11, %v4561_v26  ;;  %v2685_v22 = vperm.slane %v2082_v13, %v4561_v26  ;;  %v2158_v13 = vsel %vm301_vm0, %v1860_v44, 0.0  ;;  %v1895_v45 = vmul.f32 %v1735_v41, %v1735_v41 }
 0x197   :  { %v2287_v44 = vsel %vm301_vm0, %v1903_v8, 0.0 }
 0x198   :  { %v2671_v58 = vsel %vm2602_vm4, %v2670_v55, %v2669_v48  ;;  %v2239_v55 = vsel %vm301_vm0, %v1887_v39, 0.0 }
 0x199   :  { %v2079_v50 = vpop.xlane.xlu2 %2078 }
 0x19a   :  { %2162 = vadd.xlane.f32.xlu0 %v2161_v46  ;;  %v2683_v32 = vperm.slane %v2079_v50, %v4552_v16  ;;  %2234 = vadd.xlane.f32.xlu1 %v2233_v25  ;;  %v1259_v46 = vpop.f32.mrf.mxu2  ;;  %v4896_v25 = vpop.f32.mrf.mxu1  ;;  %v2263_v50 = vsel %vm301_vm0, %v1895_v45, 0.0 }
 0x19c   :  { %v2684_v14 = vsel %vm2598_vm3, %v2683_v32, %v2682_v56  ;;  %v4879_v56 = vpop.f32.mrf.mxu3 }
 0x19d   :  { %v2109_v40 = vpop.xlane.xlu0 %2108  ;;  %v2686_v48 = vsel %vm2602_vm4, %v2685_v22, %v2684_v14  ;;  %v2130_v31 = vpop.xlane.xlu1 %2129 }
 0x19e   :  { %2204 = vadd.xlane.f32.xlu2 %v2203_v21  ;;  %v2715_v57 = vperm.slane %v2130_v31, %v4561_v26  ;;  %v2702_v27 = vperm.slane %v2109_v40, %v4576_v5  ;;  %v4899_v22 = vpop.f32.mrf.mxu0  ;;  %v1718_v40 = vsub.f32 %v4813_v28, %v5475_v1  ;;  %v2185_v21 = vsel %vm301_vm0, %v1869_v9, 0.0 }
 0x1a0   :  { %v4885_v12 = vsel %vm2602_vm4, %v2715_v57, %v2714_v33  ;;  %v1729_v57 = vsub.f32 %v1129_v24, %v3961_v47  ;;  %v1878_v41 = vmul.f32 %v1718_v40, %v1718_v40 }
 0x1a1   :  { %v2106_v3 = vpop.xlane.xlu2 %2105 }
 0x1a2   :  { %2189 = vadd.xlane.f32.xlu0 %v2188_v42  ;;  %v2700_v18 = vperm.slane %v2106_v3, %v4561_v26  ;;  %2165 = vadd.xlane.f32.xlu1 %v2164_v34  ;;  %v4916_v34 = vpop.f32.mrf.mxu2 }
 0x1a4   :  { %v2701_v54 = vsel %vm2602_vm4, %v2700_v18, %v2699_v7  ;;  %v1751_v7 = vsub.f32 %v4830_v23, %v3888_v59  ;;  %v1327_v63 = vpop.f32.mrf.mxu3 }
 0x1a5   :  { %v2064_v11 = vpop.xlane.xlu0 %2063  ;;  %v2703_v43 = vsel %vm2606_vm5, %v2702_v27, %v2701_v54  ;;  %v2085_v33 = vpop.xlane.xlu1 %2084  ;;  %v1728_v27 = vsub.f32 %v4849_v30, %v3950_v51  ;;  %v1726_v54 = vsub.f32 %v4795_v62, %v5475_v1  ;;  %v1744_v62 = vsub.f32 %v4866_v37, %v3950_v51 }
 0x1a6   :  { %2159 = vadd.xlane.f32.xlu2 %v2158_v13  ;;  %v2687_v4 = vperm.slane %v2085_v33, %v4576_v5  ;;  %v2674_v32 = vperm.slane %v2064_v11, %v4617_v38  ;;  %v1911_v23 = vmul.f32 %v1751_v7, %v1751_v7  ;;  %v4927_v35 = vpop.f32.mrf.mxu0  ;;  %v1889_v13 = vmul.f32 %v1729_v57, %v1729_v57 }
 0x1a7   :  { %v2212_v11 = vsel %vm301_vm0, %v1878_v41, 0.0  ;;  %v1888_v45 = vmul.f32 %v1728_v27, %v1728_v27  ;;  %v1886_v7 = vmul.f32 %v1726_v54, %v1726_v54  ;;  %v1904_v41 = vmul.f32 %v1744_v62, %v1744_v62 }
 0x1a8   :  { %v4906_v17 = vsel %vm2606_vm5, %v2687_v4, %v2686_v48  ;;  %v2311_v3 = vsel %vm301_vm0, %v1911_v23, 0.0  ;;  %v2245_v9 = vsel %vm301_vm0, %v1889_v13, 0.0  ;;  %v1745_v4 = vsub.f32 %v1259_v46, %v3961_v47 }
 0x1a9   :  { %v2061_v20 = vpop.xlane.xlu2 %2060  ;;  %v2236_v37 = vsel %vm301_vm0, %v1886_v7, 0.0 }
 0x1aa   :  { %2240 = vadd.xlane.f32.xlu0 %v2239_v55  ;;  %v2672_v14 = vperm.slane %v2061_v20, %v4576_v5  ;;  %2264 = vadd.xlane.f32.xlu1 %v2263_v50  ;;  %v1905_v23 = vmul.f32 %v1745_v4, %v1745_v4  ;;  %v1752_v4 = vsub.f32 %v4855_v10, %v3950_v51 }
 0x1ac   :  { %v2673_v31 = vsel %vm2606_vm5, %v2672_v14, %v2671_v58  ;;  %v4922_v58 = vpop.f32.mrf.mxu1  ;;  %v4932_v30 = vpop.f32.mrf.mxu3  ;;  %v1912_v10 = vmul.f32 %v1752_v4, %v1752_v4 }
 0x1ad   :  { %v2136_v42 = vpop.xlane.xlu0 %2135  ;;  %v2675_v49 = vsel %vm2610_vm6, %v2674_v32, %v2673_v31  ;;  %v2112_v48 = vpop.xlane.xlu1 %2111  ;;  %v2242_v32 = vsel %vm301_vm0, %v1888_v45, 0.0 }
 0x1ae   :  { %2186 = vadd.xlane.f32.xlu2 %v2185_v21  ;;  %v2704_v28 = vperm.slane %v2112_v48, %v4617_v38  ;;  %v4940_v14 = vpop.f32.mrf.mxu2  ;;  %v2719_v8 = vperm.slane %v2136_v42, %v4617_v38  ;;  %v1736_v48 = vsub.f32 %v4871_v19, %v3950_v51  ;;  %v2293_v19 = vsel %vm301_vm0, %v1905_v23, 0.0 }
 0x1b0   :  { %v4925_v18 = vsel %vm2610_vm6, %v2704_v28, %v2703_v43  ;;  %v1896_v13 = vmul.f32 %v1736_v48, %v1736_v48 }
 0x1b1   :  { %v293_v39 = vpop.xlane.xlu2 %292 }
 0x1b2   :  { %2288 = vadd.xlane.f32.xlu0 %v2287_v44  ;;  %v294_v24 = vrot.slane %v293_v39, 4  ;;  %2312 = vadd.xlane.f32.xlu1 %v2311_v3  ;;  %v4950_v44 = vpop.f32.mrf.mxu0 }
 0x1b4   :  { %v295_v33 = vadd.f32 %v294_v24, %v293_v39  ;;  %v1200_v57 = vpop.f32.mrf.mxu1  ;;  %v4955_v3 = vpop.f32.mrf.mxu3  ;;  %v1754_v39 = vsub.f32 %v1327_v63, %v3983_v53 }
 0x1b5   :  { %v2091_v55 = vpop.xlane.xlu0 %2090  ;;  %v2067_v43 = vpop.xlane.xlu1 %2066 }
 0x1b6   :  { %v296_v60 = vrot.slane %v295_v33, 2  ;;  %2213 = vadd.xlane.f32.xlu2 %v2212_v11  ;;  %v2676_v50 = vperm.slane %v2067_v43, %v4623_v29  ;;  %v1730_v11 = vsub.f32 %v4899_v22, %v3983_v53  ;;  %v2691_v45 = vperm.slane %v2091_v55, %v4623_v29 }
 0x1b7   :  { %v2266_v22 = vsel %vm301_vm0, %v1896_v13, 0.0 }
 0x1b8   :  { %v297_v20 = vadd.f32 %v296_v60, %v295_v33  ;;  %v4944_v40 = vsel %vm2614_vm7, %v2676_v50, %v2675_v49  ;;  %v1914_v60 = vmul.f32 %v1754_v39, %v1754_v39  ;;  %v1890_v7 = vmul.f32 %v1730_v11, %v1730_v11 }
 0x1b9   :  { %v2133_v21 = vpop.xlane.xlu2 %2132  ;;  %v2314_v39 = vsel %vm301_vm0, %v1912_v10, 0.0 }
 0x1ba   :  { %2246 = vadd.xlane.f32.xlu0 %v2245_v9  ;;  %v2717_v46 = vperm.slane %v2133_v21, %v4576_v5  ;;  %v298_v31 = vrot.slane %v297_v20, 1  ;;  %2243 = vadd.xlane.f32.xlu1 %v2242_v32  ;;  %v4968_v9 = vpop.f32.mrf.mxu2  ;;  %v1141_v32 = vpop.f32.mrf.mxu0  ;;  %v2320_v21 = vsel %vm301_vm0, %v1914_v60, 0.0  ;;  %v2248_v48 = vsel %vm301_vm0, %v1890_v7, 0.0 }
 0x1bc   :  { %v2718_v42 = vsel %vm2606_vm5, %v2717_v46, %v4885_v12  ;;  %v299_v28 = vadd.f32 %v298_v31, %v297_v20  ;;  %v2290_v12 = vsel %vm301_vm0, %v1904_v41, 0.0  ;;  %v1203_v20 = vpop.f32.mrf.mxu1  ;;  %v1739_v46 = vsub.f32 %v1200_v57, %v3992_v61  ;;  %v4981_v31 = vpop.f32.mrf.mxu3 }
 0x1bd   :  { %v2118_v49 = vpop.xlane.xlu0 %2117  ;;  %v2720_v27 = vsel %vm2610_vm6, %v2719_v8, %v2718_v42  ;;  %v2139_v24 = vpop.xlane.xlu1 %2138  ;;  %v1737_v57 = vsub.f32 %v4896_v25, %v3961_v47  ;;  %v1733_v25 = vsub.f32 %v1141_v32, %v5473_v52 }
 0x1be   :  { %2237 = vadd.xlane.f32.xlu2 %v2236_v37  ;;  %3353 = vpush %v299_v28  ;;  %v2721_v54 = vperm.slane %v2139_v24, %v4623_v29  ;;  %v2708_v37 = vperm.slane %v2118_v49, %v4682_v0 }
 0x1bf   :  { %v1893_v7 = vmul.f32 %v1733_v25, %v1733_v25 }
 0x1c0   :  { %v4965_v33 = vsel %vm2614_vm7, %v2721_v54, %v2720_v27  ;;  %v1899_v27 = vmul.f32 %v1739_v46, %v1739_v46 }
 0x1c1   :  { %v2088_v63 = vpop.xlane.xlu2 %2087 }
 0x1c2   :  { %2294 = vadd.xlane.f32.xlu0 %v2293_v19  ;;  %v2689_v43 = vperm.slane %v2088_v63, %v4617_v38  ;;  %2291 = vadd.xlane.f32.xlu1 %v2290_v12  ;;  %v4996_v49 = vpop.f32.mrf.mxu2  ;;  %v2275_v11 = vsel %vm301_vm0, %v1899_v27, 0.0  ;;  %v1897_v12 = vmul.f32 %v1737_v57, %v1737_v57 }
 0x1c4   :  { %v2690_v55 = vsel %vm2610_vm6, %v2689_v43, %v4906_v17  ;;  %v1746_v17 = vsub.f32 %v4916_v34, %v3983_v53  ;;  %v1206_v63 = vpop.f32.mrf.mxu1  ;;  %v5008_v4 = vpop.f32.mrf.mxu3 }
 0x1c5   :  { %v4975_v50 = vpop.xlane.xlu0 %2144  ;;  %v2692_v62 = vsel %vm2614_vm7, %v2691_v45, %v2690_v55  ;;  %v2094_v8 = vpop.xlane.xlu1 %2093  ;;  %v2269_v55 = vsel %vm301_vm0, %v1897_v12, 0.0 }
 0x1c6   :  { %2267 = vadd.xlane.f32.xlu2 %v2266_v22  ;;  %v2693_v23 = vperm.slane %v2094_v8, %v4682_v0  ;;  %v1906_v24 = vmul.f32 %v1746_v17, %v1746_v17  ;;  %v5003_v45 = vpop.f32.mrf.mxu0  ;;  %v1741_v17 = vsub.f32 %v1206_v63, %v5473_v52 }
 0x1c8   :  { %v2694_v41 = vsel %vm2618_vm8, %v2693_v23, %v2692_v62  ;;  %v2296_v60 = vsel %vm301_vm0, %v1906_v24, 0.0  ;;  %v2257_v23 = vsel %vm301_vm0, %v1893_v7, 0.0  ;;  %v1901_v24 = vmul.f32 %v1741_v17, %v1741_v17 }
 0x1c9   :  { %v2115_v42 = vpop.xlane.xlu2 %2114 }
 0x1ca   :  { %2321 = vadd.xlane.f32.xlu0 %v2320_v21  ;;  %v2706_v28 = vperm.slane %v2115_v42, %v4623_v29  ;;  %2249 = vadd.xlane.f32.xlu1 %v2248_v48  ;;  %v2725_v21 = vperm.slane %v4975_v50, %v3753_v2  ;;  %v5022_v48 = vpop.f32.mrf.mxu2  ;;  %v1740_v50 = vsub.f32 %v1203_v20, %v5469_v6 }
 0x1cb   :  { %v1738_v20 = vsub.f32 %v4922_v58, %v3983_v53  ;;  %v1748_v58 = vsub.f32 %v4968_v9, %v5469_v6 }
 0x1cc   :  { %v2707_v34 = vsel %vm2614_vm7, %v2706_v28, %v4925_v18  ;;  %v1731_v18 = vsub.f32 %v4927_v35, %v3992_v61  ;;  %v1753_v35 = vsub.f32 %v4879_v56, %v3961_v47  ;;  %v5026_v42 = vpop.f32.mrf.mxu1 }
 0x1cd   :  { %v4994_v19 = vpop.xlane.xlu0 %2216  ;;  %v2709_v13 = vsel %vm2618_vm8, %v2708_v37, %v2707_v34  ;;  %v4999_v54 = vpop.xlane.xlu1 %2192 }
 0x1ce   :  { %2315 = vadd.xlane.f32.xlu2 %v2314_v39  ;;  %v1891_v62 = vmul.f32 %v1731_v18, %v1731_v18  ;;  %v1913_v28 = vmul.f32 %v1753_v35, %v1753_v35  ;;  %v5034_v39 = vpop.f32.mrf.mxu0  ;;  %v1578_v34 = vpop.f32.mrf.mxu3  ;;  %v2770_v25 = vperm.slane %v4994_v19, %v3753_v2 }
 0x1d0   :  { %v2317_v12 = vsel %vm301_vm0, %v1913_v28, 0.0 }
 0x1d1   :  { %v2070_v43 = vpop.xlane.xlu2 %2069 }
 0x1d2   :  { %2276 = vadd.xlane.f32.xlu0 %v2275_v11  ;;  %v2678_v22 = vperm.slane %v2070_v43, %v4682_v0  ;;  %2297 = vadd.xlane.f32.xlu1 %v2296_v60  ;;  %v1900_v11 = vmul.f32 %v1740_v50, %v1740_v50  ;;  %v2281_v60 = vsel %vm301_vm0, %v1901_v24, 0.0  ;;  %v1783_v43 = vsub.f32 %v1578_v34, %v3888_v59 }
 0x1d4   :  { %v2679_v32 = vsel %vm2618_vm8, %v2678_v22, %v4944_v40 }
 0x1d5   :  { %v2172_v8 = vpop.xlane.xlu0 %2171  ;;  %v2912_v46 = vsel %vm2911_vm12, %v2679_v32, %v4790_v15  ;;  %v2148_v10 = vpop.xlane.xlu1 %2147  ;;  %v2251_v15 = vsel %vm301_vm0, %v1891_v62, 0.0 }
 0x1d6   :  { %2270 = vadd.xlane.f32.xlu2 %v2269_v55  ;;  %v2914_v40 = vsel %vm2913_vm13, %v2694_v41, %v2912_v46  ;;  %v2726_v37 = vperm.slane %v2148_v10, %v4539_v36  ;;  %v2741_v19 = vperm.slane %v2172_v8, %v4539_v36  ;;  %v2278_v55 = vsel %vm301_vm0, %v1900_v11, 0.0  ;;  %v5054_v62 = vpop.f32.mrf.mxu2  ;;  %v1386_v9 = vpop.f32.mrf.mxu0 }
 0x1d7   :  { %v2916_v56 = vsel %vm2915_vm1, %v2709_v13, %v2914_v40  ;;  %v1943_v10 = vmul.f32 %v1783_v43, %v1783_v43  ;;  %v1908_v8 = vmul.f32 %v1748_v58, %v1748_v58  ;;  %v1732_v58 = vsub.f32 %v4950_v44, %v5469_v6 }
 0x1d8   :  { %v5032_v27 = vsel %vm2594_vm2, %v2726_v37, %v2725_v21  ;;  %v1448_v21 = vpop.f32.mrf.mxu1 }
 0x1d9   :  { %v2142_v57 = vpop.xlane.xlu2 %2141  ;;  %v2407_v50 = vsel %vm301_vm0, %v1943_v10, 0.0 }
 0x1da   :  { %2258 = vadd.xlane.f32.xlu0 %v2257_v23  ;;  %v2723_v41 = vperm.slane %v2142_v57, %v4682_v0  ;;  %2252 = vadd.xlane.f32.xlu1 %v2251_v15  ;;  %v1747_v23 = vsub.f32 %v4940_v14, %v3992_v61  ;;  %v1760_v15 = vsub.f32 %v1386_v9, %v3950_v51 }
 0x1db   :  { %v1767_v14 = vsub.f32 %v1448_v21, %v3888_v59 }
 0x1dc   :  { %v2724_v63 = vsel %vm2618_vm8, %v2723_v41, %v4965_v33  ;;  %v1898_v33 = vmul.f32 %v1738_v20, %v1738_v20  ;;  %v1907_v28 = vmul.f32 %v1747_v23, %v1747_v23  ;;  %v2302_v41 = vsel %vm301_vm0, %v1908_v8, 0.0 }
 0x1dd   :  { %v2199_v13 = vpop.xlane.xlu0 %2198  ;;  %v2220_v18 = vpop.xlane.xlu1 %2219  ;;  %v5047_v22 = vsel %vm2917_vm14, %v2724_v63, %v2916_v56  ;;  %v2755_v20 = vperm.slane %v4999_v54, %v3753_v2  ;;  %v1892_v23 = vmul.f32 %v1732_v58, %v1732_v58 }
 0x1de   :  { %2318 = vadd.xlane.f32.xlu2 %v2317_v12  ;;  %v2771_v7 = vperm.slane %v2220_v18, %v4539_v36  ;;  %v2272_v37 = vsel %vm301_vm0, %v1898_v33, 0.0  ;;  %v2758_v24 = vperm.slane %v2199_v13, %v4552_v16  ;;  %v1920_v12 = vmul.f32 %v1760_v15, %v1760_v15  ;;  %v1516_v18 = vpop.f32.mrf.mxu2  ;;  %v1581_v54 = vpop.f32.mrf.mxu3 }
 0x1df   :  { %v2299_v63 = vsel %vm301_vm0, %v1907_v28, 0.0  ;;  %v1784_v10 = vsub.f32 %v1581_v54, %v3950_v51 }
 0x1e0   :  { %v5057_v32 = vsel %vm2594_vm2, %v2771_v7, %v2770_v25  ;;  %v1927_v7 = vmul.f32 %v1767_v14, %v1767_v14  ;;  %v2338_v33 = vsel %vm301_vm0, %v1920_v12, 0.0 }
 0x1e1   :  { %v2169_v35 = vpop.xlane.xlu2 %2168 }
 0x1e2   :  { %2282 = vadd.xlane.f32.xlu0 %v2281_v60  ;;  %v2740_v46 = vperm.slane %v2169_v35, %v3753_v2  ;;  %2279 = vadd.xlane.f32.xlu1 %v2278_v55  ;;  %v5077_v60 = vpop.f32.mrf.mxu1  ;;  %v1776_v35 = vsub.f32 %v1516_v18, %v3950_v51 }
 0x1e4   :  { %v2742_v17 = vsel %vm2594_vm2, %v2741_v19, %v2740_v46  ;;  %v2359_v46 = vsel %vm301_vm0, %v1927_v7, 0.0 }
 0x1e5   :  { %v2154_v40 = vpop.xlane.xlu0 %2153  ;;  %v2175_v56 = vpop.xlane.xlu1 %2174 }
 0x1e6   :  { %2273 = vadd.xlane.f32.xlu2 %v2272_v37  ;;  %v2743_v57 = vperm.slane %v2175_v56, %v4552_v16  ;;  %v2730_v9 = vperm.slane %v2154_v40, %v4561_v26  ;;  %v1936_v56 = vmul.f32 %v1776_v35, %v1776_v35 }
 0x1e8   :  { %v5071_v34 = vsel %vm2598_vm3, %v2743_v57, %v2742_v17  ;;  %v1389_v17 = vpop.f32.mrf.mxu0  ;;  %v1944_v57 = vmul.f32 %v1784_v10, %v1784_v10 }
 0x1e9   :  { %v2196_v11 = vpop.xlane.xlu2 %2195 }
 0x1ea   :  { %2408 = vadd.xlane.f32.xlu0 %v2407_v50  ;;  %v2756_v25 = vperm.slane %v2196_v11, %v4539_v36  ;;  %2303 = vadd.xlane.f32.xlu1 %v2302_v41  ;;  %v1734_v50 = vsub.f32 %v5003_v45, %v5475_v1  ;;  %v2254_v41 = vsel %vm301_vm0, %v1892_v23, 0.0  ;;  %v1454_v14 = vpop.f32.mrf.mxu1  ;;  %v2386_v11 = vsel %vm301_vm0, %v1936_v56, 0.0 }
 0x1eb   :  { %v2410_v12 = vsel %vm301_vm0, %v1944_v57, 0.0 }
 0x1ec   :  { %v2757_v43 = vsel %vm2594_vm2, %v2756_v25, %v2755_v20  ;;  %v1761_v20 = vsub.f32 %v1389_v17, %v3961_v47  ;;  %v1894_v25 = vmul.f32 %v1734_v50, %v1734_v50 }
 0x1ed   :  { %v5080_v13 = vpop.xlane.xlu0 %2180  ;;  %v2759_v19 = vsel %vm2598_vm3, %v2758_v24, %v2757_v43  ;;  %v2202_v55 = vpop.xlane.xlu1 %2201 }
 0x1ee   :  { %2300 = vadd.xlane.f32.xlu2 %v2299_v63  ;;  %v2760_v21 = vperm.slane %v2202_v55, %v4561_v26  ;;  %v5111_v43 = vpop.f32.mrf.mxu2  ;;  %v1921_v58 = vmul.f32 %v1761_v20, %v1761_v20  ;;  %v2260_v54 = vsel %vm301_vm0, %v1894_v25, 0.0 }
 0x1ef   :  { %s3354_s1 = spop %3353 }
 0x1f0   :  { %v5092_v44 = vsel %vm2602_vm4, %v2760_v21, %v2759_v19  ;;  %v1759_v19 = vsub.f32 %v5034_v39, %v3888_v59  ;;  %v1392_v55 = vpop.f32.mrf.mxu0  ;;  %v2341_v23 = vsel %vm301_vm0, %v1921_v58, 0.0 }
 0x1f1   :  { %v2151_v8 = vpop.xlane.xlu2 %2150 }
 0x1f2   :  { %2339 = vadd.xlane.f32.xlu0 %v2338_v33  ;;  %v2728_v37 = vperm.slane %v2151_v8, %v4552_v16  ;;  %2360 = vadd.xlane.f32.xlu1 %v2359_v46  ;;  %v1584_v46 = vpop.f32.mrf.mxu3  ;;  %v1919_v8 = vmul.f32 %v1759_v19, %v1759_v19  ;;  %v1457_v56 = vpop.f32.mrf.mxu1 }
 0x1f3   :  { %v1785_v17 = vsub.f32 %v1584_v46, %v3961_v47 }
 0x1f4   :  { %v2729_v15 = vsel %vm2598_vm3, %v2728_v37, %v5032_v27  ;;  %v1769_v27 = vsub.f32 %v1454_v14, %v3961_v47  ;;  %v2747_v37 = vperm.slane %v5080_v13, %v4576_v5 }
 0x1f5   :  { %v5099_v28 = vpop.xlane.xlu0 %2228  ;;  %v2731_v40 = vsel %vm2602_vm4, %v2730_v9, %v2729_v15  ;;  %v2157_v24 = vpop.xlane.xlu1 %2156  ;;  %v1762_v9 = vsub.f32 %v1392_v55, %v3983_v53  ;;  %v1945_v13 = vmul.f32 %v1785_v17, %v1785_v17 }
 0x1f6   :  { %2255 = vadd.xlane.f32.xlu2 %v2254_v41  ;;  %v2732_v45 = vperm.slane %v2157_v24, %v4576_v5  ;;  %v1929_v21 = vmul.f32 %v1769_v27, %v1769_v27  ;;  %v2335_v41 = vsel %vm301_vm0, %v1919_v8, 0.0  ;;  %v1522_v14 = vpop.f32.mrf.mxu2 }
 0x1f7   :  { %v1922_v57 = vmul.f32 %v1762_v9, %v1762_v9 }
 0x1f8   :  { %v5109_v63 = vsel %vm2606_vm5, %v2732_v45, %v2731_v40  ;;  %v2365_v39 = vsel %vm301_vm0, %v1929_v21, 0.0  ;;  %v1775_v40 = vsub.f32 %v5054_v62, %v3888_v59  ;;  %v2413_v62 = vsel %vm301_vm0, %v1945_v13, 0.0  ;;  %v1395_v58 = vpop.f32.mrf.mxu0 }
 0x1f9   :  { %v2223_v18 = vpop.xlane.xlu2 %2222  ;;  %v2344_v45 = vsel %vm301_vm0, %v1922_v57, 0.0 }
 0x1fa   :  { %2387 = vadd.xlane.f32.xlu0 %v2386_v11  ;;  %v2773_v7 = vperm.slane %v2223_v18, %v4552_v16  ;;  %2411 = vadd.xlane.f32.xlu1 %v2410_v12  ;;  %v1778_v12 = vsub.f32 %v1522_v14, %v3983_v53  ;;  %v1935_v59 = vmul.f32 %v1775_v40, %v1775_v40  ;;  %v1587_v46 = vpop.f32.mrf.mxu3 }
 0x1fb   :  { %v1770_v18 = vsub.f32 %v1457_v56, %v3983_v53  ;;  %v1786_v56 = vsub.f32 %v1587_v46, %v3983_v53 }
 0x1fc   :  { %v2774_v33 = vsel %vm2598_vm3, %v2773_v7, %v5057_v32  ;;  %v1938_v55 = vmul.f32 %v1778_v12, %v1778_v12  ;;  %v2383_v21 = vsel %vm301_vm0, %v1935_v59, 0.0 }
 0x1fd   :  { %v5119_v35 = vpop.xlane.xlu0 %2207  ;;  %v2184_v10 = vpop.xlane.xlu1 %2183  ;;  %v1930_v8 = vmul.f32 %v1770_v18, %v1770_v18  ;;  %v1946_v14 = vmul.f32 %v1786_v56, %v1786_v56  ;;  %v1756_v56 = vsub.f32 %v4955_v3, %v5469_v6 }
 0x1fe   :  { %2261 = vadd.xlane.f32.xlu2 %v2260_v54  ;;  %v2749_v50 = vperm.slane %v2184_v10, %v4617_v38  ;;  %v5147_v10 = vpop.f32.mrf.mxu1  ;;  %v2764_v53 = vperm.slane %v5119_v35, %v4617_v38 }
 0x1ff   :  { %v2416_v18 = vsel %vm301_vm0, %v1946_v14, 0.0 }
 0x201   :  { %v2178_v32 = vpop.xlane.xlu2 %2177 }
 0x202   :  { %2342 = vadd.xlane.f32.xlu0 %v2341_v23  ;;  %v2745_v15 = vperm.slane %v2178_v32, %v4561_v26  ;;  %2366 = vadd.xlane.f32.xlu1 %v2365_v39  ;;  %v2392_v32 = vsel %vm301_vm0, %v1938_v55, 0.0 }
 0x204   :  { %v2746_v24 = vsel %vm2602_vm4, %v2745_v15, %v5071_v34  ;;  %v2777_v34 = vperm.slane %v5099_v28, %v4576_v5  ;;  %v1768_v28 = vsub.f32 %v5077_v60, %v3950_v51  ;;  %v1763_v15 = vsub.f32 %v1395_v58, %v3992_v61 }
 0x205   :  { %v2232_v11 = vpop.xlane.xlu0 %2231  ;;  %v2748_v20 = vsel %vm2606_vm5, %v2747_v37, %v2746_v24  ;;  %v2211_v25 = vpop.xlane.xlu1 %2210  ;;  %v1777_v24 = vsub.f32 %v5111_v43, %v3961_v47 }
 0x206   :  { %2336 = vadd.xlane.f32.xlu2 %v2335_v41  ;;  %v5138_v27 = vsel %vm2610_vm6, %v2749_v50, %v2748_v20  ;;  %v2779_v19 = vperm.slane %v2232_v11, %v4617_v38  ;;  %v1928_v57 = vmul.f32 %v1768_v28, %v1768_v28  ;;  %v2766_v60 = vperm.slane %v2211_v25, %v4623_v29  ;;  %v1398_v11 = vpop.f32.mrf.mxu0  ;;  %v1463_v59 = vpop.f32.mrf.mxu1 }
 0x207   :  { %v1923_v20 = vmul.f32 %v1763_v15, %v1763_v15  ;;  %v1764_v35 = vsub.f32 %v1398_v11, %v5469_v6  ;;  %v1937_v43 = vmul.f32 %v1777_v24, %v1777_v24 }
 0x208   :  { %v2362_v25 = vsel %vm301_vm0, %v1928_v57, 0.0 }
 0x209   :  { %v2226_v7 = vpop.xlane.xlu2 %2225  ;;  %v2389_v46 = vsel %vm301_vm0, %v1937_v43, 0.0 }
 0x20a   :  { %2345 = vadd.xlane.f32.xlu0 %v2344_v45  ;;  %v2775_v54 = vperm.slane %v2226_v7, %v4561_v26  ;;  %2414 = vadd.xlane.f32.xlu1 %v2413_v62 }
 0x20c   :  { %v2776_v23 = vsel %vm2602_vm4, %v2775_v54, %v2774_v33  ;;  %v2368_v33 = vsel %vm301_vm0, %v1930_v8, 0.0 }
 0x20d   :  { %v2163_v9 = vpop.xlane.xlu0 %2162  ;;  %v2778_v39 = vsel %vm2606_vm5, %v2777_v34, %v2776_v23  ;;  %v2235_v17 = vpop.xlane.xlu1 %2234  ;;  %v2347_v34 = vsel %vm301_vm0, %v1923_v20, 0.0 }
 0x20e   :  { %v2780_v37 = vsel %vm2610_vm6, %v2779_v19, %v2778_v39  ;;  %2384 = vadd.xlane.f32.xlu2 %v2383_v21  ;;  %v2781_v50 = vperm.slane %v2235_v17, %v4623_v29  ;;  %v2736_v7 = vperm.slane %v2163_v9, %v4623_v29  ;;  %v1525_v19 = vpop.f32.mrf.mxu2  ;;  %v1924_v21 = vmul.f32 %v1764_v35, %v1764_v35  ;;  %v1401_v11 = vpop.f32.mrf.mxu0 }
 0x20f   :  { %v1755_v39 = vsub.f32 %v4932_v30, %v3992_v61  ;;  %v1742_v30 = vsub.f32 %v5026_v42, %v5475_v1  ;;  %v1779_v35 = vsub.f32 %v1525_v19, %v3992_v61 }
 0x210   :  { %v5160_v40 = vsel %vm2614_vm7, %v2781_v50, %v2780_v37 }
 0x211   :  { %v2205_v51 = vpop.xlane.xlu2 %2204 }
 0x212   :  { %2393 = vadd.xlane.f32.xlu0 %v2392_v32  ;;  %v2762_v41 = vperm.slane %v2205_v51, %v4576_v5  ;;  %2369 = vadd.xlane.f32.xlu1 %v2368_v33  ;;  %v2350_v32 = vsel %vm301_vm0, %v1924_v21, 0.0  ;;  %v1771_v51 = vsub.f32 %v5147_v10, %v3992_v61 }
 0x214   :  { %v2763_v13 = vsel %vm2606_vm5, %v2762_v41, %v5092_v44  ;;  %v1772_v44 = vsub.f32 %v1463_v59, %v5469_v6  ;;  %v1916_v41 = vmul.f32 %v1756_v56, %v1756_v56 }
 0x215   :  { %v2190_v45 = vpop.xlane.xlu0 %2189  ;;  %v2765_v12 = vsel %vm2610_vm6, %v2764_v53, %v2763_v13  ;;  %v2166_v62 = vpop.xlane.xlu1 %2165  ;;  %v1902_v13 = vmul.f32 %v1742_v30, %v1742_v30 }
 0x216   :  { %2363 = vadd.xlane.f32.xlu2 %v2362_v25  ;;  %v2767_v47 = vsel %vm2614_vm7, %v2766_v60, %v2765_v12  ;;  %v2738_v54 = vperm.slane %v2166_v62, %v4682_v0  ;;  %v1932_v28 = vmul.f32 %v1772_v44, %v1772_v44  ;;  %v2753_v15 = vperm.slane %v2190_v45, %v4682_v0  ;;  %v1528_v60 = vpop.f32.mrf.mxu2 }
 0x217   :  { %v1780_v10 = vsub.f32 %v1528_v60, %v5469_v6  ;;  %v1931_v45 = vmul.f32 %v1771_v51, %v1771_v51  ;;  %v2326_v12 = vsel %vm301_vm0, %v1916_v41, 0.0  ;;  %v1404_v60 = vpop.f32.mrf.mxu0 }
 0x218   :  { %v2374_v50 = vsel %vm301_vm0, %v1932_v28, 0.0  ;;  %v1939_v28 = vmul.f32 %v1779_v35, %v1779_v35 }
 0x219   :  { %v2160_v58 = vpop.xlane.xlu2 %2159  ;;  %v1940_v62 = vmul.f32 %v1780_v10, %v1780_v10  ;;  %v2371_v43 = vsel %vm301_vm0, %v1931_v45, 0.0 }
 0x21a   :  { %2417 = vadd.xlane.f32.xlu0 %v2416_v18  ;;  %v2734_v55 = vperm.slane %v2160_v58, %v4617_v38  ;;  %2348 = vadd.xlane.f32.xlu1 %v2347_v34  ;;  %v2284_v18 = vsel %vm301_vm0, %v1902_v13, 0.0  ;;  %v1466_v13 = vpop.f32.mrf.mxu1 }
 0x21c   :  { %v2735_v23 = vsel %vm2610_vm6, %v2734_v55, %v5109_v63  ;;  %v1915_v63 = vmul.f32 %v1755_v39, %v1755_v39  ;;  %v1590_v55 = vpop.f32.mrf.mxu3  ;;  %v1757_v39 = vsub.f32 %v4981_v31, %v5473_v52 }
 0x21d   :  { %v2241_v8 = vpop.xlane.xlu0 %2240  ;;  %v2737_v9 = vsel %vm2614_vm7, %v2736_v7, %v2735_v23  ;;  %v5187_v37 = vpop.xlane.xlu1 %2264  ;;  %v2398_v23 = vsel %vm301_vm0, %v1940_v62, 0.0 }
 0x21e   :  { %v2739_v17 = vsel %vm2618_vm8, %v2738_v54, %v2737_v9  ;;  %2390 = vadd.xlane.f32.xlu2 %v2389_v46  ;;  %v2323_v24 = vsel %vm301_vm0, %v1915_v63, 0.0  ;;  %v2785_v58 = vperm.slane %v2241_v8, %v3753_v2  ;;  %v1787_v9 = vsub.f32 %v1590_v55, %v3992_v61 }
 0x21f   :  { %v2395_v63 = vsel %vm301_vm0, %v1939_v28, 0.0  ;;  %v1749_v61 = vsub.f32 %v4996_v49, %v5473_v52  ;;  %v1766_v49 = vsub.f32 %v1404_v60, %v5475_v1  ;;  %v2800_v45 = vperm.slane %v5187_v37, %v3753_v2 }
 0x220   :  { %v1947_v30 = vmul.f32 %v1787_v9, %v1787_v9 }
 0x221   :  { %v2187_v33 = vpop.xlane.xlu2 %2186 }
 0x222   :  { %2351 = vadd.xlane.f32.xlu0 %v2350_v32  ;;  %v2751_v57 = vperm.slane %v2187_v33, %v4623_v29  ;;  %2375 = vadd.xlane.f32.xlu1 %v2374_v50  ;;  %v1531_v32 = vpop.f32.mrf.mxu2 }
 0x224   :  { %v2752_v3 = vsel %vm2614_vm7, %v2751_v57, %v5138_v27  ;;  %v1765_v27 = vsub.f32 %v1401_v11, %v5473_v52  ;;  %v2419_v11 = vsel %vm301_vm0, %v1947_v30, 0.0 }
 0x225   :  { %v5201_v14 = vpop.xlane.xlu0 %2288  ;;  %v2754_v53 = vsel %vm2618_vm8, %v2753_v15, %v2752_v3  ;;  %v5205_v42 = vpop.xlane.xlu1 %2312  ;;  %v1917_v15 = vmul.f32 %v1757_v39, %v1757_v39 }
 0x226   :  { %2324 = vadd.xlane.f32.xlu2 %v2323_v24  ;;  %v2919_v20 = vsel %vm2905_vm9, %v2754_v53, %v2739_v17  ;;  %v1925_v7 = vmul.f32 %v1765_v27, %v1765_v27  ;;  %v2815_v57 = vperm.slane %v5201_v14, %v3753_v2  ;;  %v1781_v53 = vsub.f32 %v1531_v32, %v5473_v52 }
 0x227   :  { %v2329_v24 = vsel %vm301_vm0, %v1917_v15, 0.0  ;;  %v1909_v14 = vmul.f32 %v1749_v61, %v1749_v61 }
 0x228   :  { %v1941_v27 = vmul.f32 %v1781_v53, %v1781_v53 }
 0x229   :  { %v2214_v25 = vpop.xlane.xlu2 %2213 }
 0x22a   :  { %2327 = vadd.xlane.f32.xlu0 %v2326_v12  ;;  %v2768_v59 = vperm.slane %v2214_v25, %v4682_v0  ;;  %2285 = vadd.xlane.f32.xlu1 %v2284_v18  ;;  %v1534_v62 = vpop.f32.mrf.mxu2  ;;  %v1593_v18 = vpop.f32.mrf.mxu3  ;;  %v2401_v37 = vsel %vm301_vm0, %v1941_v27, 0.0 }
 0x22c   :  { %v2769_v34 = vsel %vm2618_vm8, %v2768_v59, %v2767_v47  ;;  %v2353_v47 = vsel %vm301_vm0, %v1925_v7, 0.0  ;;  %v1773_v59 = vsub.f32 %v1466_v13, %v5473_v52 }
 0x22d   :  { %v2247_v44 = vpop.xlane.xlu0 %2246  ;;  %v2920_v54 = vsel %vm2907_vm10, %v2769_v34, %v2919_v20  ;;  %v2244_v46 = vpop.xlane.xlu1 %2243  ;;  %v1926_v34 = vmul.f32 %v1766_v49, %v1766_v49  ;;  %v2932_v49 = vsel %vm301_vm0, %v5047_v22, 0.0 }
 0x22e   :  { %v2788_v21 = vperm.slane %v2247_v44, %v4552_v16  ;;  %2372 = vadd.xlane.f32.xlu2 %v2371_v43  ;;  %v2786_v19 = vperm.slane %v2244_v46, %v4539_v36  ;;  %v2305_v44 = vsel %vm301_vm0, %v1909_v14, 0.0  ;;  %v1933_v55 = vmul.f32 %v1773_v59, %v1773_v59 }
 0x22f   :  { %v1788_v46 = vsub.f32 %v1593_v18, %v5469_v6  ;;  %v1750_v6 = vsub.f32 %v5022_v48, %v5475_v1  ;;  %v1758_v59 = vsub.f32 %v5008_v4, %v5475_v1 }
 0x230   :  { %v2787_v8 = vsel %vm2594_vm2, %v2786_v19, %v2785_v58  ;;  %v1782_v58 = vsub.f32 %v1534_v62, %v5475_v1  ;;  %v2830_v19 = vperm.slane %v5205_v42, %v3753_v2  ;;  %v2377_v9 = vsel %vm301_vm0, %v1933_v55, 0.0 }
 0x231   :  { %v2238_v17 = vpop.xlane.xlu2 %2237  ;;  %v2789_v50 = vsel %vm2598_vm3, %v2788_v21, %v2787_v8  ;;  %v2356_v21 = vsel %vm301_vm0, %v1926_v34, 0.0  ;;  %v1948_v32 = vmul.f32 %v1788_v46, %v1788_v46  ;;  %v1910_v30 = vmul.f32 %v1750_v6, %v1750_v6 }
 0x232   :  { %2399 = vadd.xlane.f32.xlu0 %v2398_v23  ;;  %v2783_v56 = vperm.slane %v2238_v17, %v4682_v0  ;;  %2354 = vadd.xlane.f32.xlu1 %v2353_v47  ;;  %v1942_v47 = vmul.f32 %v1782_v58, %v1782_v58 }
 0x233   :  { %v2422_v15 = vsel %vm301_vm0, %v1948_v32, 0.0 }
 0x234   :  { %v2784_v31 = vsel %vm2618_vm8, %v2783_v56, %v5160_v40  ;;  %v1596_v56 = vpop.f32.mrf.mxu3 }
 0x235   :  { %v2295_v33 = vpop.xlane.xlu0 %2294  ;;  %v5236_v51 = vsel %vm2909_vm11, %v2784_v31, %v2920_v54  ;;  %v2292_v3 = vpop.xlane.xlu1 %2291  ;;  %v1789_v31 = vsub.f32 %v1596_v56, %v5473_v52 }
 0x236   :  { %v2818_v41 = vperm.slane %v2295_v33, %v4552_v16  ;;  %2396 = vadd.xlane.f32.xlu2 %v2395_v63  ;;  %v2816_v40 = vperm.slane %v2292_v3, %v4539_v36  ;;  %v2404_v63 = vsel %vm301_vm0, %v1942_v47, 0.0  ;;  %v1469_v33 = vpop.f32.mrf.mxu1 }
 0x237   :  { %v1774_v48 = vsub.f32 %v1469_v33, %v5475_v1  ;;  %v1949_v53 = vmul.f32 %v1789_v31, %v1789_v31 }
 0x238   :  { %v2817_v20 = vsel %vm2594_vm2, %v2816_v40, %v2815_v57  ;;  %v2308_v40 = vsel %vm301_vm0, %v1910_v30, 0.0 }
 0x239   :  { %v2268_v10 = vpop.xlane.xlu2 %2267  ;;  %v2819_v25 = vsel %vm2598_vm3, %v2818_v41, %v2817_v20  ;;  %v2425_v13 = vsel %vm301_vm0, %v1949_v53, 0.0 }
 0x23a   :  { %2330 = vadd.xlane.f32.xlu0 %v2329_v24  ;;  %v2801_v12 = vperm.slane %v2268_v10, %v4539_v36  ;;  %2420 = vadd.xlane.f32.xlu1 %v2419_v11  ;;  %v1934_v11 = vmul.f32 %v1774_v48, %v1774_v48 }
 0x23c   :  { %v2802_v35 = vsel %vm2594_vm2, %v2801_v12, %v2800_v45  ;;  %v2380_v12 = vsel %vm301_vm0, %v1934_v11, 0.0  ;;  %v1599_v18 = vpop.f32.mrf.mxu3 }
 0x23d   :  { %v2322_v43 = vpop.xlane.xlu0 %2321  ;;  %v2250_v7 = vpop.xlane.xlu1 %2249  ;;  %v1790_v58 = vsub.f32 %v1599_v18, %v5475_v1 }
 0x23e   :  { %2306 = vadd.xlane.f32.xlu2 %v2305_v44  ;;  %v2790_v54 = vperm.slane %v2250_v7, %v4561_v26  ;;  %v2835_v45 = vperm.slane %v2322_v43, %v4561_v26 }
 0x240   :  { %v2791_v23 = vsel %vm2602_vm4, %v2790_v54, %v2789_v50 }
 0x241   :  { %v2316_v28 = vpop.xlane.xlu2 %2315 }
 0x242   :  { %2402 = vadd.xlane.f32.xlu0 %v2401_v37  ;;  %v2831_v39 = vperm.slane %v2316_v28, %v4539_v36  ;;  %2357 = vadd.xlane.f32.xlu1 %v2356_v21  ;;  %v1950_v28 = vmul.f32 %v1790_v58, %v1790_v58 }
 0x244   :  { %v2832_v8 = vsel %vm2594_vm2, %v2831_v39, %v2830_v19  ;;  %v2428_v1 = vsel %vm301_vm0, %v1950_v28, 0.0 }
 0x245   :  { %v2277_v17 = vpop.xlane.xlu0 %2276  ;;  %v2298_v50 = vpop.xlane.xlu1 %2297 }
 0x246   :  { %2378 = vadd.xlane.f32.xlu2 %v2377_v9  ;;  %v2820_v42 = vperm.slane %v2298_v50, %v4561_v26  ;;  %v2807_v7 = vperm.slane %v2277_v17, %v4576_v5 }
 0x248   :  { %v2821_v61 = vsel %vm2602_vm4, %v2820_v42, %v2819_v25 }
 0x249   :  { %v2271_v57 = vpop.xlane.xlu2 %2270 }
 0x24a   :  { %2405 = vadd.xlane.f32.xlu0 %v2404_v63  ;;  %v2803_v60 = vperm.slane %v2271_v57, %v4552_v16  ;;  %2423 = vadd.xlane.f32.xlu1 %v2422_v15 }
 0x24c   :  { %v2804_v41 = vsel %vm2598_vm3, %v2803_v60, %v2802_v35  ;;  %v1918_v35 = vmul.f32 %v1758_v59, %v1758_v59 }
 0x24d   :  { %v2259_v3 = vpop.xlane.xlu0 %2258  ;;  %v2253_v24 = vpop.xlane.xlu1 %2252 }
 0x24e   :  { %2309 = vadd.xlane.f32.xlu2 %v2308_v40  ;;  %v2792_v52 = vperm.slane %v2253_v24, %v4576_v5  ;;  %v2332_v21 = vsel %vm301_vm0, %v1918_v35, 0.0  ;;  %v2796_v63 = vperm.slane %v2259_v3, %v4623_v29 }
 0x250   :  { %v2793_v14 = vsel %vm2606_vm5, %v2792_v52, %v2791_v23 }
 0x251   :  { %v2319_v20 = vpop.xlane.xlu2 %2318 }
 0x252   :  { %2933 = vadd.xlane.f32.xlu0 %v2932_v49  ;;  %v2833_v10 = vperm.slane %v2319_v20, %v4552_v16  ;;  %2426 = vadd.xlane.f32.xlu1 %v2425_v13 }
 0x254   :  { %v2834_v27 = vsel %vm2598_vm3, %v2833_v10, %v2832_v8 }
 0x255   :  { %v2283_v25 = vpop.xlane.xlu0 %2282  ;;  %v5286_v22 = vsel %vm2602_vm4, %v2835_v45, %v2834_v27  ;;  %v2280_v62 = vpop.xlane.xlu1 %2279 }
 0x256   :  { %2381 = vadd.xlane.f32.xlu2 %v2380_v12  ;;  %v2809_v44 = vperm.slane %v2280_v62, %v4617_v38  ;;  %v2811_v37 = vperm.slane %v2283_v25, %v4623_v29 }
 0x259   :  { %v2274_v34 = vpop.xlane.xlu2 %2273 }
 0x25a   :  { %v2805_v43 = vperm.slane %v2274_v34, %v4561_v26 }
 0x25c   :  { %v2806_v4 = vsel %vm2602_vm4, %v2805_v43, %v2804_v41 }
 0x25d   :  { %v2409_v54 = vpop.xlane.xlu0 %2408  ;;  %v2808_v55 = vsel %vm2606_vm5, %v2807_v7, %v2806_v4  ;;  %v2304_v46 = vpop.xlane.xlu1 %2303 }
 0x25e   :  { %2333 = vadd.xlane.f32.xlu2 %v2332_v21  ;;  %v2810_v23 = vsel %vm2610_vm6, %v2809_v44, %v2808_v55  ;;  %v2824_v39 = vperm.slane %v2304_v46, %v4617_v38  ;;  %v2890_v31 = vperm.slane %v2409_v54, %v3753_v2 }
 0x25f   :  { %v2812_v19 = vsel %vm2614_vm7, %v2811_v37, %v2810_v23 }
 0x261   :  { %v2301_v47 = vpop.xlane.xlu2 %2300 }
 0x262   :  { %v2822_v9 = vperm.slane %v2301_v47, %v4576_v5 }
 0x264   :  { %v2823_v8 = vsel %vm2606_vm5, %v2822_v9, %v2821_v61 }
 0x265   :  { %v2340_v17 = vpop.xlane.xlu0 %2339  ;;  %v5303_v32 = vsel %vm2610_vm6, %v2824_v39, %v2823_v8  ;;  %v2361_v6 = vpop.xlane.xlu1 %2360 }
 0x266   :  { %2429 = vadd.xlane.f32.xlu2 %v2428_v1  ;;  %v2846_v24 = vperm.slane %v2340_v17, %v4539_v36  ;;  %v2860_v34 = vperm.slane %v2361_v6, %v3753_v2 }
 0x269   :  { %v2256_v56 = vpop.xlane.xlu2 %2255 }
 0x26a   :  { %v2794_v50 = vperm.slane %v2256_v56, %v4617_v38 }
 0x26c   :  { %v2795_v42 = vsel %vm2610_vm6, %v2794_v50, %v2793_v14 }
 0x26d   :  { %v2388_v15 = vpop.xlane.xlu0 %2387  ;;  %v2797_v33 = vsel %vm2614_vm7, %v2796_v63, %v2795_v42  ;;  %v2412_v30 = vpop.xlane.xlu1 %2411 }
 0x26e   :  { %v2891_v61 = vperm.slane %v2412_v30, %v4539_v36  ;;  %v2876_v12 = vperm.slane %v2388_v15, %v4539_v36 }
 0x270   :  { %v2892_v57 = vsel %vm2594_vm2, %v2891_v61, %v2890_v31 }
 0x271   :  { %v2262_v60 = vpop.xlane.xlu2 %2261 }
 0x272   :  { %v2798_v48 = vperm.slane %v2262_v60, %v4682_v0 }
 0x274   :  { %v2799_v41 = vsel %vm2618_vm8, %v2798_v48, %v2797_v33 }
 0x275   :  { %v2343_v53 = vpop.xlane.xlu0 %2342  ;;  %v2922_v3 = vsel %vm2911_vm12, %v2799_v41, %v5236_v51  ;;  %v2367_v40 = vpop.xlane.xlu1 %2366 }
 0x276   :  { %v2848_v52 = vperm.slane %v2343_v53, %v4552_v16  ;;  %v2863_v43 = vperm.slane %v2367_v40, %v4552_v16 }
 0x279   :  { %v2337_v11 = vpop.xlane.xlu2 %2336 }
 0x27a   :  { %v2845_v49 = vperm.slane %v2337_v11, %v3753_v2 }
 0x27c   :  { %v2847_v13 = vsel %vm2594_vm2, %v2846_v24, %v2845_v49 }
 0x27d   :  { %v5320_v14 = vpop.xlane.xlu0 %2345  ;;  %v2849_v20 = vsel %vm2598_vm3, %v2848_v52, %v2847_v13  ;;  %v2415_v10 = vpop.xlane.xlu1 %2414 }
 0x27e   :  { %v2893_v45 = vperm.slane %v2415_v10, %v4552_v16  ;;  %v2850_v41 = vperm.slane %v5320_v14, %v4561_v26 }
 0x280   :  { %v5326_v51 = vsel %vm2598_vm3, %v2893_v45, %v2892_v57 }
 0x281   :  { %v2385_v27 = vpop.xlane.xlu2 %2384 }
 0x282   :  { %v2875_v25 = vperm.slane %v2385_v27, %v3753_v2  ;;  %v2851_v27 = vsel %vm2602_vm4, %v2850_v41, %v2849_v20 }
 0x284   :  { %v2877_v59 = vsel %vm2594_vm2, %v2876_v12, %v2875_v25 }
 0x285   :  { %v2394_v62 = vpop.xlane.xlu0 %2393  ;;  %v2370_v18 = vpop.xlane.xlu1 %2369 }
 0x286   :  { %v2880_v61 = vperm.slane %v2394_v62, %v4561_v26 }
 0x289   :  { %v2364_v35 = vpop.xlane.xlu2 %2363 }
 0x28a   :  { %v2861_v44 = vperm.slane %v2364_v35, %v4539_v36 }
 0x28c   :  { %v2862_v7 = vsel %vm2594_vm2, %v2861_v44, %v2860_v34 }
 0x28d   :  { %v5334_v37 = vpop.xlane.xlu0 %2417  ;;  %v2864_v58 = vsel %vm2598_vm3, %v2863_v43, %v2862_v7  ;;  %v2349_v4 = vpop.xlane.xlu1 %2348 }
 0x28e   :  { %v2852_v40 = vperm.slane %v2349_v4, %v4576_v5 }
 0x291   :  { %v2391_v54 = vpop.xlane.xlu2 %2390 }
 0x292   :  { %v2878_v55 = vperm.slane %v2391_v54, %v4552_v16 }
 0x294   :  { %v2879_v21 = vsel %vm2598_vm3, %v2878_v55, %v2877_v59 }
 0x295   :  { %v2352_v46 = vpop.xlane.xlu0 %2351  ;;  %v2376_v23 = vpop.xlane.xlu1 %2375  ;;  %v2881_v13 = vsel %vm2602_vm4, %v2880_v61, %v2879_v21 }
 0x296   :  { %v2854_v52 = vperm.slane %v2352_v46, %v4617_v38  ;;  %v2869_v11 = vperm.slane %v2376_v23, %v4617_v38 }
 0x299   :  { %v2325_v28 = vpop.xlane.xlu2 %2324 }
 0x29a   :  { %v2837_v23 = vperm.slane %v2325_v28, %v4576_v5 }
 0x29d   :  { %v5339_v39 = vpop.xlane.xlu0 %2327  ;;  %v2286_v36 = vpop.xlane.xlu1 %2285 }
 0x29e   :  { %v2813_v47 = vperm.slane %v2286_v36, %v4682_v0 }
 0x2a0   :  { %v2814_v9 = vsel %vm2618_vm8, %v2813_v47, %v2812_v19  ;;  %v2865_v19 = vperm.slane %v2370_v18, %v4561_v26  ;;  %v2853_v18 = vsel %vm2606_vm5, %v2852_v40, %v2851_v27 }
 0x2a1   :  { %v2373_v1 = vpop.xlane.xlu2 %2372  ;;  %v2923_v8 = vsel %vm2913_vm13, %v2814_v9, %v2922_v3  ;;  %v2855_v44 = vsel %vm2610_vm6, %v2854_v52, %v2853_v18  ;;  %v2839_v9 = vperm.slane %v5339_v39, %v4617_v38 }
 0x2a2   :  { %v2867_v60 = vperm.slane %v2373_v1, %v4576_v5  ;;  %v2866_v49 = vsel %vm2602_vm4, %v2865_v19, %v2864_v58 }
 0x2a4   :  { %v2868_v10 = vsel %vm2606_vm5, %v2867_v60, %v2866_v49 }
 0x2a5   :  { %v2400_v17 = vpop.xlane.xlu0 %2399  ;;  %v2355_v56 = vpop.xlane.xlu1 %2354  ;;  %v2870_v43 = vsel %vm2610_vm6, %v2869_v11, %v2868_v10 }
 0x2a6   :  { %v2884_v14 = vperm.slane %v2400_v17, %v4617_v38  ;;  %v2856_v45 = vperm.slane %v2355_v56, %v4623_v29  ;;  %v2838_v17 = vsel %vm2606_vm5, %v2837_v23, %v5286_v22  ;;  %v5476_v23 = vld [vmem:[#allocation9_spill] sm:$0xff] }
 0x2a7   :  { %v2840_v56 = vsel %vm2610_vm6, %v2839_v9, %v2838_v17 }
 0x2a8   :  { %v2857_v20 = vsel %vm2614_vm7, %v2856_v45, %v2855_v44 }
 0x2a9   :  { %v2397_v6 = vpop.xlane.xlu2 %2396 }
 0x2aa   :  { %v2882_v53 = vperm.slane %v2397_v6, %v4576_v5 }
 0x2ac   :  { %v2883_v25 = vsel %vm2606_vm5, %v2882_v53, %v2881_v13 }
 0x2ad   :  { %v2331_v16 = vpop.xlane.xlu0 %2330  ;;  %v5344_v63 = vpop.xlane.xlu1 %2420  ;;  %v2885_v4 = vsel %vm2610_vm6, %v2884_v14, %v2883_v25 }
 0x2b1   :  { %v2307_v50 = vpop.xlane.xlu2 %2306 }
 0x2b2   :  { %v2826_v31 = vperm.slane %v2307_v50, %v4623_v29 }
 0x2b4   :  { %v2827_v48 = vsel %vm2614_vm7, %v2826_v31, %v5303_v32  ;;  %v2897_v31 = vperm.slane %v5344_v63, %v4576_v5 }
 0x2b5   :  { %v2403_v15 = vpop.xlane.xlu0 %2402  ;;  %v2358_v33 = vpop.xlane.xlu1 %2357 }
 0x2b6   :  { %v2886_v59 = vperm.slane %v2403_v15, %v4623_v29  ;;  %v2858_v62 = vperm.slane %v2358_v33, %v4682_v0 }
 0x2b8   :  { %v2887_v55 = vsel %vm2614_vm7, %v2886_v59, %v2885_v4  ;;  %v2859_v21 = vsel %vm2618_vm8, %v2858_v62, %v2857_v20 }
 0x2b9   :  { %v2379_v42 = vpop.xlane.xlu2 %2378 }
 0x2ba   :  { %v2871_v12 = vperm.slane %v2379_v42, %v4623_v29  ;;  %v2895_v42 = vperm.slane %v5334_v37, %v4561_v26 }
 0x2bc   :  { %v2872_v54 = vsel %vm2614_vm7, %v2871_v12, %v2870_v43  ;;  %v2896_v61 = vsel %vm2602_vm4, %v2895_v42, %v5326_v51 }
 0x2bd   :  { %v2406_v32 = vpop.xlane.xlu0 %2405  ;;  %v2424_v7 = vpop.xlane.xlu1 %2423  ;;  %v2898_v26 = vsel %vm2606_vm5, %v2897_v31, %v2896_v61  ;;  %v3002_v31 = vstv %s3354_s1 }
 0x2be   :  { %v2888_v35 = vperm.slane %v2406_v32, %v4682_v0  ;;  %v2899_v22 = vperm.slane %v2424_v7, %v4617_v38 }
 0x2c0   :  { %v2889_v36 = vsel %vm2618_vm8, %v2888_v35, %v2887_v55  ;;  %v2900_v19 = vsel %vm2610_vm6, %v2899_v22, %v2898_v26  ;;  %vm5477_vm6 = vcmp.lt.s32.totalorder %v5476_v23, 20 }
 0x2c1   :  { %v2310_v30 = vpop.xlane.xlu2 %2309 }
 0x2c2   :  { %v2828_v57 = vperm.slane %v2310_v30, %v4682_v0 }
 0x2c4   :  { %v2829_v3 = vsel %vm2618_vm8, %v2828_v57, %v2827_v48 }
 0x2c5   :  { %v2924_v24 = vsel %vm2915_vm1, %v2829_v3, %v2923_v8  ;;  %v2841_v8 = vperm.slane %v2331_v16, %v4623_v29  ;;  %v2427_v15 = vpop.xlane.xlu1 %2426 }
 0x2c6   :  { %v2901_v30 = vperm.slane %v2427_v15, %v4623_v29  ;;  %v2934_v29 = vpop.xlane.xlu0 %2933  ;;  %v5479_v15 = vld [vmem:[#allocation8_spill] sm:$0xff] }
 0x2c7   :  { %v2842_v28 = vsel %vm2614_vm7, %v2841_v8, %v2840_v56  ;;  %3378 = vrsqrt.f32 %v2934_v29  ;;  %vm2949_vm1 = vcmp.eq.f32.partialorder %v2934_v29, inf  ;;  %v2952_v43 = vand.u32 2147483648, %v2934_v29 }
 0x2c8   :  { %v2902_v5 = vsel %vm2614_vm7, %v2901_v30, %v2900_v19  ;;  %vm2951_vm3 = vcmp.eq.f32.partialorder %v2934_v29, 0.0  ;;  %vm5478_vm7 = vcmask 3072  }
 0x2c9   :  { %v2382_v34 = vpop.xlane.xlu2 %2381 }
 0x2ca   :  { %v2873_v58 = vperm.slane %v2382_v34, %v4682_v0 }
 0x2cc   :  { %v2874_v46 = vsel %vm2618_vm8, %v2873_v58, %v2872_v54 }
 0x2cd   :  { %v2926_v47 = vsel %vm2905_vm9, %v2874_v46, %v2859_v21  ;;  %v3379_v48 = vpop.eup %3378  ;;  %vm2996_vm9 = vcmp.eq.s32.totalorder %v3753_v2, 0 }
 0x2ce   :  { %v2927_v1 = vsel %vm2907_vm10, %v2889_v36, %v2926_v47  ;;  %v2943_v51 = vmul.f32 %v3379_v48, %v2934_v29 }
 0x2d0   :  { %v2944_v53 = vmul.f32 %v3379_v48, %v2943_v51 }
 0x2d1   :  { %v2334_v6 = vpop.xlane.xlu2 %2333 }
 0x2d2   :  { %v2843_v50 = vperm.slane %v2334_v6, %v4682_v0  ;;  %v2945_v40 = vmul.f32 0.5, %v2944_v53 }
 0x2d4   :  { %v2844_v39 = vsel %vm2618_vm8, %v2843_v50, %v2842_v28  ;;  %v2946_v11 = vsub.f32 1.5, %v2945_v40 }
 0x2d5   :  { %v2925_v16 = vsel %vm2917_vm14, %v2844_v39, %v2924_v24  ;;  %vm2938_vm14 = vcmask 519168  }
 0x2d6   :  { %v2935_v33 = vsel %vm301_vm0, %v2925_v16, 0.0  ;;  %v2947_v10 = vmul.f32 %v3379_v48, %v2946_v11 }
 0x2d7   :  { %2936 = vadd.xlane.f32.xlu1 %v2935_v33 }
 0x2d8   :  { %v2948_v25 = vmul.f32 %v2947_v10, %v2934_v29 }
 0x2d9   :  { %v2430_v37 = vpop.xlane.xlu2 %2429 }
 0x2da   :  { %v2903_v57 = vperm.slane %v2430_v37, %v4682_v0  ;;  %v2950_v34 = vsel %vm2949_vm1, %v2934_v29, %v2948_v25 }
 0x2db   :  { %v2953_v20 = vsel %vm2951_vm3, %v2952_v43, %v2950_v34 }
 0x2dc   :  { %v2904_v38 = vsel %vm2618_vm8, %v2903_v57, %v2902_v5  ;;  %v2981_v46 = vsel %vm285_vm15, %v2953_v20, 0.0  ;;  %vm2995_vm8 = vcmp.eq.s32.totalorder %v5479_v15, 0 }
 0x2dd   :  { %v2928_v63 = vsel %vm2909_vm11, %v2904_v38, %v2927_v1  ;;  %vm2997_vm11 = vmand %vm2995_vm8, %vm2996_vm9 }
 0x2de   :  { %v2939_v60 = vsel %vm2938_vm14, %v2928_v63, 0.0 }
 0x2df   :  { %2940 = vadd.xlane.f32.xlu2 %v2939_v60 }
 0x34a   :  { %v2937_v41 = vpop.xlane.xlu1 %2936 }
 0x34b   :  { %3380 = vrsqrt.f32 %v2937_v41  ;;  %vm2961_vm0 = vcmp.eq.f32.partialorder %v2937_v41, inf  ;;  %v2964_v18 = vand.u32 2147483648, %v2937_v41  ;;  %vm2963_vm2 = vcmp.eq.f32.partialorder %v2937_v41, 0.0 }
 0x351   :  { %v3381_v3 = vpop.eup %3380 }
 0x352   :  { %v2955_v24 = vmul.f32 %v3381_v3, %v2937_v41  ;;  %v2941_v0 = vpop.xlane.xlu2 %2940 }
 0x353   :  { %3382 = vrsqrt.f32 %v2941_v0  ;;  %vm2973_vm4 = vcmp.eq.f32.partialorder %v2941_v0, inf  ;;  %v2976_v4 = vand.u32 2147483648, %v2941_v0  ;;  %vm2975_vm5 = vcmp.eq.f32.partialorder %v2941_v0, 0.0 }
 0x354   :  { %v2956_v52 = vmul.f32 %v3381_v3, %v2955_v24 }
 0x356   :  { %v2957_v49 = vmul.f32 0.5, %v2956_v52 }
 0x358   :  { %v2958_v13 = vsub.f32 1.5, %v2957_v49 }
 0x359   :  { %v3383_v32 = vpop.eup %3382 }
 0x35a   :  { %v2959_v14 = vmul.f32 %v3381_v3, %v2958_v13  ;;  %v2967_v45 = vmul.f32 %v3383_v32, %v2941_v0 }
 0x35c   :  { %v2960_v12 = vmul.f32 %v2959_v14, %v2937_v41  ;;  %v2968_v27 = vmul.f32 %v3383_v32, %v2967_v45 }
 0x35e   :  { %v2969_v59 = vmul.f32 0.5, %v2968_v27  ;;  %v2962_v62 = vsel %vm2961_vm0, %v2937_v41, %v2960_v12 }
 0x35f   :  { %v2965_v7 = vsel %vm2963_vm2, %v2964_v18, %v2962_v62 }
 0x360   :  { %v2970_v35 = vsub.f32 1.5, %v2969_v59  ;;  %v2982_v54 = vsel %vm285_vm15, %v2965_v7, 0.0  ;;  %vm2998_vm15 = vcmp.eq.s32.totalorder %v3753_v2, 1 }
 0x361   :  { %v2983_v47 = vadd.f32 %v2982_v54, %v2981_v46  ;;  %vm2999_vm10 = vmand %vm2995_vm8, %vm2998_vm15 }
 0x362   :  { %v2971_v44 = vmul.f32 %v3383_v32, %v2970_v35 }
 0x364   :  { %v2972_v58 = vmul.f32 %v2971_v44, %v2941_v0 }
 0x366   :  { %v2974_v55 = vsel %vm2973_vm4, %v2941_v0, %v2972_v58 }
 0x367   :  { %v2977_v21 = vsel %vm2975_vm5, %v2976_v4, %v2974_v55 }
 0x368   :  { %v2980_v36 = vsel %vm5477_vm6, %v2977_v21, 0.0 }
 0x369   :  { %v2984_v9 = vsel %vm5478_vm7, %v2980_v36, 0.0 }
 0x36a   :  { %v2985_v1 = vadd.f32 %v2984_v9, %v2983_v47 }
 0x36c   :  { %2986 = vadd.xlane.f32.xlu0 %v2985_v1 }
 0x3df   :  { %v2987_v8 = vpop.xlane.xlu0 %2986 }
 0x3e0   :  { %v2988_v17 = vrot.slane %v2987_v8, 4 }
 0x3e2   :  { %v2989_v6 = vadd.f32 %v2988_v17, %v2987_v8 }
 0x3e4   :  { %v2990_v56 = vrot.slane %v2989_v6, 2 }
 0x3e6   :  { %v2991_v50 = vadd.f32 %v2990_v56, %v2989_v6 }
 0x3e8   :  { %v2992_v28 = vrot.slane %v2991_v50, 1 }
 0x3ea   :  { %v2993_v42 = vadd.f32 %v2992_v28, %v2991_v50 }
 0x3ec   :  { %3355 = vpush %v2993_v42 }
 0x41d   :  { %s3356_s7 = spop %3355 }
 0x41e   :  { %v3000_v39 = vstv %s3356_s7 }
 0x41f   :  { %v3001_v16 = vsel %vm2999_vm10, %v3000_v39, 0.0 }
 0x420   :  { %v3003_v22 = vsel %vm2997_vm11, %v3002_v31, %v3001_v16 }
 0x421   :  { %3004 = vst [vmem:[#allocation5] sm:$0xff] %v3003_v22 }
 0x422   :  { %3015 = dma.vmem_to_hbm [thread:$0]  %s3011_s30, 128, %s3013_s6, [#allocation4]  }
 0x423   :  { %3434 = dma.done.wait [#allocation4], 128  }
 0x424   :  { %3435 = vsyncadd [#allocation4], 4294967168 }
 0x425   :  { %3020 = vsyncpa [#allocation3], 1 }
 0x426   :  { %3021 = vsyncpa [#allocation4], 1 }

</bundles_post_ra>
